<compile_context>
chip_gen: v7x
topology: tpu7x:2x2x1
jax: 0.10.0
libtpu: 0.0.40
codegen_flags: <defaults>
</compile_context>

<pallas_src>
import numpy as np
import jax
import jax.numpy as jnp
from jax.experimental import pallas as pl
from jax.experimental.pallas import tpu as pltpu


def _make_cbam_kernel(tb, C, H, W, ks, d_off):
    HW = H * W
    pad = ks // 2

    def kernel(x_ref, w1t_ref, b1_ref, w2t_ref, b2_ref,
               wconv_ref, bn_ref, mask_ref, o_ref, buf_ref):
        # ---------------- channel attention ----------------
        xf = x_ref[...].astype(jnp.float32)                  # (TB, C, HW)

        avg = jnp.mean(xf, axis=2)                           # (TB, C)  C on lanes
        mxp = jnp.max(xf, axis=2)                            # (TB, C)
        pooled = jnp.concatenate([avg, mxp], axis=0)         # (2*TB, C)  fused MLP batch

        h = jnp.dot(pooled, w1t_ref[...],
                    preferred_element_type=jnp.float32) + b1_ref[...]
        h = jnp.maximum(h, 0.0)
        mlp = jnp.dot(h, w2t_ref[...],
                      preferred_element_type=jnp.float32) + b2_ref[...]   # (2*TB, C)
        att = mlp[:tb] + mlp[tb:]                            # MLP(avg) + MLP(max)
        gate = jax.nn.sigmoid(att)                           # (TB, C)

        co = xf * gate[:, :, None]                           # (TB, C, HW)  channel-attended

        # ---------------- spatial attention ----------------
        cmean = jnp.mean(co, axis=1)                         # (TB, HW)
        cmax = jnp.max(co, axis=1)                           # (TB, HW)

        # zero-padded flat copies in scratch: each (ky,kx) conv tap becomes a
        # lane-shifted 1-D slice; y-padding comes from the zeroed border,
        # x-wrap is removed by the precomputed column masks.
        buf_ref[...] = jnp.zeros_like(buf_ref)
        buf_ref[0, :, pl.ds(d_off, HW)] = cmean
        buf_ref[1, :, pl.ds(d_off, HW)] = cmax

        masks = mask_ref[...]                                # (ks, HW) column-validity

        acc = jnp.zeros((tb, HW), jnp.float32)
        for kx in range(ks):
            ox = kx - pad
            part = jnp.zeros((tb, HW), jnp.float32)
            for c in range(2):
                for ky in range(ks):
                    oy = ky - pad
                    wv = wconv_ref[c * ks * ks + ky * ks + kx]   # scalar from SMEM
                    start = d_off + oy * W + ox
                    part = part + wv * buf_ref[c, :, pl.ds(start, HW)]
            acc = acc + part * masks[kx:kx + 1, :]

        # eval-mode BatchNorm2d(1): pre-folded scale / shift scalars
        space = acc * bn_ref[0] + bn_ref[1]                  # (TB, HW)

        # ---------------- CBAM output ----------------
        o_ref[...] = (co * space[:, None, :]).astype(o_ref.dtype)

    return kernel


def cbam_forward(x, w1, b1, w2, b2, w_conv,
                 bn_gamma, bn_beta, bn_mean, bn_var, bn_eps=1e-5):
    """x: (B, C, H, W).  PyTorch conventions: w1 (HID, C), b1 (HID,), w2 (C, HID),
       b2 (C,), w_conv (1, 2, ks, ks), BatchNorm2d(1) params are shape (1,)."""
    B, C, H, W = x.shape
    HW = H * W
    HID = w1.shape[0]
    ks = w_conv.shape[-1]
    pad = ks // 2
    dtype = x.dtype

    # batch tiling: biggest divisor of B with a block <= ~2 MiB, but keep at
    # least 2 grid steps when B >= 2 (megacore sharding / DMA pipelining).
    itemsize = jnp.dtype(dtype).itemsize
    target_block_bytes = 2 * 1024 * 1024
    tb = 1
    for cand in range(1, B + 1):
        if B % cand != 0:
            continue
        if cand * C * HW * itemsize > target_block_bytes:
            continue
        if B >= 2 and B // cand < 2:
            continue
        tb = cand

    # scratch layout for the flattened zero-padded conv inputs
    d_off = ((pad * W + pad + 127) // 128) * 128
    l_buf = ((d_off + HW + pad * W + pad + 127) // 128) * 128

    # tiny parameter prep (native dtype kept for the big tensor x itself)
    x_flat = x.reshape(B, C, HW)                                 # free reshape
    w1t = jnp.asarray(w1, jnp.float32).T                         # (C, HID)
    b1r = jnp.asarray(b1, jnp.float32).reshape(1, HID)
    w2t = jnp.asarray(w2, jnp.float32).T                         # (HID, C)
    b2r = jnp.asarray(b2, jnp.float32).reshape(1, C)
    wconv_flat = jnp.asarray(w_conv, jnp.float32).reshape(-1)    # (2*ks*ks,)

    scale = jnp.asarray(bn_gamma, jnp.float32).reshape(()) / jnp.sqrt(
        jnp.asarray(bn_var, jnp.float32).reshape(()) + bn_eps)
    shift = (jnp.asarray(bn_beta, jnp.float32).reshape(())
             - jnp.asarray(bn_mean, jnp.float32).reshape(()) * scale)
    bn_params = jnp.stack([scale, shift])                        # (2,)

    # per-horizontal-offset column masks (host constants, zero x-wrap contributions)
    xs = np.arange(W)
    mask_rows = [np.tile(((xs + (kx - pad)) >= 0) & ((xs + (kx - pad)) < W), H)
                 for kx in range(ks)]
    mask_arr = jnp.asarray(np.stack(mask_rows), dtype=jnp.float32)   # (ks, HW)

    block_bytes = tb * C * HW * itemsize
    vmem_limit = int(min(64 * 1024 * 1024,
                         max(32 * 1024 * 1024, 12 * block_bytes)))

    kernel = _make_cbam_kernel(tb, C, H, W, ks, d_off)

    out = pl.pallas_call(
        kernel,
        out_shape=jax.ShapeDtypeStruct((B, C, HW), dtype),
        grid_spec=pltpu.PrefetchScalarGridSpec(
            num_scalar_prefetch=0,
            grid=(B // tb,),
            in_specs=[
                pl.BlockSpec((tb, C, HW), lambda b: (b, 0, 0)),
                pl.BlockSpec((C, HID), lambda b: (0, 0)),
                pl.BlockSpec((1, HID), lambda b: (0, 0)),
                pl.BlockSpec((HID, C), lambda b: (0, 0)),
                pl.BlockSpec((1, C), lambda b: (0, 0)),
                pl.BlockSpec(memory_space=pltpu.MemorySpace.SMEM),   # conv weights
                pl.BlockSpec(memory_space=pltpu.MemorySpace.SMEM),   # bn scale/shift
                pl.BlockSpec((ks, HW), lambda b: (0, 0)),
            ],
            out_specs=pl.BlockSpec((tb, C, HW), lambda b: (b, 0, 0)),
            scratch_shapes=[pltpu.VMEM((2, tb, l_buf), jnp.float32)],
        ),
        compiler_params=pltpu.CompilerParams(
            dimension_semantics=("parallel",),
            vmem_limit_bytes=vmem_limit,
        ),
    )(x_flat, w1t, b1r, w2t, b2r, wconv_flat, bn_params, mask_arr)

    return out.reshape(B, C, H, W)


def cbam_reference(x, w1, b1, w2, b2, w_conv,
                   bn_gamma, bn_beta, bn_mean, bn_var, bn_eps=1e-5):
    """Plain-JAX reference of the PyTorch CBAM forward (eval-mode BN)."""
    hi = jax.lax.Precision.HIGHEST
    avg = jnp.mean(x, axis=(2, 3))
    mx = jnp.max(x, axis=(2, 3))

    def mlp(v):
        h = jnp.maximum(jnp.dot(v, w1.T, precision=hi) + b1, 0.0)
        return jnp.dot(h, w2.T, precision=hi) + b2

    gate = jax.nn.sigmoid(mlp(avg) + mlp(mx))[:, :, None, None]
    chanel_out = x * gate

    cmean = jnp.mean(chanel_out, axis=1, keepdims=True)
    cmax = jnp.max(chanel_out, axis=1, keepdims=True)
    sp_in = jnp.concatenate([cmean, cmax], axis=1)               # (B, 2, H, W)
    pad = w_conv.shape[-1] // 2
    conv = jax.lax.conv_general_dilated(
        sp_in, w_conv, window_strides=(1, 1),
        padding=((pad, pad), (pad, pad)),
        dimension_numbers=("NCHW", "OIHW", "NCHW"), precision=hi)  # (B, 1, H, W)
    scale = bn_gamma.reshape(()) / jnp.sqrt(bn_var.reshape(()) + bn_eps)
    space = (conv - bn_mean.reshape(())) * scale + bn_beta.reshape(())
    return space * chanel_out


if __name__ == "__main__":
    B, C, H, W = 2, 32, 16, 16
    reduction_ratio = 16
    HID = C // reduction_ratio          # = 2
    ks = 7

    key = jax.random.PRNGKey(0)
    kx_, k1, k2, k3, k4, k5 = jax.random.split(key, 6)

    x = jax.random.normal(kx_, (B, C, H, W), dtype=jnp.float32)
    w1 = jax.random.normal(k1, (HID, C), dtype=jnp.float32) * 0.1
    b1 = jax.random.normal(k2, (HID,), dtype=jnp.float32) * 0.1
    w2 = jax.random.normal(k3, (C, HID), dtype=jnp.float32) * 0.1
    b2 = jax.random.normal(k4, (C,), dtype=jnp.float32) * 0.1
    w_conv = jax.random.normal(k5, (1, 2, ks, ks), dtype=jnp.float32) * 0.1

    # BatchNorm2d(1) defaults (eval mode): gamma=1, beta=0, running stats (0, 1)
    bn_gamma = jnp.ones((1,), jnp.float32)
    bn_beta = jnp.zeros((1,), jnp.float32)
    bn_mean = jnp.zeros((1,), jnp.float32)
    bn_var = jnp.ones((1,), jnp.float32)

    y = cbam_forward(x, w1, b1, w2, b2, w_conv, bn_gamma, bn_beta, bn_mean, bn_var)
    y = jax.block_until_ready(y)

    y_ref = cbam_reference(x, w1, b1, w2, b2, w_conv,
                           bn_gamma, bn_beta, bn_mean, bn_var)
    assert y.shape == (B, C, H, W)
    max_err = float(jnp.max(jnp.abs(y - y_ref)))
    assert jnp.allclose(y, y_ref, atol=1e-4, rtol=1e-4), (
        f"mismatch vs reference, max abs err = {max_err}")

    print("KERNEL_OK")
</pallas_src>

<mosaic_0001>
module attributes {stable_mosaic.version = 11 : i64} {
  func.func @kernel(%arg0: i32, %arg1: memref<1x32x256xf32, #tpu.memory_space<vmem>>, %arg2: memref<32x2xf32, #tpu.memory_space<vmem>>, %arg3: memref<1x2xf32, #tpu.memory_space<vmem>>, %arg4: memref<2x32xf32, #tpu.memory_space<vmem>>, %arg5: memref<1x32xf32, #tpu.memory_space<vmem>>, %arg6: memref<98xf32, #tpu.memory_space<smem>>, %arg7: memref<2xf32, #tpu.memory_space<smem>>, %arg8: memref<7x256xf32, #tpu.memory_space<vmem>>, %arg9: memref<1x32x256xf32, #tpu.memory_space<vmem>>, %arg10: memref<2x1x512xf32, #tpu.memory_space<vmem>>) attributes {dimension_semantics = [#tpu.dimension_semantics<parallel>], iteration_bounds = array<i64: 2>, scalar_prefetch = 0 : i64, scratch_operands = 1 : i64, tpu.core_type = #tpu.core_type<tc>, window_params = [{transform_indices = @transform_0, window_bounds = array<i64: 1, 32, 256>}, {pipeline_mode = #tpu.pipeline_mode<synchronous>, transform_indices = @transform_1, window_bounds = array<i64: 32, 2>}, {pipeline_mode = #tpu.pipeline_mode<synchronous>, transform_indices = @transform_2, window_bounds = array<i64: 1, 2>}, {pipeline_mode = #tpu.pipeline_mode<synchronous>, transform_indices = @transform_3, window_bounds = array<i64: 2, 32>}, {pipeline_mode = #tpu.pipeline_mode<synchronous>, transform_indices = @transform_4, window_bounds = array<i64: 1, 32>}, {transform_indices = @transform_5, window_bounds = array<i64: 98>}, {transform_indices = @transform_6, window_bounds = array<i64: 2>}, {pipeline_mode = #tpu.pipeline_mode<synchronous>, transform_indices = @transform_7, window_bounds = array<i64: 7, 256>}, {transform_indices = @transform_8, window_bounds = array<i64: 1, 32, 256>}]} {
    %c0 = arith.constant 0 : index
    %c0_0 = arith.constant 0 : index
    %c0_1 = arith.constant 0 : index
    %0 = vector.load %arg1[%c0, %c0_0, %c0_1] : memref<1x32x256xf32, #tpu.memory_space<vmem>>, vector<1x32x256xf32>
    %cst = arith.constant dense<0.000000e+00> : vector<1x32xf32>
    %1 = vector.multi_reduction <add>, %0, %cst [2] : vector<1x32x256xf32> to vector<1x32xf32>
    %cst_2 = arith.constant 2.560000e+02 : f32
    %2 = vector.broadcast %cst_2 : f32 to vector<1x32xf32>
    %3 = arith.divf %1, %2 : vector<1x32xf32>
    %cst_3 = arith.constant dense<0xFF800000> : vector<1x32xf32>
    %4 = vector.multi_reduction <maximumf>, %0, %cst_3 [2] : vector<1x32x256xf32> to vector<1x32xf32>
    %5 = tpu.concatenate %3, %4 in 0 : vector<1x32xf32>, vector<1x32xf32> -> vector<2x32xf32>
    %c0_4 = arith.constant 0 : index
    %c0_5 = arith.constant 0 : index
    %6 = vector.load %arg2[%c0_4, %c0_5] : memref<32x2xf32, #tpu.memory_space<vmem>>, vector<32x2xf32>
    %cst_6 = arith.constant dense<0.000000e+00> : vector<2x2xf32>
    %7 = tpu.matmul %5, %6, %cst_6 {dimension_numbers = #tpu.dot_dimension_numbers<[1], [0], [0], [1], [0, 0, 1, 1], [], []>} : vector<2x32xf32>, vector<32x2xf32>, vector<2x2xf32> -> vector<2x2xf32>
    %c0_7 = arith.constant 0 : index
    %c0_8 = arith.constant 0 : index
    %8 = vector.load %arg3[%c0_7, %c0_8] : memref<1x2xf32, #tpu.memory_space<vmem>>, vector<1x2xf32>
    %9 = vector.broadcast %8 : vector<1x2xf32> to vector<2x2xf32>
    %10 = arith.addf %7, %9 : vector<2x2xf32>
    %cst_9 = arith.constant 0.000000e+00 : f32
    %11 = vector.broadcast %cst_9 : f32 to vector<2x2xf32>
    %12 = arith.maximumf %10, %11 : vector<2x2xf32>
    %c0_10 = arith.constant 0 : index
    %c0_11 = arith.constant 0 : index
    %13 = vector.load %arg4[%c0_10, %c0_11] : memref<2x32xf32, #tpu.memory_space<vmem>>, vector<2x32xf32>
    %cst_12 = arith.constant dense<0.000000e+00> : vector<2x32xf32>
    %14 = tpu.matmul %12, %13, %cst_12 {dimension_numbers = #tpu.dot_dimension_numbers<[1], [0], [0], [1], [0, 0, 1, 1], [], []>} : vector<2x2xf32>, vector<2x32xf32>, vector<2x32xf32> -> vector<2x32xf32>
    %c0_13 = arith.constant 0 : index
    %c0_14 = arith.constant 0 : index
    %15 = vector.load %arg5[%c0_13, %c0_14] : memref<1x32xf32, #tpu.memory_space<vmem>>, vector<1x32xf32>
    %16 = vector.broadcast %15 : vector<1x32xf32> to vector<2x32xf32>
    %17 = arith.addf %14, %16 : vector<2x32xf32>
    %18 = vector.extract_strided_slice %17 {offsets = [0, 0], sizes = [1, 32], strides = [1, 1]} : vector<2x32xf32> to vector<1x32xf32>
    %19 = vector.extract_strided_slice %17 {offsets = [1, 0], sizes = [1, 32], strides = [1, 1]} : vector<2x32xf32> to vector<1x32xf32>
    %20 = arith.addf %18, %19 : vector<1x32xf32>
    %21 = arith.negf %20 : vector<1x32xf32>
    %22 = math.exp %21 : vector<1x32xf32>
    %cst_15 = arith.constant 1.000000e+00 : f32
    %23 = vector.broadcast %cst_15 : f32 to vector<1x32xf32>
    %24 = arith.addf %23, %22 : vector<1x32xf32>
    %25 = arith.divf %23, %24 : vector<1x32xf32>
    %26 = vector.shape_cast %25 : vector<1x32xf32> to vector<1x32x1xf32>
    %27 = vector.broadcast %26 : vector<1x32x1xf32> to vector<1x32x256xf32>
    %28 = arith.mulf %0, %27 : vector<1x32x256xf32>
    %cst_16 = arith.constant dense<0.000000e+00> : vector<1x256xf32>
    %29 = vector.multi_reduction <add>, %28, %cst_16 [1] : vector<1x32x256xf32> to vector<1x256xf32>
    %cst_17 = arith.constant 3.200000e+01 : f32
    %30 = vector.broadcast %cst_17 : f32 to vector<1x256xf32>
    %31 = arith.divf %29, %30 : vector<1x256xf32>
    %cst_18 = arith.constant dense<0xFF800000> : vector<1x256xf32>
    %32 = vector.multi_reduction <maximumf>, %28, %cst_18 [1] : vector<1x32x256xf32> to vector<1x256xf32>
    %cst_19 = arith.constant 0.000000e+00 : f32
    %33 = vector.broadcast %cst_19 : f32 to vector<2x1x512xf32>
    %c0_20 = arith.constant 0 : index
    %c0_21 = arith.constant 0 : index
    %c0_22 = arith.constant 0 : index
    %34 = vector.load %arg10[%c0_20, %c0_21, %c0_22] : memref<2x1x512xf32, #tpu.memory_space<vmem>>, vector<2x1x512xf32>
    tpu.vector_store %arg10[%c0_20, %c0_21, %c0_22], %33 {strides = array<i32>} : memref<2x1x512xf32, #tpu.memory_space<vmem>>, vector<2x1x512xf32>,
    %c0_23 = arith.constant 0 : index
    %c0_24 = arith.constant 0 : index
    %c128 = arith.constant 128 : index
    %35 = vector.load %arg10[%c0_23, %c0_24, %c128] : memref<2x1x512xf32, #tpu.memory_space<vmem>>, vector<1x1x256xf32>
    %36 = vector.shape_cast %35 : vector<1x1x256xf32> to vector<1x256xf32>
    %37 = vector.shape_cast %31 : vector<1x256xf32> to vector<1x1x256xf32>
    tpu.vector_store %arg10[%c0_23, %c0_24, %c128], %37 {strides = array<i32>} : memref<2x1x512xf32, #tpu.memory_space<vmem>>, vector<1x1x256xf32>,
    %c1 = arith.constant 1 : index
    %c0_25 = arith.constant 0 : index
    %c128_26 = arith.constant 128 : index
    %38 = vector.load %arg10[%c1, %c0_25, %c128_26] : memref<2x1x512xf32, #tpu.memory_space<vmem>>, vector<1x1x256xf32>
    %39 = vector.shape_cast %38 : vector<1x1x256xf32> to vector<1x256xf32>
    %40 = vector.shape_cast %32 : vector<1x256xf32> to vector<1x1x256xf32>
    tpu.vector_store %arg10[%c1, %c0_25, %c128_26], %40 {strides = array<i32>} : memref<2x1x512xf32, #tpu.memory_space<vmem>>, vector<1x1x256xf32>,
    %c0_27 = arith.constant 0 : index
    %c0_28 = arith.constant 0 : index
    %41 = vector.load %arg8[%c0_27, %c0_28] : memref<7x256xf32, #tpu.memory_space<vmem>>, vector<7x256xf32>
    %cst_29 = arith.constant 0.000000e+00 : f32
    %42 = vector.broadcast %cst_29 : f32 to vector<1x256xf32>
    %cst_30 = arith.constant 0.000000e+00 : f32
    %43 = vector.broadcast %cst_30 : f32 to vector<1x256xf32>
    %c0_31 = arith.constant 0 : index
    %44 = memref.load %arg6[%c0_31] : memref<98xf32, #tpu.memory_space<smem>>
    %c0_32 = arith.constant 0 : index
    %c0_33 = arith.constant 0 : index
    %c77 = arith.constant 77 : index
    %45 = vector.load %arg10[%c0_32, %c0_33, %c77] : memref<2x1x512xf32, #tpu.memory_space<vmem>>, vector<1x1x256xf32>
    %46 = vector.shape_cast %45 : vector<1x1x256xf32> to vector<1x256xf32>
    %47 = vector.broadcast %44 : f32 to vector<1x256xf32>
    %48 = arith.mulf %47, %46 : vector<1x256xf32>
    %49 = arith.addf %43, %48 : vector<1x256xf32>
    %c7 = arith.constant 7 : index
    %50 = memref.load %arg6[%c7] : memref<98xf32, #tpu.memory_space<smem>>
    %c0_34 = arith.constant 0 : index
    %c0_35 = arith.constant 0 : index
    %c93 = arith.constant 93 : index
    %51 = vector.load %arg10[%c0_34, %c0_35, %c93] : memref<2x1x512xf32, #tpu.memory_space<vmem>>, vector<1x1x256xf32>
    %52 = vector.shape_cast %51 : vector<1x1x256xf32> to vector<1x256xf32>
    %53 = vector.broadcast %50 : f32 to vector<1x256xf32>
    %54 = arith.mulf %53, %52 : vector<1x256xf32>
    %55 = arith.addf %49, %54 : vector<1x256xf32>
    %c14 = arith.constant 14 : index
    %56 = memref.load %arg6[%c14] : memref<98xf32, #tpu.memory_space<smem>>
    %c0_36 = arith.constant 0 : index
    %c0_37 = arith.constant 0 : index
    %c109 = arith.constant 109 : index
    %57 = vector.load %arg10[%c0_36, %c0_37, %c109] : memref<2x1x512xf32, #tpu.memory_space<vmem>>, vector<1x1x256xf32>
    %58 = vector.shape_cast %57 : vector<1x1x256xf32> to vector<1x256xf32>
    %59 = vector.broadcast %56 : f32 to vector<1x256xf32>
    %60 = arith.mulf %59, %58 : vector<1x256xf32>
    %61 = arith.addf %55, %60 : vector<1x256xf32>
    %c21 = arith.constant 21 : index
    %62 = memref.load %arg6[%c21] : memref<98xf32, #tpu.memory_space<smem>>
    %c0_38 = arith.constant 0 : index
    %c0_39 = arith.constant 0 : index
    %c125 = arith.constant 125 : index
    %63 = vector.load %arg10[%c0_38, %c0_39, %c125] : memref<2x1x512xf32, #tpu.memory_space<vmem>>, vector<1x1x256xf32>
    %64 = vector.shape_cast %63 : vector<1x1x256xf32> to vector<1x256xf32>
    %65 = vector.broadcast %62 : f32 to vector<1x256xf32>
    %66 = arith.mulf %65, %64 : vector<1x256xf32>
    %67 = arith.addf %61, %66 : vector<1x256xf32>
    %c28 = arith.constant 28 : index
    %68 = memref.load %arg6[%c28] : memref<98xf32, #tpu.memory_space<smem>>
    %c0_40 = arith.constant 0 : index
    %c0_41 = arith.constant 0 : index
    %c141 = arith.constant 141 : index
    %69 = vector.load %arg10[%c0_40, %c0_41, %c141] : memref<2x1x512xf32, #tpu.memory_space<vmem>>, vector<1x1x256xf32>
    %70 = vector.shape_cast %69 : vector<1x1x256xf32> to vector<1x256xf32>
    %71 = vector.broadcast %68 : f32 to vector<1x256xf32>
    %72 = arith.mulf %71, %70 : vector<1x256xf32>
    %73 = arith.addf %67, %72 : vector<1x256xf32>
    %c35 = arith.constant 35 : index
    %74 = memref.load %arg6[%c35] : memref<98xf32, #tpu.memory_space<smem>>
    %c0_42 = arith.constant 0 : index
    %c0_43 = arith.constant 0 : index
    %c157 = arith.constant 157 : index
    %75 = vector.load %arg10[%c0_42, %c0_43, %c157] : memref<2x1x512xf32, #tpu.memory_space<vmem>>, vector<1x1x256xf32>
    %76 = vector.shape_cast %75 : vector<1x1x256xf32> to vector<1x256xf32>
    %77 = vector.broadcast %74 : f32 to vector<1x256xf32>
    %78 = arith.mulf %77, %76 : vector<1x256xf32>
    %79 = arith.addf %73, %78 : vector<1x256xf32>
    %c42 = arith.constant 42 : index
    %80 = memref.load %arg6[%c42] : memref<98xf32, #tpu.memory_space<smem>>
    %c0_44 = arith.constant 0 : index
    %c0_45 = arith.constant 0 : index
    %c173 = arith.constant 173 : index
    %81 = vector.load %arg10[%c0_44, %c0_45, %c173] : memref<2x1x512xf32, #tpu.memory_space<vmem>>, vector<1x1x256xf32>
    %82 = vector.shape_cast %81 : vector<1x1x256xf32> to vector<1x256xf32>
    %83 = vector.broadcast %80 : f32 to vector<1x256xf32>
    %84 = arith.mulf %83, %82 : vector<1x256xf32>
    %85 = arith.addf %79, %84 : vector<1x256xf32>
    %c49 = arith.constant 49 : index
    %86 = memref.load %arg6[%c49] : memref<98xf32, #tpu.memory_space<smem>>
    %c1_46 = arith.constant 1 : index
    %c0_47 = arith.constant 0 : index
    %c77_48 = arith.constant 77 : index
    %87 = vector.load %arg10[%c1_46, %c0_47, %c77_48] : memref<2x1x512xf32, #tpu.memory_space<vmem>>, vector<1x1x256xf32>
    %88 = vector.shape_cast %87 : vector<1x1x256xf32> to vector<1x256xf32>
    %89 = vector.broadcast %86 : f32 to vector<1x256xf32>
    %90 = arith.mulf %89, %88 : vector<1x256xf32>
    %91 = arith.addf %85, %90 : vector<1x256xf32>
    %c56 = arith.constant 56 : index
    %92 = memref.load %arg6[%c56] : memref<98xf32, #tpu.memory_space<smem>>
    %c1_49 = arith.constant 1 : index
    %c0_50 = arith.constant 0 : index
    %c93_51 = arith.constant 93 : index
    %93 = vector.load %arg10[%c1_49, %c0_50, %c93_51] : memref<2x1x512xf32, #tpu.memory_space<vmem>>, vector<1x1x256xf32>
    %94 = vector.shape_cast %93 : vector<1x1x256xf32> to vector<1x256xf32>
    %95 = vector.broadcast %92 : f32 to vector<1x256xf32>
    %96 = arith.mulf %95, %94 : vector<1x256xf32>
    %97 = arith.addf %91, %96 : vector<1x256xf32>
    %c63 = arith.constant 63 : index
    %98 = memref.load %arg6[%c63] : memref<98xf32, #tpu.memory_space<smem>>
    %c1_52 = arith.constant 1 : index
    %c0_53 = arith.constant 0 : index
    %c109_54 = arith.constant 109 : index
    %99 = vector.load %arg10[%c1_52, %c0_53, %c109_54] : memref<2x1x512xf32, #tpu.memory_space<vmem>>, vector<1x1x256xf32>
    %100 = vector.shape_cast %99 : vector<1x1x256xf32> to vector<1x256xf32>
    %101 = vector.broadcast %98 : f32 to vector<1x256xf32>
    %102 = arith.mulf %101, %100 : vector<1x256xf32>
    %103 = arith.addf %97, %102 : vector<1x256xf32>
    %c70 = arith.constant 70 : index
    %104 = memref.load %arg6[%c70] : memref<98xf32, #tpu.memory_space<smem>>
    %c1_55 = arith.constant 1 : index
    %c0_56 = arith.constant 0 : index
    %c125_57 = arith.constant 125 : index
    %105 = vector.load %arg10[%c1_55, %c0_56, %c125_57] : memref<2x1x512xf32, #tpu.memory_space<vmem>>, vector<1x1x256xf32>
    %106 = vector.shape_cast %105 : vector<1x1x256xf32> to vector<1x256xf32>
    %107 = vector.broadcast %104 : f32 to vector<1x256xf32>
    %108 = arith.mulf %107, %106 : vector<1x256xf32>
    %109 = arith.addf %103, %108 : vector<1x256xf32>
    %c77_58 = arith.constant 77 : index
    %110 = memref.load %arg6[%c77_58] : memref<98xf32, #tpu.memory_space<smem>>
    %c1_59 = arith.constant 1 : index
    %c0_60 = arith.constant 0 : index
    %c141_61 = arith.constant 141 : index
    %111 = vector.load %arg10[%c1_59, %c0_60, %c141_61] : memref<2x1x512xf32, #tpu.memory_space<vmem>>, vector<1x1x256xf32>
    %112 = vector.shape_cast %111 : vector<1x1x256xf32> to vector<1x256xf32>
    %113 = vector.broadcast %110 : f32 to vector<1x256xf32>
    %114 = arith.mulf %113, %112 : vector<1x256xf32>
    %115 = arith.addf %109, %114 : vector<1x256xf32>
    %c84 = arith.constant 84 : index
    %116 = memref.load %arg6[%c84] : memref<98xf32, #tpu.memory_space<smem>>
    %c1_62 = arith.constant 1 : index
    %c0_63 = arith.constant 0 : index
    %c157_64 = arith.constant 157 : index
    %117 = vector.load %arg10[%c1_62, %c0_63, %c157_64] : memref<2x1x512xf32, #tpu.memory_space<vmem>>, vector<1x1x256xf32>
    %118 = vector.shape_cast %117 : vector<1x1x256xf32> to vector<1x256xf32>
    %119 = vector.broadcast %116 : f32 to vector<1x256xf32>
    %120 = arith.mulf %119, %118 : vector<1x256xf32>
    %121 = arith.addf %115, %120 : vector<1x256xf32>
    %c91 = arith.constant 91 : index
    %122 = memref.load %arg6[%c91] : memref<98xf32, #tpu.memory_space<smem>>
    %c1_65 = arith.constant 1 : index
    %c0_66 = arith.constant 0 : index
    %c173_67 = arith.constant 173 : index
    %123 = vector.load %arg10[%c1_65, %c0_66, %c173_67] : memref<2x1x512xf32, #tpu.memory_space<vmem>>, vector<1x1x256xf32>
    %124 = vector.shape_cast %123 : vector<1x1x256xf32> to vector<1x256xf32>
    %125 = vector.broadcast %122 : f32 to vector<1x256xf32>
    %126 = arith.mulf %125, %124 : vector<1x256xf32>
    %127 = arith.addf %121, %126 : vector<1x256xf32>
    %128 = vector.extract_strided_slice %41 {offsets = [0, 0], sizes = [1, 256], strides = [1, 1]} : vector<7x256xf32> to vector<1x256xf32>
    %129 = arith.mulf %127, %128 : vector<1x256xf32>
    %130 = arith.addf %42, %129 : vector<1x256xf32>
    %cst_68 = arith.constant 0.000000e+00 : f32
    %131 = vector.broadcast %cst_68 : f32 to vector<1x256xf32>
    %c1_69 = arith.constant 1 : index
    %132 = memref.load %arg6[%c1_69] : memref<98xf32, #tpu.memory_space<smem>>
    %c0_70 = arith.constant 0 : index
    %c0_71 = arith.constant 0 : index
    %c78 = arith.constant 78 : index
    %133 = vector.load %arg10[%c0_70, %c0_71, %c78] : memref<2x1x512xf32, #tpu.memory_space<vmem>>, vector<1x1x256xf32>
    %134 = vector.shape_cast %133 : vector<1x1x256xf32> to vector<1x256xf32>
    %135 = vector.broadcast %132 : f32 to vector<1x256xf32>
    %136 = arith.mulf %135, %134 : vector<1x256xf32>
    %137 = arith.addf %131, %136 : vector<1x256xf32>
    %c8 = arith.constant 8 : index
    %138 = memref.load %arg6[%c8] : memref<98xf32, #tpu.memory_space<smem>>
    %c0_72 = arith.constant 0 : index
    %c0_73 = arith.constant 0 : index
    %c94 = arith.constant 94 : index
    %139 = vector.load %arg10[%c0_72, %c0_73, %c94] : memref<2x1x512xf32, #tpu.memory_space<vmem>>, vector<1x1x256xf32>
    %140 = vector.shape_cast %139 : vector<1x1x256xf32> to vector<1x256xf32>
    %141 = vector.broadcast %138 : f32 to vector<1x256xf32>
    %142 = arith.mulf %141, %140 : vector<1x256xf32>
    %143 = arith.addf %137, %142 : vector<1x256xf32>
    %c15 = arith.constant 15 : index
    %144 = memref.load %arg6[%c15] : memref<98xf32, #tpu.memory_space<smem>>
    %c0_74 = arith.constant 0 : index
    %c0_75 = arith.constant 0 : index
    %c110 = arith.constant 110 : index
    %145 = vector.load %arg10[%c0_74, %c0_75, %c110] : memref<2x1x512xf32, #tpu.memory_space<vmem>>, vector<1x1x256xf32>
    %146 = vector.shape_cast %145 : vector<1x1x256xf32> to vector<1x256xf32>
    %147 = vector.broadcast %144 : f32 to vector<1x256xf32>
    %148 = arith.mulf %147, %146 : vector<1x256xf32>
    %149 = arith.addf %143, %148 : vector<1x256xf32>
    %c22 = arith.constant 22 : index
    %150 = memref.load %arg6[%c22] : memref<98xf32, #tpu.memory_space<smem>>
    %c0_76 = arith.constant 0 : index
    %c0_77 = arith.constant 0 : index
    %c126 = arith.constant 126 : index
    %151 = vector.load %arg10[%c0_76, %c0_77, %c126] : memref<2x1x512xf32, #tpu.memory_space<vmem>>, vector<1x1x256xf32>
    %152 = vector.shape_cast %151 : vector<1x1x256xf32> to vector<1x256xf32>
    %153 = vector.broadcast %150 : f32 to vector<1x256xf32>
    %154 = arith.mulf %153, %152 : vector<1x256xf32>
    %155 = arith.addf %149, %154 : vector<1x256xf32>
    %c29 = arith.constant 29 : index
    %156 = memref.load %arg6[%c29] : memref<98xf32, #tpu.memory_space<smem>>
    %c0_78 = arith.constant 0 : index
    %c0_79 = arith.constant 0 : index
    %c142 = arith.constant 142 : index
    %157 = vector.load %arg10[%c0_78, %c0_79, %c142] : memref<2x1x512xf32, #tpu.memory_space<vmem>>, vector<1x1x256xf32>
    %158 = vector.shape_cast %157 : vector<1x1x256xf32> to vector<1x256xf32>
    %159 = vector.broadcast %156 : f32 to vector<1x256xf32>
    %160 = arith.mulf %159, %158 : vector<1x256xf32>
    %161 = arith.addf %155, %160 : vector<1x256xf32>
    %c36 = arith.constant 36 : index
    %162 = memref.load %arg6[%c36] : memref<98xf32, #tpu.memory_space<smem>>
    %c0_80 = arith.constant 0 : index
    %c0_81 = arith.constant 0 : index
    %c158 = arith.constant 158 : index
    %163 = vector.load %arg10[%c0_80, %c0_81, %c158] : memref<2x1x512xf32, #tpu.memory_space<vmem>>, vector<1x1x256xf32>
    %164 = vector.shape_cast %163 : vector<1x1x256xf32> to vector<1x256xf32>
    %165 = vector.broadcast %162 : f32 to vector<1x256xf32>
    %166 = arith.mulf %165, %164 : vector<1x256xf32>
    %167 = arith.addf %161, %166 : vector<1x256xf32>
    %c43 = arith.constant 43 : index
    %168 = memref.load %arg6[%c43] : memref<98xf32, #tpu.memory_space<smem>>
    %c0_82 = arith.constant 0 : index
    %c0_83 = arith.constant 0 : index
    %c174 = arith.constant 174 : index
    %169 = vector.load %arg10[%c0_82, %c0_83, %c174] : memref<2x1x512xf32, #tpu.memory_space<vmem>>, vector<1x1x256xf32>
    %170 = vector.shape_cast %169 : vector<1x1x256xf32> to vector<1x256xf32>
    %171 = vector.broadcast %168 : f32 to vector<1x256xf32>
    %172 = arith.mulf %171, %170 : vector<1x256xf32>
    %173 = arith.addf %167, %172 : vector<1x256xf32>
    %c50 = arith.constant 50 : index
    %174 = memref.load %arg6[%c50] : memref<98xf32, #tpu.memory_space<smem>>
    %c1_84 = arith.constant 1 : index
    %c0_85 = arith.constant 0 : index
    %c78_86 = arith.constant 78 : index
    %175 = vector.load %arg10[%c1_84, %c0_85, %c78_86] : memref<2x1x512xf32, #tpu.memory_space<vmem>>, vector<1x1x256xf32>
    %176 = vector.shape_cast %175 : vector<1x1x256xf32> to vector<1x256xf32>
    %177 = vector.broadcast %174 : f32 to vector<1x256xf32>
    %178 = arith.mulf %177, %176 : vector<1x256xf32>
    %179 = arith.addf %173, %178 : vector<1x256xf32>
    %c57 = arith.constant 57 : index
    %180 = memref.load %arg6[%c57] : memref<98xf32, #tpu.memory_space<smem>>
    %c1_87 = arith.constant 1 : index
    %c0_88 = arith.constant 0 : index
    %c94_89 = arith.constant 94 : index
    %181 = vector.load %arg10[%c1_87, %c0_88, %c94_89] : memref<2x1x512xf32, #tpu.memory_space<vmem>>, vector<1x1x256xf32>
    %182 = vector.shape_cast %181 : vector<1x1x256xf32> to vector<1x256xf32>
    %183 = vector.broadcast %180 : f32 to vector<1x256xf32>
    %184 = arith.mulf %183, %182 : vector<1x256xf32>
    %185 = arith.addf %179, %184 : vector<1x256xf32>
    %c64 = arith.constant 64 : index
    %186 = memref.load %arg6[%c64] : memref<98xf32, #tpu.memory_space<smem>>
    %c1_90 = arith.constant 1 : index
    %c0_91 = arith.constant 0 : index
    %c110_92 = arith.constant 110 : index
    %187 = vector.load %arg10[%c1_90, %c0_91, %c110_92] : memref<2x1x512xf32, #tpu.memory_space<vmem>>, vector<1x1x256xf32>
    %188 = vector.shape_cast %187 : vector<1x1x256xf32> to vector<1x256xf32>
    %189 = vector.broadcast %186 : f32 to vector<1x256xf32>
    %190 = arith.mulf %189, %188 : vector<1x256xf32>
    %191 = arith.addf %185, %190 : vector<1x256xf32>
    %c71 = arith.constant 71 : index
    %192 = memref.load %arg6[%c71] : memref<98xf32, #tpu.memory_space<smem>>
    %c1_93 = arith.constant 1 : index
    %c0_94 = arith.constant 0 : index
    %c126_95 = arith.constant 126 : index
    %193 = vector.load %arg10[%c1_93, %c0_94, %c126_95] : memref<2x1x512xf32, #tpu.memory_space<vmem>>, vector<1x1x256xf32>
    %194 = vector.shape_cast %193 : vector<1x1x256xf32> to vector<1x256xf32>
    %195 = vector.broadcast %192 : f32 to vector<1x256xf32>
    %196 = arith.mulf %195, %194 : vector<1x256xf32>
    %197 = arith.addf %191, %196 : vector<1x256xf32>
    %c78_96 = arith.constant 78 : index
    %198 = memref.load %arg6[%c78_96] : memref<98xf32, #tpu.memory_space<smem>>
    %c1_97 = arith.constant 1 : index
    %c0_98 = arith.constant 0 : index
    %c142_99 = arith.constant 142 : index
    %199 = vector.load %arg10[%c1_97, %c0_98, %c142_99] : memref<2x1x512xf32, #tpu.memory_space<vmem>>, vector<1x1x256xf32>
    %200 = vector.shape_cast %199 : vector<1x1x256xf32> to vector<1x256xf32>
    %201 = vector.broadcast %198 : f32 to vector<1x256xf32>
    %202 = arith.mulf %201, %200 : vector<1x256xf32>
    %203 = arith.addf %197, %202 : vector<1x256xf32>
    %c85 = arith.constant 85 : index
    %204 = memref.load %arg6[%c85] : memref<98xf32, #tpu.memory_space<smem>>
    %c1_100 = arith.constant 1 : index
    %c0_101 = arith.constant 0 : index
    %c158_102 = arith.constant 158 : index
    %205 = vector.load %arg10[%c1_100, %c0_101, %c158_102] : memref<2x1x512xf32, #tpu.memory_space<vmem>>, vector<1x1x256xf32>
    %206 = vector.shape_cast %205 : vector<1x1x256xf32> to vector<1x256xf32>
    %207 = vector.broadcast %204 : f32 to vector<1x256xf32>
    %208 = arith.mulf %207, %206 : vector<1x256xf32>
    %209 = arith.addf %203, %208 : vector<1x256xf32>
    %c92 = arith.constant 92 : index
    %210 = memref.load %arg6[%c92] : memref<98xf32, #tpu.memory_space<smem>>
    %c1_103 = arith.constant 1 : index
    %c0_104 = arith.constant 0 : index
    %c174_105 = arith.constant 174 : index
    %211 = vector.load %arg10[%c1_103, %c0_104, %c174_105] : memref<2x1x512xf32, #tpu.memory_space<vmem>>, vector<1x1x256xf32>
    %212 = vector.shape_cast %211 : vector<1x1x256xf32> to vector<1x256xf32>
    %213 = vector.broadcast %210 : f32 to vector<1x256xf32>
    %214 = arith.mulf %213, %212 : vector<1x256xf32>
    %215 = arith.addf %209, %214 : vector<1x256xf32>
    %216 = vector.extract_strided_slice %41 {offsets = [1, 0], sizes = [1, 256], strides = [1, 1]} : vector<7x256xf32> to vector<1x256xf32>
    %217 = arith.mulf %215, %216 : vector<1x256xf32>
    %218 = arith.addf %130, %217 : vector<1x256xf32>
    %cst_106 = arith.constant 0.000000e+00 : f32
    %219 = vector.broadcast %cst_106 : f32 to vector<1x256xf32>
    %c2 = arith.constant 2 : index
    %220 = memref.load %arg6[%c2] : memref<98xf32, #tpu.memory_space<smem>>
    %c0_107 = arith.constant 0 : index
    %c0_108 = arith.constant 0 : index
    %c79 = arith.constant 79 : index
    %221 = vector.load %arg10[%c0_107, %c0_108, %c79] : memref<2x1x512xf32, #tpu.memory_space<vmem>>, vector<1x1x256xf32>
    %222 = vector.shape_cast %221 : vector<1x1x256xf32> to vector<1x256xf32>
    %223 = vector.broadcast %220 : f32 to vector<1x256xf32>
    %224 = arith.mulf %223, %222 : vector<1x256xf32>
    %225 = arith.addf %219, %224 : vector<1x256xf32>
    %c9 = arith.constant 9 : index
    %226 = memref.load %arg6[%c9] : memref<98xf32, #tpu.memory_space<smem>>
    %c0_109 = arith.constant 0 : index
    %c0_110 = arith.constant 0 : index
    %c95 = arith.constant 95 : index
    %227 = vector.load %arg10[%c0_109, %c0_110, %c95] : memref<2x1x512xf32, #tpu.memory_space<vmem>>, vector<1x1x256xf32>
    %228 = vector.shape_cast %227 : vector<1x1x256xf32> to vector<1x256xf32>
    %229 = vector.broadcast %226 : f32 to vector<1x256xf32>
    %230 = arith.mulf %229, %228 : vector<1x256xf32>
    %231 = arith.addf %225, %230 : vector<1x256xf32>
    %c16 = arith.constant 16 : index
    %232 = memref.load %arg6[%c16] : memref<98xf32, #tpu.memory_space<smem>>
    %c0_111 = arith.constant 0 : index
    %c0_112 = arith.constant 0 : index
    %c111 = arith.constant 111 : index
    %233 = vector.load %arg10[%c0_111, %c0_112, %c111] : memref<2x1x512xf32, #tpu.memory_space<vmem>>, vector<1x1x256xf32>
    %234 = vector.shape_cast %233 : vector<1x1x256xf32> to vector<1x256xf32>
    %235 = vector.broadcast %232 : f32 to vector<1x256xf32>
    %236 = arith.mulf %235, %234 : vector<1x256xf32>
    %237 = arith.addf %231, %236 : vector<1x256xf32>
    %c23 = arith.constant 23 : index
    %238 = memref.load %arg6[%c23] : memref<98xf32, #tpu.memory_space<smem>>
    %c0_113 = arith.constant 0 : index
    %c0_114 = arith.constant 0 : index
    %c127 = arith.constant 127 : index
    %239 = vector.load %arg10[%c0_113, %c0_114, %c127] : memref<2x1x512xf32, #tpu.memory_space<vmem>>, vector<1x1x256xf32>
    %240 = vector.shape_cast %239 : vector<1x1x256xf32> to vector<1x256xf32>
    %241 = vector.broadcast %238 : f32 to vector<1x256xf32>
    %242 = arith.mulf %241, %240 : vector<1x256xf32>
    %243 = arith.addf %237, %242 : vector<1x256xf32>
    %c30 = arith.constant 30 : index
    %244 = memref.load %arg6[%c30] : memref<98xf32, #tpu.memory_space<smem>>
    %c0_115 = arith.constant 0 : index
    %c0_116 = arith.constant 0 : index
    %c143 = arith.constant 143 : index
    %245 = vector.load %arg10[%c0_115, %c0_116, %c143] : memref<2x1x512xf32, #tpu.memory_space<vmem>>, vector<1x1x256xf32>
    %246 = vector.shape_cast %245 : vector<1x1x256xf32> to vector<1x256xf32>
    %247 = vector.broadcast %244 : f32 to vector<1x256xf32>
    %248 = arith.mulf %247, %246 : vector<1x256xf32>
    %249 = arith.addf %243, %248 : vector<1x256xf32>
    %c37 = arith.constant 37 : index
    %250 = memref.load %arg6[%c37] : memref<98xf32, #tpu.memory_space<smem>>
    %c0_117 = arith.constant 0 : index
    %c0_118 = arith.constant 0 : index
    %c159 = arith.constant 159 : index
    %251 = vector.load %arg10[%c0_117, %c0_118, %c159] : memref<2x1x512xf32, #tpu.memory_space<vmem>>, vector<1x1x256xf32>
    %252 = vector.shape_cast %251 : vector<1x1x256xf32> to vector<1x256xf32>
    %253 = vector.broadcast %250 : f32 to vector<1x256xf32>
    %254 = arith.mulf %253, %252 : vector<1x256xf32>
    %255 = arith.addf %249, %254 : vector<1x256xf32>
    %c44 = arith.constant 44 : index
    %256 = memref.load %arg6[%c44] : memref<98xf32, #tpu.memory_space<smem>>
    %c0_119 = arith.constant 0 : index
    %c0_120 = arith.constant 0 : index
    %c175 = arith.constant 175 : index
    %257 = vector.load %arg10[%c0_119, %c0_120, %c175] : memref<2x1x512xf32, #tpu.memory_space<vmem>>, vector<1x1x256xf32>
    %258 = vector.shape_cast %257 : vector<1x1x256xf32> to vector<1x256xf32>
    %259 = vector.broadcast %256 : f32 to vector<1x256xf32>
    %260 = arith.mulf %259, %258 : vector<1x256xf32>
    %261 = arith.addf %255, %260 : vector<1x256xf32>
    %c51 = arith.constant 51 : index
    %262 = memref.load %arg6[%c51] : memref<98xf32, #tpu.memory_space<smem>>
    %c1_121 = arith.constant 1 : index
    %c0_122 = arith.constant 0 : index
    %c79_123 = arith.constant 79 : index
    %263 = vector.load %arg10[%c1_121, %c0_122, %c79_123] : memref<2x1x512xf32, #tpu.memory_space<vmem>>, vector<1x1x256xf32>
    %264 = vector.shape_cast %263 : vector<1x1x256xf32> to vector<1x256xf32>
    %265 = vector.broadcast %262 : f32 to vector<1x256xf32>
    %266 = arith.mulf %265, %264 : vector<1x256xf32>
    %267 = arith.addf %261, %266 : vector<1x256xf32>
    %c58 = arith.constant 58 : index
    %268 = memref.load %arg6[%c58] : memref<98xf32, #tpu.memory_space<smem>>
    %c1_124 = arith.constant 1 : index
    %c0_125 = arith.constant 0 : index
    %c95_126 = arith.constant 95 : index
    %269 = vector.load %arg10[%c1_124, %c0_125, %c95_126] : memref<2x1x512xf32, #tpu.memory_space<vmem>>, vector<1x1x256xf32>
    %270 = vector.shape_cast %269 : vector<1x1x256xf32> to vector<1x256xf32>
    %271 = vector.broadcast %268 : f32 to vector<1x256xf32>
    %272 = arith.mulf %271, %270 : vector<1x256xf32>
    %273 = arith.addf %267, %272 : vector<1x256xf32>
    %c65 = arith.constant 65 : index
    %274 = memref.load %arg6[%c65] : memref<98xf32, #tpu.memory_space<smem>>
    %c1_127 = arith.constant 1 : index
    %c0_128 = arith.constant 0 : index
    %c111_129 = arith.constant 111 : index
    %275 = vector.load %arg10[%c1_127, %c0_128, %c111_129] : memref<2x1x512xf32, #tpu.memory_space<vmem>>, vector<1x1x256xf32>
    %276 = vector.shape_cast %275 : vector<1x1x256xf32> to vector<1x256xf32>
    %277 = vector.broadcast %274 : f32 to vector<1x256xf32>
    %278 = arith.mulf %277, %276 : vector<1x256xf32>
    %279 = arith.addf %273, %278 : vector<1x256xf32>
    %c72 = arith.constant 72 : index
    %280 = memref.load %arg6[%c72] : memref<98xf32, #tpu.memory_space<smem>>
    %c1_130 = arith.constant 1 : index
    %c0_131 = arith.constant 0 : index
    %c127_132 = arith.constant 127 : index
    %281 = vector.load %arg10[%c1_130, %c0_131, %c127_132] : memref<2x1x512xf32, #tpu.memory_space<vmem>>, vector<1x1x256xf32>
    %282 = vector.shape_cast %281 : vector<1x1x256xf32> to vector<1x256xf32>
    %283 = vector.broadcast %280 : f32 to vector<1x256xf32>
    %284 = arith.mulf %283, %282 : vector<1x256xf32>
    %285 = arith.addf %279, %284 : vector<1x256xf32>
    %c79_133 = arith.constant 79 : index
    %286 = memref.load %arg6[%c79_133] : memref<98xf32, #tpu.memory_space<smem>>
    %c1_134 = arith.constant 1 : index
    %c0_135 = arith.constant 0 : index
    %c143_136 = arith.constant 143 : index
    %287 = vector.load %arg10[%c1_134, %c0_135, %c143_136] : memref<2x1x512xf32, #tpu.memory_space<vmem>>, vector<1x1x256xf32>
    %288 = vector.shape_cast %287 : vector<1x1x256xf32> to vector<1x256xf32>
    %289 = vector.broadcast %286 : f32 to vector<1x256xf32>
    %290 = arith.mulf %289, %288 : vector<1x256xf32>
    %291 = arith.addf %285, %290 : vector<1x256xf32>
    %c86 = arith.constant 86 : index
    %292 = memref.load %arg6[%c86] : memref<98xf32, #tpu.memory_space<smem>>
    %c1_137 = arith.constant 1 : index
    %c0_138 = arith.constant 0 : index
    %c159_139 = arith.constant 159 : index
    %293 = vector.load %arg10[%c1_137, %c0_138, %c159_139] : memref<2x1x512xf32, #tpu.memory_space<vmem>>, vector<1x1x256xf32>
    %294 = vector.shape_cast %293 : vector<1x1x256xf32> to vector<1x256xf32>
    %295 = vector.broadcast %292 : f32 to vector<1x256xf32>
    %296 = arith.mulf %295, %294 : vector<1x256xf32>
    %297 = arith.addf %291, %296 : vector<1x256xf32>
    %c93_140 = arith.constant 93 : index
    %298 = memref.load %arg6[%c93_140] : memref<98xf32, #tpu.memory_space<smem>>
    %c1_141 = arith.constant 1 : index
    %c0_142 = arith.constant 0 : index
    %c175_143 = arith.constant 175 : index
    %299 = vector.load %arg10[%c1_141, %c0_142, %c175_143] : memref<2x1x512xf32, #tpu.memory_space<vmem>>, vector<1x1x256xf32>
    %300 = vector.shape_cast %299 : vector<1x1x256xf32> to vector<1x256xf32>
    %301 = vector.broadcast %298 : f32 to vector<1x256xf32>
    %302 = arith.mulf %301, %300 : vector<1x256xf32>
    %303 = arith.addf %297, %302 : vector<1x256xf32>
    %304 = vector.extract_strided_slice %41 {offsets = [2, 0], sizes = [1, 256], strides = [1, 1]} : vector<7x256xf32> to vector<1x256xf32>
    %305 = arith.mulf %303, %304 : vector<1x256xf32>
    %306 = arith.addf %218, %305 : vector<1x256xf32>
    %cst_144 = arith.constant 0.000000e+00 : f32
    %307 = vector.broadcast %cst_144 : f32 to vector<1x256xf32>
    %c3 = arith.constant 3 : index
    %308 = memref.load %arg6[%c3] : memref<98xf32, #tpu.memory_space<smem>>
    %c0_145 = arith.constant 0 : index
    %c0_146 = arith.constant 0 : index
    %c80 = arith.constant 80 : index
    %309 = vector.load %arg10[%c0_145, %c0_146, %c80] : memref<2x1x512xf32, #tpu.memory_space<vmem>>, vector<1x1x256xf32>
    %310 = vector.shape_cast %309 : vector<1x1x256xf32> to vector<1x256xf32>
    %311 = vector.broadcast %308 : f32 to vector<1x256xf32>
    %312 = arith.mulf %311, %310 : vector<1x256xf32>
    %313 = arith.addf %307, %312 : vector<1x256xf32>
    %c10 = arith.constant 10 : index
    %314 = memref.load %arg6[%c10] : memref<98xf32, #tpu.memory_space<smem>>
    %c0_147 = arith.constant 0 : index
    %c0_148 = arith.constant 0 : index
    %c96 = arith.constant 96 : index
    %315 = vector.load %arg10[%c0_147, %c0_148, %c96] : memref<2x1x512xf32, #tpu.memory_space<vmem>>, vector<1x1x256xf32>
    %316 = vector.shape_cast %315 : vector<1x1x256xf32> to vector<1x256xf32>
    %317 = vector.broadcast %314 : f32 to vector<1x256xf32>
    %318 = arith.mulf %317, %316 : vector<1x256xf32>
    %319 = arith.addf %313, %318 : vector<1x256xf32>
    %c17 = arith.constant 17 : index
    %320 = memref.load %arg6[%c17] : memref<98xf32, #tpu.memory_space<smem>>
    %c0_149 = arith.constant 0 : index
    %c0_150 = arith.constant 0 : index
    %c112 = arith.constant 112 : index
    %321 = vector.load %arg10[%c0_149, %c0_150, %c112] : memref<2x1x512xf32, #tpu.memory_space<vmem>>, vector<1x1x256xf32>
    %322 = vector.shape_cast %321 : vector<1x1x256xf32> to vector<1x256xf32>
    %323 = vector.broadcast %320 : f32 to vector<1x256xf32>
    %324 = arith.mulf %323, %322 : vector<1x256xf32>
    %325 = arith.addf %319, %324 : vector<1x256xf32>
    %c24 = arith.constant 24 : index
    %326 = memref.load %arg6[%c24] : memref<98xf32, #tpu.memory_space<smem>>
    %c0_151 = arith.constant 0 : index
    %c0_152 = arith.constant 0 : index
    %c128_153 = arith.constant 128 : index
    %327 = vector.load %arg10[%c0_151, %c0_152, %c128_153] : memref<2x1x512xf32, #tpu.memory_space<vmem>>, vector<1x1x256xf32>
    %328 = vector.shape_cast %327 : vector<1x1x256xf32> to vector<1x256xf32>
    %329 = vector.broadcast %326 : f32 to vector<1x256xf32>
    %330 = arith.mulf %329, %328 : vector<1x256xf32>
    %331 = arith.addf %325, %330 : vector<1x256xf32>
    %c31 = arith.constant 31 : index
    %332 = memref.load %arg6[%c31] : memref<98xf32, #tpu.memory_space<smem>>
    %c0_154 = arith.constant 0 : index
    %c0_155 = arith.constant 0 : index
    %c144 = arith.constant 144 : index
    %333 = vector.load %arg10[%c0_154, %c0_155, %c144] : memref<2x1x512xf32, #tpu.memory_space<vmem>>, vector<1x1x256xf32>
    %334 = vector.shape_cast %333 : vector<1x1x256xf32> to vector<1x256xf32>
    %335 = vector.broadcast %332 : f32 to vector<1x256xf32>
    %336 = arith.mulf %335, %334 : vector<1x256xf32>
    %337 = arith.addf %331, %336 : vector<1x256xf32>
    %c38 = arith.constant 38 : index
    %338 = memref.load %arg6[%c38] : memref<98xf32, #tpu.memory_space<smem>>
    %c0_156 = arith.constant 0 : index
    %c0_157 = arith.constant 0 : index
    %c160 = arith.constant 160 : index
    %339 = vector.load %arg10[%c0_156, %c0_157, %c160] : memref<2x1x512xf32, #tpu.memory_space<vmem>>, vector<1x1x256xf32>
    %340 = vector.shape_cast %339 : vector<1x1x256xf32> to vector<1x256xf32>
    %341 = vector.broadcast %338 : f32 to vector<1x256xf32>
    %342 = arith.mulf %341, %340 : vector<1x256xf32>
    %343 = arith.addf %337, %342 : vector<1x256xf32>
    %c45 = arith.constant 45 : index
    %344 = memref.load %arg6[%c45] : memref<98xf32, #tpu.memory_space<smem>>
    %c0_158 = arith.constant 0 : index
    %c0_159 = arith.constant 0 : index
    %c176 = arith.constant 176 : index
    %345 = vector.load %arg10[%c0_158, %c0_159, %c176] : memref<2x1x512xf32, #tpu.memory_space<vmem>>, vector<1x1x256xf32>
    %346 = vector.shape_cast %345 : vector<1x1x256xf32> to vector<1x256xf32>
    %347 = vector.broadcast %344 : f32 to vector<1x256xf32>
    %348 = arith.mulf %347, %346 : vector<1x256xf32>
    %349 = arith.addf %343, %348 : vector<1x256xf32>
    %c52 = arith.constant 52 : index
    %350 = memref.load %arg6[%c52] : memref<98xf32, #tpu.memory_space<smem>>
    %c1_160 = arith.constant 1 : index
    %c0_161 = arith.constant 0 : index
    %c80_162 = arith.constant 80 : index
    %351 = vector.load %arg10[%c1_160, %c0_161, %c80_162] : memref<2x1x512xf32, #tpu.memory_space<vmem>>, vector<1x1x256xf32>
    %352 = vector.shape_cast %351 : vector<1x1x256xf32> to vector<1x256xf32>
    %353 = vector.broadcast %350 : f32 to vector<1x256xf32>
    %354 = arith.mulf %353, %352 : vector<1x256xf32>
    %355 = arith.addf %349, %354 : vector<1x256xf32>
    %c59 = arith.constant 59 : index
    %356 = memref.load %arg6[%c59] : memref<98xf32, #tpu.memory_space<smem>>
    %c1_163 = arith.constant 1 : index
    %c0_164 = arith.constant 0 : index
    %c96_165 = arith.constant 96 : index
    %357 = vector.load %arg10[%c1_163, %c0_164, %c96_165] : memref<2x1x512xf32, #tpu.memory_space<vmem>>, vector<1x1x256xf32>
    %358 = vector.shape_cast %357 : vector<1x1x256xf32> to vector<1x256xf32>
    %359 = vector.broadcast %356 : f32 to vector<1x256xf32>
    %360 = arith.mulf %359, %358 : vector<1x256xf32>
    %361 = arith.addf %355, %360 : vector<1x256xf32>
    %c66 = arith.constant 66 : index
    %362 = memref.load %arg6[%c66] : memref<98xf32, #tpu.memory_space<smem>>
    %c1_166 = arith.constant 1 : index
    %c0_167 = arith.constant 0 : index
    %c112_168 = arith.constant 112 : index
    %363 = vector.load %arg10[%c1_166, %c0_167, %c112_168] : memref<2x1x512xf32, #tpu.memory_space<vmem>>, vector<1x1x256xf32>
    %364 = vector.shape_cast %363 : vector<1x1x256xf32> to vector<1x256xf32>
    %365 = vector.broadcast %362 : f32 to vector<1x256xf32>
    %366 = arith.mulf %365, %364 : vector<1x256xf32>
    %367 = arith.addf %361, %366 : vector<1x256xf32>
    %c73 = arith.constant 73 : index
    %368 = memref.load %arg6[%c73] : memref<98xf32, #tpu.memory_space<smem>>
    %c1_169 = arith.constant 1 : index
    %c0_170 = arith.constant 0 : index
    %c128_171 = arith.constant 128 : index
    %369 = vector.load %arg10[%c1_169, %c0_170, %c128_171] : memref<2x1x512xf32, #tpu.memory_space<vmem>>, vector<1x1x256xf32>
    %370 = vector.shape_cast %369 : vector<1x1x256xf32> to vector<1x256xf32>
    %371 = vector.broadcast %368 : f32 to vector<1x256xf32>
    %372 = arith.mulf %371, %370 : vector<1x256xf32>
    %373 = arith.addf %367, %372 : vector<1x256xf32>
    %c80_172 = arith.constant 80 : index
    %374 = memref.load %arg6[%c80_172] : memref<98xf32, #tpu.memory_space<smem>>
    %c1_173 = arith.constant 1 : index
    %c0_174 = arith.constant 0 : index
    %c144_175 = arith.constant 144 : index
    %375 = vector.load %arg10[%c1_173, %c0_174, %c144_175] : memref<2x1x512xf32, #tpu.memory_space<vmem>>, vector<1x1x256xf32>
    %376 = vector.shape_cast %375 : vector<1x1x256xf32> to vector<1x256xf32>
    %377 = vector.broadcast %374 : f32 to vector<1x256xf32>
    %378 = arith.mulf %377, %376 : vector<1x256xf32>
    %379 = arith.addf %373, %378 : vector<1x256xf32>
    %c87 = arith.constant 87 : index
    %380 = memref.load %arg6[%c87] : memref<98xf32, #tpu.memory_space<smem>>
    %c1_176 = arith.constant 1 : index
    %c0_177 = arith.constant 0 : index
    %c160_178 = arith.constant 160 : index
    %381 = vector.load %arg10[%c1_176, %c0_177, %c160_178] : memref<2x1x512xf32, #tpu.memory_space<vmem>>, vector<1x1x256xf32>
    %382 = vector.shape_cast %381 : vector<1x1x256xf32> to vector<1x256xf32>
    %383 = vector.broadcast %380 : f32 to vector<1x256xf32>
    %384 = arith.mulf %383, %382 : vector<1x256xf32>
    %385 = arith.addf %379, %384 : vector<1x256xf32>
    %c94_179 = arith.constant 94 : index
    %386 = memref.load %arg6[%c94_179] : memref<98xf32, #tpu.memory_space<smem>>
    %c1_180 = arith.constant 1 : index
    %c0_181 = arith.constant 0 : index
    %c176_182 = arith.constant 176 : index
    %387 = vector.load %arg10[%c1_180, %c0_181, %c176_182] : memref<2x1x512xf32, #tpu.memory_space<vmem>>, vector<1x1x256xf32>
    %388 = vector.shape_cast %387 : vector<1x1x256xf32> to vector<1x256xf32>
    %389 = vector.broadcast %386 : f32 to vector<1x256xf32>
    %390 = arith.mulf %389, %388 : vector<1x256xf32>
    %391 = arith.addf %385, %390 : vector<1x256xf32>
    %392 = vector.extract_strided_slice %41 {offsets = [3, 0], sizes = [1, 256], strides = [1, 1]} : vector<7x256xf32> to vector<1x256xf32>
    %393 = arith.mulf %391, %392 : vector<1x256xf32>
    %394 = arith.addf %306, %393 : vector<1x256xf32>
    %cst_183 = arith.constant 0.000000e+00 : f32
    %395 = vector.broadcast %cst_183 : f32 to vector<1x256xf32>
    %c4 = arith.constant 4 : index
    %396 = memref.load %arg6[%c4] : memref<98xf32, #tpu.memory_space<smem>>
    %c0_184 = arith.constant 0 : index
    %c0_185 = arith.constant 0 : index
    %c81 = arith.constant 81 : index
    %397 = vector.load %arg10[%c0_184, %c0_185, %c81] : memref<2x1x512xf32, #tpu.memory_space<vmem>>, vector<1x1x256xf32>
    %398 = vector.shape_cast %397 : vector<1x1x256xf32> to vector<1x256xf32>
    %399 = vector.broadcast %396 : f32 to vector<1x256xf32>
    %400 = arith.mulf %399, %398 : vector<1x256xf32>
    %401 = arith.addf %395, %400 : vector<1x256xf32>
    %c11 = arith.constant 11 : index
    %402 = memref.load %arg6[%c11] : memref<98xf32, #tpu.memory_space<smem>>
    %c0_186 = arith.constant 0 : index
    %c0_187 = arith.constant 0 : index
    %c97 = arith.constant 97 : index
    %403 = vector.load %arg10[%c0_186, %c0_187, %c97] : memref<2x1x512xf32, #tpu.memory_space<vmem>>, vector<1x1x256xf32>
    %404 = vector.shape_cast %403 : vector<1x1x256xf32> to vector<1x256xf32>
    %405 = vector.broadcast %402 : f32 to vector<1x256xf32>
    %406 = arith.mulf %405, %404 : vector<1x256xf32>
    %407 = arith.addf %401, %406 : vector<1x256xf32>
    %c18 = arith.constant 18 : index
    %408 = memref.load %arg6[%c18] : memref<98xf32, #tpu.memory_space<smem>>
    %c0_188 = arith.constant 0 : index
    %c0_189 = arith.constant 0 : index
    %c113 = arith.constant 113 : index
    %409 = vector.load %arg10[%c0_188, %c0_189, %c113] : memref<2x1x512xf32, #tpu.memory_space<vmem>>, vector<1x1x256xf32>
    %410 = vector.shape_cast %409 : vector<1x1x256xf32> to vector<1x256xf32>
    %411 = vector.broadcast %408 : f32 to vector<1x256xf32>
    %412 = arith.mulf %411, %410 : vector<1x256xf32>
    %413 = arith.addf %407, %412 : vector<1x256xf32>
    %c25 = arith.constant 25 : index
    %414 = memref.load %arg6[%c25] : memref<98xf32, #tpu.memory_space<smem>>
    %c0_190 = arith.constant 0 : index
    %c0_191 = arith.constant 0 : index
    %c129 = arith.constant 129 : index
    %415 = vector.load %arg10[%c0_190, %c0_191, %c129] : memref<2x1x512xf32, #tpu.memory_space<vmem>>, vector<1x1x256xf32>
    %416 = vector.shape_cast %415 : vector<1x1x256xf32> to vector<1x256xf32>
    %417 = vector.broadcast %414 : f32 to vector<1x256xf32>
    %418 = arith.mulf %417, %416 : vector<1x256xf32>
    %419 = arith.addf %413, %418 : vector<1x256xf32>
    %c32 = arith.constant 32 : index
    %420 = memref.load %arg6[%c32] : memref<98xf32, #tpu.memory_space<smem>>
    %c0_192 = arith.constant 0 : index
    %c0_193 = arith.constant 0 : index
    %c145 = arith.constant 145 : index
    %421 = vector.load %arg10[%c0_192, %c0_193, %c145] : memref<2x1x512xf32, #tpu.memory_space<vmem>>, vector<1x1x256xf32>
    %422 = vector.shape_cast %421 : vector<1x1x256xf32> to vector<1x256xf32>
    %423 = vector.broadcast %420 : f32 to vector<1x256xf32>
    %424 = arith.mulf %423, %422 : vector<1x256xf32>
    %425 = arith.addf %419, %424 : vector<1x256xf32>
    %c39 = arith.constant 39 : index
    %426 = memref.load %arg6[%c39] : memref<98xf32, #tpu.memory_space<smem>>
    %c0_194 = arith.constant 0 : index
    %c0_195 = arith.constant 0 : index
    %c161 = arith.constant 161 : index
    %427 = vector.load %arg10[%c0_194, %c0_195, %c161] : memref<2x1x512xf32, #tpu.memory_space<vmem>>, vector<1x1x256xf32>
    %428 = vector.shape_cast %427 : vector<1x1x256xf32> to vector<1x256xf32>
    %429 = vector.broadcast %426 : f32 to vector<1x256xf32>
    %430 = arith.mulf %429, %428 : vector<1x256xf32>
    %431 = arith.addf %425, %430 : vector<1x256xf32>
    %c46 = arith.constant 46 : index
    %432 = memref.load %arg6[%c46] : memref<98xf32, #tpu.memory_space<smem>>
    %c0_196 = arith.constant 0 : index
    %c0_197 = arith.constant 0 : index
    %c177 = arith.constant 177 : index
    %433 = vector.load %arg10[%c0_196, %c0_197, %c177] : memref<2x1x512xf32, #tpu.memory_space<vmem>>, vector<1x1x256xf32>
    %434 = vector.shape_cast %433 : vector<1x1x256xf32> to vector<1x256xf32>
    %435 = vector.broadcast %432 : f32 to vector<1x256xf32>
    %436 = arith.mulf %435, %434 : vector<1x256xf32>
    %437 = arith.addf %431, %436 : vector<1x256xf32>
    %c53 = arith.constant 53 : index
    %438 = memref.load %arg6[%c53] : memref<98xf32, #tpu.memory_space<smem>>
    %c1_198 = arith.constant 1 : index
    %c0_199 = arith.constant 0 : index
    %c81_200 = arith.constant 81 : index
    %439 = vector.load %arg10[%c1_198, %c0_199, %c81_200] : memref<2x1x512xf32, #tpu.memory_space<vmem>>, vector<1x1x256xf32>
    %440 = vector.shape_cast %439 : vector<1x1x256xf32> to vector<1x256xf32>
    %441 = vector.broadcast %438 : f32 to vector<1x256xf32>
    %442 = arith.mulf %441, %440 : vector<1x256xf32>
    %443 = arith.addf %437, %442 : vector<1x256xf32>
    %c60 = arith.constant 60 : index
    %444 = memref.load %arg6[%c60] : memref<98xf32, #tpu.memory_space<smem>>
    %c1_201 = arith.constant 1 : index
    %c0_202 = arith.constant 0 : index
    %c97_203 = arith.constant 97 : index
    %445 = vector.load %arg10[%c1_201, %c0_202, %c97_203] : memref<2x1x512xf32, #tpu.memory_space<vmem>>, vector<1x1x256xf32>
    %446 = vector.shape_cast %445 : vector<1x1x256xf32> to vector<1x256xf32>
    %447 = vector.broadcast %444 : f32 to vector<1x256xf32>
    %448 = arith.mulf %447, %446 : vector<1x256xf32>
    %449 = arith.addf %443, %448 : vector<1x256xf32>
    %c67 = arith.constant 67 : index
    %450 = memref.load %arg6[%c67] : memref<98xf32, #tpu.memory_space<smem>>
    %c1_204 = arith.constant 1 : index
    %c0_205 = arith.constant 0 : index
    %c113_206 = arith.constant 113 : index
    %451 = vector.load %arg10[%c1_204, %c0_205, %c113_206] : memref<2x1x512xf32, #tpu.memory_space<vmem>>, vector<1x1x256xf32>
    %452 = vector.shape_cast %451 : vector<1x1x256xf32> to vector<1x256xf32>
    %453 = vector.broadcast %450 : f32 to vector<1x256xf32>
    %454 = arith.mulf %453, %452 : vector<1x256xf32>
    %455 = arith.addf %449, %454 : vector<1x256xf32>
    %c74 = arith.constant 74 : index
    %456 = memref.load %arg6[%c74] : memref<98xf32, #tpu.memory_space<smem>>
    %c1_207 = arith.constant 1 : index
    %c0_208 = arith.constant 0 : index
    %c129_209 = arith.constant 129 : index
    %457 = vector.load %arg10[%c1_207, %c0_208, %c129_209] : memref<2x1x512xf32, #tpu.memory_space<vmem>>, vector<1x1x256xf32>
    %458 = vector.shape_cast %457 : vector<1x1x256xf32> to vector<1x256xf32>
    %459 = vector.broadcast %456 : f32 to vector<1x256xf32>
    %460 = arith.mulf %459, %458 : vector<1x256xf32>
    %461 = arith.addf %455, %460 : vector<1x256xf32>
    %c81_210 = arith.constant 81 : index
    %462 = memref.load %arg6[%c81_210] : memref<98xf32, #tpu.memory_space<smem>>
    %c1_211 = arith.constant 1 : index
    %c0_212 = arith.constant 0 : index
    %c145_213 = arith.constant 145 : index
    %463 = vector.load %arg10[%c1_211, %c0_212, %c145_213] : memref<2x1x512xf32, #tpu.memory_space<vmem>>, vector<1x1x256xf32>
    %464 = vector.shape_cast %463 : vector<1x1x256xf32> to vector<1x256xf32>
    %465 = vector.broadcast %462 : f32 to vector<1x256xf32>
    %466 = arith.mulf %465, %464 : vector<1x256xf32>
    %467 = arith.addf %461, %466 : vector<1x256xf32>
    %c88 = arith.constant 88 : index
    %468 = memref.load %arg6[%c88] : memref<98xf32, #tpu.memory_space<smem>>
    %c1_214 = arith.constant 1 : index
    %c0_215 = arith.constant 0 : index
    %c161_216 = arith.constant 161 : index
    %469 = vector.load %arg10[%c1_214, %c0_215, %c161_216] : memref<2x1x512xf32, #tpu.memory_space<vmem>>, vector<1x1x256xf32>
    %470 = vector.shape_cast %469 : vector<1x1x256xf32> to vector<1x256xf32>
    %471 = vector.broadcast %468 : f32 to vector<1x256xf32>
    %472 = arith.mulf %471, %470 : vector<1x256xf32>
    %473 = arith.addf %467, %472 : vector<1x256xf32>
    %c95_217 = arith.constant 95 : index
    %474 = memref.load %arg6[%c95_217] : memref<98xf32, #tpu.memory_space<smem>>
    %c1_218 = arith.constant 1 : index
    %c0_219 = arith.constant 0 : index
    %c177_220 = arith.constant 177 : index
    %475 = vector.load %arg10[%c1_218, %c0_219, %c177_220] : memref<2x1x512xf32, #tpu.memory_space<vmem>>, vector<1x1x256xf32>
    %476 = vector.shape_cast %475 : vector<1x1x256xf32> to vector<1x256xf32>
    %477 = vector.broadcast %474 : f32 to vector<1x256xf32>
    %478 = arith.mulf %477, %476 : vector<1x256xf32>
    %479 = arith.addf %473, %478 : vector<1x256xf32>
    %480 = vector.extract_strided_slice %41 {offsets = [4, 0], sizes = [1, 256], strides = [1, 1]} : vector<7x256xf32> to vector<1x256xf32>
    %481 = arith.mulf %479, %480 : vector<1x256xf32>
    %482 = arith.addf %394, %481 : vector<1x256xf32>
    %cst_221 = arith.constant 0.000000e+00 : f32
    %483 = vector.broadcast %cst_221 : f32 to vector<1x256xf32>
    %c5 = arith.constant 5 : index
    %484 = memref.load %arg6[%c5] : memref<98xf32, #tpu.memory_space<smem>>
    %c0_222 = arith.constant 0 : index
    %c0_223 = arith.constant 0 : index
    %c82 = arith.constant 82 : index
    %485 = vector.load %arg10[%c0_222, %c0_223, %c82] : memref<2x1x512xf32, #tpu.memory_space<vmem>>, vector<1x1x256xf32>
    %486 = vector.shape_cast %485 : vector<1x1x256xf32> to vector<1x256xf32>
    %487 = vector.broadcast %484 : f32 to vector<1x256xf32>
    %488 = arith.mulf %487, %486 : vector<1x256xf32>
    %489 = arith.addf %483, %488 : vector<1x256xf32>
    %c12 = arith.constant 12 : index
    %490 = memref.load %arg6[%c12] : memref<98xf32, #tpu.memory_space<smem>>
    %c0_224 = arith.constant 0 : index
    %c0_225 = arith.constant 0 : index
    %c98 = arith.constant 98 : index
    %491 = vector.load %arg10[%c0_224, %c0_225, %c98] : memref<2x1x512xf32, #tpu.memory_space<vmem>>, vector<1x1x256xf32>
    %492 = vector.shape_cast %491 : vector<1x1x256xf32> to vector<1x256xf32>
    %493 = vector.broadcast %490 : f32 to vector<1x256xf32>
    %494 = arith.mulf %493, %492 : vector<1x256xf32>
    %495 = arith.addf %489, %494 : vector<1x256xf32>
    %c19 = arith.constant 19 : index
    %496 = memref.load %arg6[%c19] : memref<98xf32, #tpu.memory_space<smem>>
    %c0_226 = arith.constant 0 : index
    %c0_227 = arith.constant 0 : index
    %c114 = arith.constant 114 : index
    %497 = vector.load %arg10[%c0_226, %c0_227, %c114] : memref<2x1x512xf32, #tpu.memory_space<vmem>>, vector<1x1x256xf32>
    %498 = vector.shape_cast %497 : vector<1x1x256xf32> to vector<1x256xf32>
    %499 = vector.broadcast %496 : f32 to vector<1x256xf32>
    %500 = arith.mulf %499, %498 : vector<1x256xf32>
    %501 = arith.addf %495, %500 : vector<1x256xf32>
    %c26 = arith.constant 26 : index
    %502 = memref.load %arg6[%c26] : memref<98xf32, #tpu.memory_space<smem>>
    %c0_228 = arith.constant 0 : index
    %c0_229 = arith.constant 0 : index
    %c130 = arith.constant 130 : index
    %503 = vector.load %arg10[%c0_228, %c0_229, %c130] : memref<2x1x512xf32, #tpu.memory_space<vmem>>, vector<1x1x256xf32>
    %504 = vector.shape_cast %503 : vector<1x1x256xf32> to vector<1x256xf32>
    %505 = vector.broadcast %502 : f32 to vector<1x256xf32>
    %506 = arith.mulf %505, %504 : vector<1x256xf32>
    %507 = arith.addf %501, %506 : vector<1x256xf32>
    %c33 = arith.constant 33 : index
    %508 = memref.load %arg6[%c33] : memref<98xf32, #tpu.memory_space<smem>>
    %c0_230 = arith.constant 0 : index
    %c0_231 = arith.constant 0 : index
    %c146 = arith.constant 146 : index
    %509 = vector.load %arg10[%c0_230, %c0_231, %c146] : memref<2x1x512xf32, #tpu.memory_space<vmem>>, vector<1x1x256xf32>
    %510 = vector.shape_cast %509 : vector<1x1x256xf32> to vector<1x256xf32>
    %511 = vector.broadcast %508 : f32 to vector<1x256xf32>
    %512 = arith.mulf %511, %510 : vector<1x256xf32>
    %513 = arith.addf %507, %512 : vector<1x256xf32>
    %c40 = arith.constant 40 : index
    %514 = memref.load %arg6[%c40] : memref<98xf32, #tpu.memory_space<smem>>
    %c0_232 = arith.constant 0 : index
    %c0_233 = arith.constant 0 : index
    %c162 = arith.constant 162 : index
    %515 = vector.load %arg10[%c0_232, %c0_233, %c162] : memref<2x1x512xf32, #tpu.memory_space<vmem>>, vector<1x1x256xf32>
    %516 = vector.shape_cast %515 : vector<1x1x256xf32> to vector<1x256xf32>
    %517 = vector.broadcast %514 : f32 to vector<1x256xf32>
    %518 = arith.mulf %517, %516 : vector<1x256xf32>
    %519 = arith.addf %513, %518 : vector<1x256xf32>
    %c47 = arith.constant 47 : index
    %520 = memref.load %arg6[%c47] : memref<98xf32, #tpu.memory_space<smem>>
    %c0_234 = arith.constant 0 : index
    %c0_235 = arith.constant 0 : index
    %c178 = arith.constant 178 : index
    %521 = vector.load %arg10[%c0_234, %c0_235, %c178] : memref<2x1x512xf32, #tpu.memory_space<vmem>>, vector<1x1x256xf32>
    %522 = vector.shape_cast %521 : vector<1x1x256xf32> to vector<1x256xf32>
    %523 = vector.broadcast %520 : f32 to vector<1x256xf32>
    %524 = arith.mulf %523, %522 : vector<1x256xf32>
    %525 = arith.addf %519, %524 : vector<1x256xf32>
    %c54 = arith.constant 54 : index
    %526 = memref.load %arg6[%c54] : memref<98xf32, #tpu.memory_space<smem>>
    %c1_236 = arith.constant 1 : index
    %c0_237 = arith.constant 0 : index
    %c82_238 = arith.constant 82 : index
    %527 = vector.load %arg10[%c1_236, %c0_237, %c82_238] : memref<2x1x512xf32, #tpu.memory_space<vmem>>, vector<1x1x256xf32>
    %528 = vector.shape_cast %527 : vector<1x1x256xf32> to vector<1x256xf32>
    %529 = vector.broadcast %526 : f32 to vector<1x256xf32>
    %530 = arith.mulf %529, %528 : vector<1x256xf32>
    %531 = arith.addf %525, %530 : vector<1x256xf32>
    %c61 = arith.constant 61 : index
    %532 = memref.load %arg6[%c61] : memref<98xf32, #tpu.memory_space<smem>>
    %c1_239 = arith.constant 1 : index
    %c0_240 = arith.constant 0 : index
    %c98_241 = arith.constant 98 : index
    %533 = vector.load %arg10[%c1_239, %c0_240, %c98_241] : memref<2x1x512xf32, #tpu.memory_space<vmem>>, vector<1x1x256xf32>
    %534 = vector.shape_cast %533 : vector<1x1x256xf32> to vector<1x256xf32>
    %535 = vector.broadcast %532 : f32 to vector<1x256xf32>
    %536 = arith.mulf %535, %534 : vector<1x256xf32>
    %537 = arith.addf %531, %536 : vector<1x256xf32>
    %c68 = arith.constant 68 : index
    %538 = memref.load %arg6[%c68] : memref<98xf32, #tpu.memory_space<smem>>
    %c1_242 = arith.constant 1 : index
    %c0_243 = arith.constant 0 : index
    %c114_244 = arith.constant 114 : index
    %539 = vector.load %arg10[%c1_242, %c0_243, %c114_244] : memref<2x1x512xf32, #tpu.memory_space<vmem>>, vector<1x1x256xf32>
    %540 = vector.shape_cast %539 : vector<1x1x256xf32> to vector<1x256xf32>
    %541 = vector.broadcast %538 : f32 to vector<1x256xf32>
    %542 = arith.mulf %541, %540 : vector<1x256xf32>
    %543 = arith.addf %537, %542 : vector<1x256xf32>
    %c75 = arith.constant 75 : index
    %544 = memref.load %arg6[%c75] : memref<98xf32, #tpu.memory_space<smem>>
    %c1_245 = arith.constant 1 : index
    %c0_246 = arith.constant 0 : index
    %c130_247 = arith.constant 130 : index
    %545 = vector.load %arg10[%c1_245, %c0_246, %c130_247] : memref<2x1x512xf32, #tpu.memory_space<vmem>>, vector<1x1x256xf32>
    %546 = vector.shape_cast %545 : vector<1x1x256xf32> to vector<1x256xf32>
    %547 = vector.broadcast %544 : f32 to vector<1x256xf32>
    %548 = arith.mulf %547, %546 : vector<1x256xf32>
    %549 = arith.addf %543, %548 : vector<1x256xf32>
    %c82_248 = arith.constant 82 : index
    %550 = memref.load %arg6[%c82_248] : memref<98xf32, #tpu.memory_space<smem>>
    %c1_249 = arith.constant 1 : index
    %c0_250 = arith.constant 0 : index
    %c146_251 = arith.constant 146 : index
    %551 = vector.load %arg10[%c1_249, %c0_250, %c146_251] : memref<2x1x512xf32, #tpu.memory_space<vmem>>, vector<1x1x256xf32>
    %552 = vector.shape_cast %551 : vector<1x1x256xf32> to vector<1x256xf32>
    %553 = vector.broadcast %550 : f32 to vector<1x256xf32>
    %554 = arith.mulf %553, %552 : vector<1x256xf32>
    %555 = arith.addf %549, %554 : vector<1x256xf32>
    %c89 = arith.constant 89 : index
    %556 = memref.load %arg6[%c89] : memref<98xf32, #tpu.memory_space<smem>>
    %c1_252 = arith.constant 1 : index
    %c0_253 = arith.constant 0 : index
    %c162_254 = arith.constant 162 : index
    %557 = vector.load %arg10[%c1_252, %c0_253, %c162_254] : memref<2x1x512xf32, #tpu.memory_space<vmem>>, vector<1x1x256xf32>
    %558 = vector.shape_cast %557 : vector<1x1x256xf32> to vector<1x256xf32>
    %559 = vector.broadcast %556 : f32 to vector<1x256xf32>
    %560 = arith.mulf %559, %558 : vector<1x256xf32>
    %561 = arith.addf %555, %560 : vector<1x256xf32>
    %c96_255 = arith.constant 96 : index
    %562 = memref.load %arg6[%c96_255] : memref<98xf32, #tpu.memory_space<smem>>
    %c1_256 = arith.constant 1 : index
    %c0_257 = arith.constant 0 : index
    %c178_258 = arith.constant 178 : index
    %563 = vector.load %arg10[%c1_256, %c0_257, %c178_258] : memref<2x1x512xf32, #tpu.memory_space<vmem>>, vector<1x1x256xf32>
    %564 = vector.shape_cast %563 : vector<1x1x256xf32> to vector<1x256xf32>
    %565 = vector.broadcast %562 : f32 to vector<1x256xf32>
    %566 = arith.mulf %565, %564 : vector<1x256xf32>
    %567 = arith.addf %561, %566 : vector<1x256xf32>
    %568 = vector.extract_strided_slice %41 {offsets = [5, 0], sizes = [1, 256], strides = [1, 1]} : vector<7x256xf32> to vector<1x256xf32>
    %569 = arith.mulf %567, %568 : vector<1x256xf32>
    %570 = arith.addf %482, %569 : vector<1x256xf32>
    %cst_259 = arith.constant 0.000000e+00 : f32
    %571 = vector.broadcast %cst_259 : f32 to vector<1x256xf32>
    %c6 = arith.constant 6 : index
    %572 = memref.load %arg6[%c6] : memref<98xf32, #tpu.memory_space<smem>>
    %c0_260 = arith.constant 0 : index
    %c0_261 = arith.constant 0 : index
    %c83 = arith.constant 83 : index
    %573 = vector.load %arg10[%c0_260, %c0_261, %c83] : memref<2x1x512xf32, #tpu.memory_space<vmem>>, vector<1x1x256xf32>
    %574 = vector.shape_cast %573 : vector<1x1x256xf32> to vector<1x256xf32>
    %575 = vector.broadcast %572 : f32 to vector<1x256xf32>
    %576 = arith.mulf %575, %574 : vector<1x256xf32>
    %577 = arith.addf %571, %576 : vector<1x256xf32>
    %c13 = arith.constant 13 : index
    %578 = memref.load %arg6[%c13] : memref<98xf32, #tpu.memory_space<smem>>
    %c0_262 = arith.constant 0 : index
    %c0_263 = arith.constant 0 : index
    %c99 = arith.constant 99 : index
    %579 = vector.load %arg10[%c0_262, %c0_263, %c99] : memref<2x1x512xf32, #tpu.memory_space<vmem>>, vector<1x1x256xf32>
    %580 = vector.shape_cast %579 : vector<1x1x256xf32> to vector<1x256xf32>
    %581 = vector.broadcast %578 : f32 to vector<1x256xf32>
    %582 = arith.mulf %581, %580 : vector<1x256xf32>
    %583 = arith.addf %577, %582 : vector<1x256xf32>
    %c20 = arith.constant 20 : index
    %584 = memref.load %arg6[%c20] : memref<98xf32, #tpu.memory_space<smem>>
    %c0_264 = arith.constant 0 : index
    %c0_265 = arith.constant 0 : index
    %c115 = arith.constant 115 : index
    %585 = vector.load %arg10[%c0_264, %c0_265, %c115] : memref<2x1x512xf32, #tpu.memory_space<vmem>>, vector<1x1x256xf32>
    %586 = vector.shape_cast %585 : vector<1x1x256xf32> to vector<1x256xf32>
    %587 = vector.broadcast %584 : f32 to vector<1x256xf32>
    %588 = arith.mulf %587, %586 : vector<1x256xf32>
    %589 = arith.addf %583, %588 : vector<1x256xf32>
    %c27 = arith.constant 27 : index
    %590 = memref.load %arg6[%c27] : memref<98xf32, #tpu.memory_space<smem>>
    %c0_266 = arith.constant 0 : index
    %c0_267 = arith.constant 0 : index
    %c131 = arith.constant 131 : index
    %591 = vector.load %arg10[%c0_266, %c0_267, %c131] : memref<2x1x512xf32, #tpu.memory_space<vmem>>, vector<1x1x256xf32>
    %592 = vector.shape_cast %591 : vector<1x1x256xf32> to vector<1x256xf32>
    %593 = vector.broadcast %590 : f32 to vector<1x256xf32>
    %594 = arith.mulf %593, %592 : vector<1x256xf32>
    %595 = arith.addf %589, %594 : vector<1x256xf32>
    %c34 = arith.constant 34 : index
    %596 = memref.load %arg6[%c34] : memref<98xf32, #tpu.memory_space<smem>>
    %c0_268 = arith.constant 0 : index
    %c0_269 = arith.constant 0 : index
    %c147 = arith.constant 147 : index
    %597 = vector.load %arg10[%c0_268, %c0_269, %c147] : memref<2x1x512xf32, #tpu.memory_space<vmem>>, vector<1x1x256xf32>
    %598 = vector.shape_cast %597 : vector<1x1x256xf32> to vector<1x256xf32>
    %599 = vector.broadcast %596 : f32 to vector<1x256xf32>
    %600 = arith.mulf %599, %598 : vector<1x256xf32>
    %601 = arith.addf %595, %600 : vector<1x256xf32>
    %c41 = arith.constant 41 : index
    %602 = memref.load %arg6[%c41] : memref<98xf32, #tpu.memory_space<smem>>
    %c0_270 = arith.constant 0 : index
    %c0_271 = arith.constant 0 : index
    %c163 = arith.constant 163 : index
    %603 = vector.load %arg10[%c0_270, %c0_271, %c163] : memref<2x1x512xf32, #tpu.memory_space<vmem>>, vector<1x1x256xf32>
    %604 = vector.shape_cast %603 : vector<1x1x256xf32> to vector<1x256xf32>
    %605 = vector.broadcast %602 : f32 to vector<1x256xf32>
    %606 = arith.mulf %605, %604 : vector<1x256xf32>
    %607 = arith.addf %601, %606 : vector<1x256xf32>
    %c48 = arith.constant 48 : index
    %608 = memref.load %arg6[%c48] : memref<98xf32, #tpu.memory_space<smem>>
    %c0_272 = arith.constant 0 : index
    %c0_273 = arith.constant 0 : index
    %c179 = arith.constant 179 : index
    %609 = vector.load %arg10[%c0_272, %c0_273, %c179] : memref<2x1x512xf32, #tpu.memory_space<vmem>>, vector<1x1x256xf32>
    %610 = vector.shape_cast %609 : vector<1x1x256xf32> to vector<1x256xf32>
    %611 = vector.broadcast %608 : f32 to vector<1x256xf32>
    %612 = arith.mulf %611, %610 : vector<1x256xf32>
    %613 = arith.addf %607, %612 : vector<1x256xf32>
    %c55 = arith.constant 55 : index
    %614 = memref.load %arg6[%c55] : memref<98xf32, #tpu.memory_space<smem>>
    %c1_274 = arith.constant 1 : index
    %c0_275 = arith.constant 0 : index
    %c83_276 = arith.constant 83 : index
    %615 = vector.load %arg10[%c1_274, %c0_275, %c83_276] : memref<2x1x512xf32, #tpu.memory_space<vmem>>, vector<1x1x256xf32>
    %616 = vector.shape_cast %615 : vector<1x1x256xf32> to vector<1x256xf32>
    %617 = vector.broadcast %614 : f32 to vector<1x256xf32>
    %618 = arith.mulf %617, %616 : vector<1x256xf32>
    %619 = arith.addf %613, %618 : vector<1x256xf32>
    %c62 = arith.constant 62 : index
    %620 = memref.load %arg6[%c62] : memref<98xf32, #tpu.memory_space<smem>>
    %c1_277 = arith.constant 1 : index
    %c0_278 = arith.constant 0 : index
    %c99_279 = arith.constant 99 : index
    %621 = vector.load %arg10[%c1_277, %c0_278, %c99_279] : memref<2x1x512xf32, #tpu.memory_space<vmem>>, vector<1x1x256xf32>
    %622 = vector.shape_cast %621 : vector<1x1x256xf32> to vector<1x256xf32>
    %623 = vector.broadcast %620 : f32 to vector<1x256xf32>
    %624 = arith.mulf %623, %622 : vector<1x256xf32>
    %625 = arith.addf %619, %624 : vector<1x256xf32>
    %c69 = arith.constant 69 : index
    %626 = memref.load %arg6[%c69] : memref<98xf32, #tpu.memory_space<smem>>
    %c1_280 = arith.constant 1 : index
    %c0_281 = arith.constant 0 : index
    %c115_282 = arith.constant 115 : index
    %627 = vector.load %arg10[%c1_280, %c0_281, %c115_282] : memref<2x1x512xf32, #tpu.memory_space<vmem>>, vector<1x1x256xf32>
    %628 = vector.shape_cast %627 : vector<1x1x256xf32> to vector<1x256xf32>
    %629 = vector.broadcast %626 : f32 to vector<1x256xf32>
    %630 = arith.mulf %629, %628 : vector<1x256xf32>
    %631 = arith.addf %625, %630 : vector<1x256xf32>
    %c76 = arith.constant 76 : index
    %632 = memref.load %arg6[%c76] : memref<98xf32, #tpu.memory_space<smem>>
    %c1_283 = arith.constant 1 : index
    %c0_284 = arith.constant 0 : index
    %c131_285 = arith.constant 131 : index
    %633 = vector.load %arg10[%c1_283, %c0_284, %c131_285] : memref<2x1x512xf32, #tpu.memory_space<vmem>>, vector<1x1x256xf32>
    %634 = vector.shape_cast %633 : vector<1x1x256xf32> to vector<1x256xf32>
    %635 = vector.broadcast %632 : f32 to vector<1x256xf32>
    %636 = arith.mulf %635, %634 : vector<1x256xf32>
    %637 = arith.addf %631, %636 : vector<1x256xf32>
    %c83_286 = arith.constant 83 : index
    %638 = memref.load %arg6[%c83_286] : memref<98xf32, #tpu.memory_space<smem>>
    %c1_287 = arith.constant 1 : index
    %c0_288 = arith.constant 0 : index
    %c147_289 = arith.constant 147 : index
    %639 = vector.load %arg10[%c1_287, %c0_288, %c147_289] : memref<2x1x512xf32, #tpu.memory_space<vmem>>, vector<1x1x256xf32>
    %640 = vector.shape_cast %639 : vector<1x1x256xf32> to vector<1x256xf32>
    %641 = vector.broadcast %638 : f32 to vector<1x256xf32>
    %642 = arith.mulf %641, %640 : vector<1x256xf32>
    %643 = arith.addf %637, %642 : vector<1x256xf32>
    %c90 = arith.constant 90 : index
    %644 = memref.load %arg6[%c90] : memref<98xf32, #tpu.memory_space<smem>>
    %c1_290 = arith.constant 1 : index
    %c0_291 = arith.constant 0 : index
    %c163_292 = arith.constant 163 : index
    %645 = vector.load %arg10[%c1_290, %c0_291, %c163_292] : memref<2x1x512xf32, #tpu.memory_space<vmem>>, vector<1x1x256xf32>
    %646 = vector.shape_cast %645 : vector<1x1x256xf32> to vector<1x256xf32>
    %647 = vector.broadcast %644 : f32 to vector<1x256xf32>
    %648 = arith.mulf %647, %646 : vector<1x256xf32>
    %649 = arith.addf %643, %648 : vector<1x256xf32>
    %c97_293 = arith.constant 97 : index
    %650 = memref.load %arg6[%c97_293] : memref<98xf32, #tpu.memory_space<smem>>
    %c1_294 = arith.constant 1 : index
    %c0_295 = arith.constant 0 : index
    %c179_296 = arith.constant 179 : index
    %651 = vector.load %arg10[%c1_294, %c0_295, %c179_296] : memref<2x1x512xf32, #tpu.memory_space<vmem>>, vector<1x1x256xf32>
    %652 = vector.shape_cast %651 : vector<1x1x256xf32> to vector<1x256xf32>
    %653 = vector.broadcast %650 : f32 to vector<1x256xf32>
    %654 = arith.mulf %653, %652 : vector<1x256xf32>
    %655 = arith.addf %649, %654 : vector<1x256xf32>
    %656 = vector.extract_strided_slice %41 {offsets = [6, 0], sizes = [1, 256], strides = [1, 1]} : vector<7x256xf32> to vector<1x256xf32>
    %657 = arith.mulf %655, %656 : vector<1x256xf32>
    %658 = arith.addf %570, %657 : vector<1x256xf32>
    %c0_297 = arith.constant 0 : index
    %659 = memref.load %arg7[%c0_297] : memref<2xf32, #tpu.memory_space<smem>>
    %660 = vector.broadcast %659 : f32 to vector<1x256xf32>
    %661 = arith.mulf %658, %660 : vector<1x256xf32>
    %c1_298 = arith.constant 1 : index
    %662 = memref.load %arg7[%c1_298] : memref<2xf32, #tpu.memory_space<smem>>
    %663 = vector.broadcast %662 : f32 to vector<1x256xf32>
    %664 = arith.addf %661, %663 : vector<1x256xf32>
    %665 = vector.shape_cast %664 : vector<1x256xf32> to vector<1x1x256xf32>
    %666 = vector.broadcast %665 : vector<1x1x256xf32> to vector<1x32x256xf32>
    %667 = arith.mulf %28, %666 : vector<1x32x256xf32>
    %c0_299 = arith.constant 0 : index
    %c0_300 = arith.constant 0 : index
    %c0_301 = arith.constant 0 : index
    %668 = vector.load %arg9[%c0_299, %c0_300, %c0_301] : memref<1x32x256xf32, #tpu.memory_space<vmem>>, vector<1x32x256xf32>
    tpu.vector_store %arg9[%c0_299, %c0_300, %c0_301], %667 {strides = array<i32>} : memref<1x32x256xf32, #tpu.memory_space<vmem>>, vector<1x32x256xf32>,
    return
  }
  func.func @transform_0(%arg0: i32) -> (i32, i32, i32) {
    %c0_i32 = arith.constant 0 : i32
    %c0_i32_0 = arith.constant 0 : i32
    %c0_i32_1 = arith.constant 0 : i32
    return %arg0, %c0_i32, %c0_i32_0 : i32, i32, i32
  }
  func.func @transform_1(%arg0: i32) -> (i32, i32) {
    %c0_i32 = arith.constant 0 : i32
    %c0_i32_0 = arith.constant 0 : i32
    %c0_i32_1 = arith.constant 0 : i32
    return %c0_i32, %c0_i32_0 : i32, i32
  }
  func.func @transform_2(%arg0: i32) -> (i32, i32) {
    %c0_i32 = arith.constant 0 : i32
    %c0_i32_0 = arith.constant 0 : i32
    %c0_i32_1 = arith.constant 0 : i32
    return %c0_i32, %c0_i32_0 : i32, i32
  }
  func.func @transform_3(%arg0: i32) -> (i32, i32) {
    %c0_i32 = arith.constant 0 : i32
    %c0_i32_0 = arith.constant 0 : i32
    %c0_i32_1 = arith.constant 0 : i32
    return %c0_i32, %c0_i32_0 : i32, i32
  }
  func.func @transform_4(%arg0: i32) -> (i32, i32) {
    %c0_i32 = arith.constant 0 : i32
    %c0_i32_0 = arith.constant 0 : i32
    %c0_i32_1 = arith.constant 0 : i32
    return %c0_i32, %c0_i32_0 : i32, i32
  }
  func.func @transform_5(%arg0: i32) -> i32 {
    %c0_i32 = arith.constant 0 : i32
    %c0_i32_0 = arith.constant 0 : i32
    return %c0_i32 : i32
  }
  func.func @transform_6(%arg0: i32) -> i32 {
    %c0_i32 = arith.constant 0 : i32
    %c0_i32_0 = arith.constant 0 : i32
    return %c0_i32 : i32
  }
  func.func @transform_7(%arg0: i32) -> (i32, i32) {
    %c0_i32 = arith.constant 0 : i32
    %c0_i32_0 = arith.constant 0 : i32
    %c0_i32_1 = arith.constant 0 : i32
    return %c0_i32, %c0_i32_0 : i32, i32
  }
  func.func @transform_8(%arg0: i32) -> (i32, i32, i32) {
    %c0_i32 = arith.constant 0 : i32
    %c0_i32_0 = arith.constant 0 : i32
    %c0_i32_1 = arith.constant 0 : i32
    return %arg0, %c0_i32, %c0_i32_0 : i32, i32, i32
  }
}

</mosaic_0001>

<bundles_post_ra>
// kernel: tpu_custom_call.1
= control target key start
LH: loop header
LB: loop body
LE: loop exit
PB: predicated region body
PF: predicated region fallthrough
CT: control target
= control target key end

     0   :  { %s3340_s0 = inlined_call_operand.hbm [shape: f32[2,32,256], index: 0, kind: input, shape index: {}]   ;;  %s3341_s1 = inlined_call_operand.vmem [shape: f32[32,2], index: 1, kind: input, shape index: {}]   ;;  %s3342_s2 = inlined_call_operand.vmem [shape: f32[1,2], index: 2, kind: input, shape index: {}]   ;;  %s3343_s3 = inlined_call_operand.vmem [shape: f32[2,32], index: 3, kind: input, shape index: {}]   ;;  %s3344_s4 = inlined_call_operand.vmem [shape: f32[1,32], index: 4, kind: input, shape index: {}]   ;;  %s3345_s5 = inlined_call_operand.vmem [shape: f32[98], index: 5, kind: input, shape index: {}]   ;;  %s3346_s6 = inlined_call_operand.vmem [shape: f32[2], index: 6, kind: input, shape index: {}]   ;;  %s3347_s7 = inlined_call_operand.vmem [shape: f32[7,256], index: 7, kind: input, shape index: {}]   ;;  %s3348_s8 = inlined_call_operand.hbm [shape: f32[2,32,256], index: 8, kind: output, shape index: {}]  }
   0x1   :  { %3385 = sst [smem:[#allocation41_spill]] %s3345_s5 }
   0x2   :  { %3386 = sst [smem:[#allocation42_spill]] %s3346_s6 }
   0x3   :  { %13 = vsyncpa [#allocation4], 0 }
   0x4   :  { %15 = vsyncpa [#allocation4 + $0x1], 0 }
   0x5   :  { %16 = vsyncpa [#allocation6], 0 }
   0x6   :  { %17 = vsyncpa [#allocation9], 0 }
   0x7   :  { %18 = vsyncpa [#allocation5], 0 }
   0x8   :  { %20 = vsyncpa [#allocation5 + $0x1], 0  ;;  %s2442_s27 = smov 0   ;;  %s2444_s28 = smov 0  }
   0x9   :  { %s2446_s29 = smov 0   ;;  %s2448_s30 = smov 0  }
   0xa LB: > { %s2463_s9 = sadd.s32 4294967295, %s2364_s30   ;;  %s1977_s10 = sadd.s32 4294967294, %s2364_s30   ;;  %s2364_s30 = sphi %s2448_s30, %s3465_s30   ;;  %s2360_s29 = sphi %s2446_s29, %s3464_s29   ;;  %s2356_s28 = sphi %s2444_s28, %s3463_s28   ;;  %s2352_s27 = sphi %s2442_s27, %s3462_s27  }
   0xb   : > { %s2467_s11 = sadd.s32 1, %s2364_s30   ;;  %s33_s12 = sadd.s32 1, %s2360_s29 }
   0xc   : > { %s30_s13 = ssub.s32 %s2364_s30, %s2467_s11  ;;  %p40_p0 = scmp.ne.s32.totalorder %s2360_s29, %s2356_s28 }
   0xd   : > { %p31_p1 = scmp.eq.s32.totalorder %s30_s13, 0  ;;  %p41_p2 = scmp.eq.s32.totalorder %s2364_s30, 0 }
   0xe   : > { %p46_p3 = scmp.ne.s32.totalorder %s2356_s28, %s2352_s27  ;;  %p3349_p4 = scmp.eq.s32.totalorder %s2463_s9, 0 }
   0xf   : > { %s2479_s14 = scalar_select %p31_p1, %s2360_s29, %s33_s12  }
  0x10   : > { %p2481_p5 = por %p41_p2, %p40_p0  ;;  %p2487_p6 = por %p3349_p4, %p46_p3 }
  0x11   : > { %p217_p7 = scmp.eq.s32.totalorder %s2463_s9, 1  ;;  %p223_p8 = scmp.eq.s32.totalorder %s1977_s10, 1 }
  0x12   : > { %s3388_s16 = scalar_select %p2487_p6, 1, 0 }
  0x13   : > { %p1978_p9 = scmp.ge.s32.totalorder %s2364_s30, 1  ;;  %p230_p10 = scmp.lt.s32.totalorder %s2364_s30, 3 }
  0x14   : > { %p2494_p11 = por %p217_p7, %p40_p0  ;;  %p2498_p12 = por %p223_p8, %p46_p3 }
  0x15   : > { %p2502_p13 = pnand %p1978_p9, %p230_p10  ;;  %s3392_s5 = sld [smem:[#allocation41_spill]] }
  0x16   : > { %s3389_s17 = scalar_select %p2494_p11, 1, 0 }
  0x17   : > { %s3390_s18 = scalar_select %p2498_p12, 1, 0 }
  0x18   : > { %s3391_s19 = scalar_select %p2502_p13, 1, 0 }
  0x19   : > { %p2142_p1 = pneg %p2502_p13  ;;  %p2159_p2 = scmp.lt.s32.totalorder %s2364_s30, 2 }
  0x1a   : > { %s3394_s6 = sld [smem:[#allocation42_spill]] }
  0x1b   : > { %s255_s22 = sshll.u32 %s3392_s5, 4  ;;  %p2515_p7 = pnand %p2142_p1, %p3349_p4  ;;  %s256_s22 = int_to_ptr.vmem [resolvable:$true] %s255_s22 }
  0x1c   : > { %p2524_p3 = pnand %p2159_p2, %p2481_p5  ;;  %s2230_s12 = scalar_lea.vmem %s256_s22, 16 }
  0x1d   : > { %p2231_p8 = scmp.ne.s32.totalorder %s256_s22, %s2230_s12  ;;  %p2232_p9 = pneg %p2515_p7 }
  0x1e   : > { %s3395_s10 = scalar_select %p2524_p3, 1, 0 }
  0x1f   : > { %p2233_p10 = pnand %p2232_p9, %p2231_p8  ;;  %p2238_p0 = scmp.lt.s32.totalorder %s256_s22, %s256_s22 }
  0x20   : > { %s266_s26 = sshll.u32 %s3394_s6, 4  ;;  %p2239_p4 = scmp.lt.s32.totalorder %s2230_s12, %s2230_s12  ;;  %s267_s26 = int_to_ptr.vmem [resolvable:$true] %s266_s26 }
  0x21   : > { %p2234_p1 = pneg %p2233_p10 }
  0x22   : > { %p2240_p12 = por %p2239_p4, %p2238_p0 }
  0x24   : > { %p2241_p11 = pnand %p2240_p12, %p2234_p1 }
  0x26   : > { %2244 = shalt.err (!%p2241_p11)
}
  0x27   : > { %s2366_s13 = smov [#allocation7]   ;;  %s280_s15 = sand.u32 1, %s2360_s29  }
  0x28   : > { %2145 = dma.vmem_to_smem (!%p2515_p7), %s256_s22, 16, %s2366_s13, [#allocation6]  }
  0x29   : > { %s2245_s20 = scalar_lea.vmem %s267_s26, 16  ;;  %p2253_p8 = scmp.lt.s32.totalorder %s267_s26, %s267_s26 }
  0x2a   : > { %p2246_p5 = scmp.ne.s32.totalorder %s267_s26, %s2245_s20  ;;  %p2254_p10 = scmp.lt.s32.totalorder %s2245_s20, %s2245_s20 }
  0x2c   : > { %p2248_p2 = pnand %p2246_p5, %p2232_p9  ;;  %p2255_p13 = por %p2254_p10, %p2253_p8 }
  0x2e   : > { %p2249_p6 = pneg %p2248_p2 }
  0x30   : > { %p2256_p3 = pnand %p2255_p13, %p2249_p6 }
  0x32   : > { %2259 = shalt.err (!%p2256_p3)
}
  0x33   : > { %s2367_s21 = smov [#allocation8]   ;;  %s1982_s22 = sshll.u32 %s280_s15, 6 }
  0x34   : > { %2148 = dma.vmem_to_smem (!%p2515_p7), %s267_s26, 16, %s2367_s21, [#allocation9]  }
  0x35   : > { %s2099_s24 = sshll.u32 %s2364_s30, 10  ;;  %s284_s20 = scalar_lea.vmem [#allocation3], %s1982_s22 }
  0x36   : > { %s2545_s13 = scalar_lea.hbm %s3340_s0, %s2099_s24  ;;  %s291_s5 = sshll.u32 %s284_s20, 4  ;;  %s2547_s5 = int_to_ptr.vmem [resolvable:$true] %s291_s5 }
  0x37   : > { %s2549_s23 = scalar_lea.sflag [#allocation4], %s280_s15  ;;  %s2260_s6 = scalar_lea.hbm %s2545_s13, 1024 }
  0x38   : > { %p2261_p4 = scmp.ne.s32.totalorder %s2545_s13, %s2260_s6  ;;  %p3396_p6 = scmp.ne.s32.totalorder %s3395_s10, 0 }
  0x39   : > { %s2265_s24 = scalar_lea.hbm %s3340_s0, 2048  ;;  %p2266_p0 = scmp.lt.u32.totalorder %s2545_s13, %s3340_s0 }
  0x3a   : > { %p2262_p11 = pneg %p3396_p6  ;;  %p2267_p7 = scmp.lt.u32.totalorder %s2265_s24, %s2260_s6 }
  0x3b   : > { %p2269_p9 = scmp.lt.u32.totalorder %s2260_s6, %s2545_s13 }
  0x3c   : > { %p2263_p12 = pnand %p2262_p11, %p2261_p4  ;;  %p2268_p3 = por %p2267_p7, %p2266_p0 }
  0x3e   : > { %p2264_p13 = pneg %p2263_p12  ;;  %p2270_p1 = por %p2269_p9, %p2268_p3 }
  0x40   : > { %p2271_p5 = pnand %p2270_p1, %p2264_p13 }
  0x42   : > { %2274 = shalt.err (!%p2271_p5)
}
  0x43   : > { %s2275_s15 = scalar_lea.vmem %s2547_s5, 1024  ;;  %s2368_s22 = smov [#allocation3]  }
  0x44   : > { %p2276_p2 = scmp.ne.s32.totalorder %s2547_s5, %s2275_s15  ;;  %s2280_s20 = sshll.u32 %s2368_s22, 4  ;;  %s2281_s20 = int_to_ptr.vmem [resolvable:$false] %s2280_s20 }
  0x45   : > { %s2282_s26 = scalar_lea.vmem %s2281_s20, 2048  ;;  %p2283_p4 = scmp.lt.s32.totalorder %s2547_s5, %s2281_s20 }
  0x46   : > { %p2278_p8 = pnand %p2276_p2, %p2262_p11  ;;  %p2284_p12 = scmp.lt.s32.totalorder %s2282_s26, %s2275_s15 }
  0x48   : > { %p2279_p10 = pneg %p2278_p8  ;;  %p2285_p0 = por %p2284_p12, %p2283_p4 }
  0x4a   : > { %p2286_p7 = pnand %p2285_p0, %p2279_p10 }
  0x4c   : > { %2289 = shalt.err (!%p2286_p7)
}
  0x4d   : > { %s2369_s6 = smov 256   ;;  %s2370_s21 = smov 16  }
  0x4e   : > { %2152 = dma.hbm_to_vmem [thread:$0]  (!%p3396_p6), %s2545_s13, 1024, %s2547_s5, %s2549_s23, %s2369_s6, %s2369_s6, %s2370_s21  }
  0x4f   : > { %p3397_p11 = scmp.ne.s32.totalorder %s3391_s19, 0 }
  0x51   : > { %303 = sbr.rel (%p3397_p11) target bundleno = 1418 (0x58a), region = 52 }
  0x58   : > { %s2580_s24 = sand.u32 1, %s2356_s28   ;;  %p3398_p13 = scmp.ne.s32.totalorder %s3388_s16, 0 }
  0x59   : > { %s3354_s25 = sshll.u32 %s2580_s24, 6  ;;  %s306_s12 = scalar_lea.sflag [#allocation4], %s2580_s24 }
  0x5a   : > { %s309_s15 = scalar_lea.vmem [#allocation3], %s3354_s25 }
  0x5b   : > { %2335 = dma.done.wait (%p3398_p13), %s306_s12, 1024  }
  0x5c   : > { %2337 = vsyncadd (%p3398_p13), %s306_s12, 4294966272  ;;  %p3399_p6 = scmp.eq.s32.totalorder %s2463_s9, 0 }
  0x5e   : > { %2339 = dma.done.wait (%p3399_p6), [#allocation6], 16   ;;  %p3400_p3 = pmov %p3399_p6 }
  0x60   : > { %2341 = vsyncadd (%p3400_p3), [#allocation6], 4294967280  ;;  %p3401_p9 = pmov %p3400_p3 }
  0x61   : > { %p3402_p1 = pmov %p3400_p3 }
  0x62   : > { %2343 = dma.done.wait (%p3401_p9), [#allocation9], 16  }
  0x63   : > { %2345 = vsyncadd (%p3402_p1), [#allocation9], 4294967280 }
  0x64   : > { %322 = sfence }
  0x65   : > { %v2598_v0 = vld [vmem:[%s309_s15 + $0x20] sm:$0xff]  ;;  %v2600_v1 = vld [vmem:[%s309_s15 + $0x28] sm:$0xff]  ;;  %v2608_v5 = vld [vmem:[%s309_s15 + $0x30] sm:$0xff]  ;;  %v2371_v19 = vmov 0.0|0.0   ;;  %v392_v22 = vlaneseq  ;;  %vm2372_vm1 = vmmov 0   ;;  %v2373_v24 = vmov 0.0  }
  0x66   : > { %v2602_v2 = vld [vmem:[%s309_s15] sm:$0xff]  ;;  %v365_v3 = vadd.f32 %v2600_v1, %v2598_v0  ;;  %v2606_v4 = vld [vmem:[%s309_s15 + $0x8] sm:$0xff]  ;;  %v2610_v6 = vld [vmem:[%s309_s15 + $0x38] sm:$0xff]  ;;  %v382_v15 = vmax.f32 %v2598_v0, %v2600_v1  ;;  %2124 = vmatprep.subr.bf16.mxu0 %v2371_v19  ;;  %2116 = vmatprep.mubr.msk.f32.mxu0 %vm2372_vm1, %v2373_v24  ;;  %vm403_vm2 = vcmask 130112   ;;  %vm410_vm3 = vcmask 195712   ;;  %s2375_s16 = smov 78  }
  0x67   : > { %v359_v7 = vadd.f32 %v2606_v4, %v2602_v2  ;;  %v2614_v8 = vld [vmem:[%s309_s15 + $0x10] sm:$0xff]  ;;  %v2616_v9 = vld [vmem:[%s309_s15 + $0x18] sm:$0xff]  ;;  %v368_v10 = vadd.f32 %v2610_v6, %v2608_v5  ;;  %v376_v13 = vmax.f32 %v2602_v2, %v2606_v4  ;;  %v385_v14 = vmax.f32 %v2608_v5, %v2610_v6  ;;  %v447_v17 = vld [vmem:[%s3341_s1 + $0x8] sm:$0xff]  ;;  %2119 = vmatprep.subr.mxu1 %v2373_v24  ;;  %s2376_s19 = smov 80   ;;  %s2377_s10 = smov 79  }
  0x68   : > { %366 = vadd.xlane.f32.xlu1 %v365_v3  ;;  %v362_v11 = vadd.f32 %v2616_v9, %v2614_v8  ;;  %v379_v12 = vmax.f32 %v2614_v8, %v2616_v9  ;;  %v446_v16 = vld [vmem:[%s3341_s1] sm:$0xff]  ;;  %v448_v20 = vld [vmem:[%s3341_s1 + $0x10] sm:$0xff]  ;;  %v449_v21 = vld [vmem:[%s3341_s1 + $0x18] sm:$0xff]  ;;  %vm696_vm0 = vcmp.lt.s32.totalorder %v392_v22, 512  ;;  %2121 = vmatprep.mubr.msk.f32.mxu1 %vm2372_vm1, %v2373_v24  ;;  %v393_v25 = vand.u32 127, %v392_v22  ;;  %s2018_s22 = sld [smem:[#allocation7 + $0x40]] }
  0x69   : > { %360 = vadd.xlane.f32.xlu0 %v359_v7  ;;  %v2125_v18 = vpack.c.bf16 %v447_v17, %v446_v16  ;;  %v2128_v23 = vpack.c.bf16 %v449_v21, %v448_v20  ;;  %698 = vst.msk [vmem:[#allocation2] sm:$0xf] %vm696_vm0, %v2373_v24  ;;  %699 = vst.msk [vmem:[#allocation2 + $0x4] sm:$0xf] %vm696_vm0, %v2373_v24  ;;  %v2645_v28 = vshrl.u32 %v392_v22, 7  ;;  %vm417_vm4 = vcmask 261312  }
  0x6a   : > { %v398_v27 = vadd.s32 4294967288, %v393_v25  ;;  %v405_v30 = vadd.s32 4294967280, %v393_v25  ;;  %v412_v35 = vadd.s32 4294967272, %v393_v25  ;;  %vm444_vm5 = vcmask 1040384   ;;  %v532_v61 = vld [vmem:[%s3343_s3] sm:$0x3] }
  0x6b   : > { %2126 = vmatpush3.bf16.msra.mxu0 %v2125_v18  ;;  %3403 = vst [vmem:[#allocation15_spill] sm:$0xff] %v2645_v28  ;;  %v396_v33 = vsub.s32 %v393_v25, %v2645_v28  ;;  %vm457_vm6 = vcmask 261120   ;;  %vm544_vm7 = vcmask 1041408   ;;  %v1990_v62 = vld [vmem:[%s3342_s2] ss:$0 sm:$0xff]  ;;  %vm540_vm8 = vcmask 15360  }
  0x6c   : > { %369 = vadd.xlane.f32.xlu1 %v368_v10  ;;  %2127 = vmatprep.subr.bf16.mxu0 %v2371_v19  ;;  %v401_v32 = vsub.s32 %v398_v27, %v2645_v28  ;;  %v408_v38 = vsub.s32 %v405_v30, %v2645_v28  ;;  %v415_v43 = vsub.s32 %v412_v35, %v2645_v28  ;;  %vm718_vm9 = vcmp.lt.s32.totalorder %v392_v22, 256  ;;  %s2017_s20 = sld [smem:[#allocation7 + $0x39]]  ;;  %s2031_s6 = sld [smem:[#allocation7 + $0x3a]] }
  0x6d   : > { %363 = vadd.xlane.f32.xlu0 %v362_v11  ;;  %2120 = vmatpush3.msk.msra.mxu1 %vm544_vm7, %v532_v61  ;;  %v2374_v11 = vmov 1966171168   ;;  %s2032_s26 = sld [smem:[#allocation7 + $0x41]]  ;;  %s2020_s21 = sld [smem:[#allocation7 + $0x4e]]  ;;  %vm755_vm10 = vcmask 916480   ;;  %vm1048_vm11 = vcmask 637952  }
  0x6e   : > { %s2019_s12 = sld [smem:[#allocation7 + $0x47]]  ;;  %s2046_s15 = sld [smem:[#allocation7 + $0x42]]  ;;  %vm777_vm12 = vcmask 654336   ;;  %vm766_vm13 = vcmask 785408   ;;  %vm1196_vm14 = vcmask 646144   ;;  %vm789_vm15 = vcmask 523264  }
  0x6f   : > { %2129 = vmatpush3.bf16.msra.mxu0 %v2128_v23  ;;  %v1992_v23 = vld [vmem:[%s3344_s4] ss:$0 sm:$0xff]  ;;  %s2045_s5 = sld [smem:[#allocation7 + $0x3b]]  ;;  %s2034_s13 = sld [smem:[#allocation7 + $0x4f]]  ;;  %vm800_vm0 = vcmask 392192   ;;  %vm1507_vm1 = vcmask 662528  }
  0x70   : > { %380 = vmax.xlane.f32.xlu1 %v379_v12  ;;  %v704_v12 = vunpack.c.l.s4 %v2374_v11  ;;  %s2033_s23 = sld [smem:[#allocation7 + $0x48]]  ;;  %s2061_s25 = sld [smem:[#allocation7 + $0x4a]]  ;;  %vm1204_vm7 = vcmask 1031168  }
  0x71   : > { %377 = vmax.xlane.f32.xlu0 %v376_v13  ;;  %p3459_p2 = scmp.ne.s32.totalorder %s3389_s17, 0 }
  0x72   : > { %v705_v13 = vunpack.c.0.s8 %v704_v12 }
  0x74   : > { %386 = vmax.xlane.f32.xlu1 %v385_v14  ;;  %v2661_v14 = vsub.s32 %v705_v13, %v2645_v28 }
  0x75   : > { %383 = vmax.xlane.f32.xlu0 %v382_v15  ;;  %v2224_v15 = vld [vmem:[%s3347_s7] ss:$8 sps:$4 sm:$0xff]  }
  0x76   : > { %v889_v16 = vrot.slane %v2224_v15, %v2661_v14 }
  0x78   : > { %v1037_v17 = vcombine.high %v889_v16, %v889_v16  ;;  %v2668_v18 = vrot.slane %v889_v16, %v2661_v14 }
  0x7a   : > { %v1044_v19 = vrot.slane %v1037_v17, %v2661_v14  ;;  %v1192_v20 = vcombine.high %v2668_v18, %v2668_v18 }
  0x7c   : > { %v1342_v21 = vcombine.high %v1044_v19, %v1044_v19 }
  0x85   : > { %1045 = vrot.lane.b32.xlu1 %v1044_v19, %s2375_s16  ;;  %s3357_s16 = smov 96  }
  0x89   : > { %1193 = vrot.lane.b32.xlu1 %v1192_v20, %s2377_s10  ;;  %s3355_s10 = smov 112  }
  0x8b   : > { %1343 = vrot.lane.b32.xlu0 %v1342_v21, %s2376_s19 }
  0xf5   : > { %v367_v26 = vpop.xlane.xlu1 %366 }
  0xf6   : > { %v361_v29 = vpop.xlane.xlu0 %360  ;;  %v374_v39 = vmul.f32 0.00390625, %v367_v26 }
  0xf7   : > { %v372_v34 = vmul.f32 0.00390625, %v361_v29 }
  0xf8   : > { %v409_v49 = vrot.slane %v374_v39, %v408_v38 }
  0xf9   : > { %v370_v31 = vpop.xlane.xlu1 %369  ;;  %v397_v42 = vrot.slane %v372_v34, %v396_v33 }
  0xfa   : > { %v364_v36 = vpop.xlane.xlu0 %363  ;;  %v375_v44 = vmul.f32 0.00390625, %v370_v31 }
  0xfb   : > { %v373_v37 = vmul.f32 0.00390625, %v364_v36 }
  0xfc   : > { %v416_v51 = vrot.slane %v375_v44, %v415_v43 }
  0xfd   : > { %v402_v40 = vrot.slane %v373_v37, %v401_v32  ;;  %v381_v41 = vpop.xlane.xlu1 %380 }
  0xfe   : > { %v378_v45 = vpop.xlane.xlu0 %377  ;;  %v431_v47 = vrot.slane %v381_v41, %v401_v32 }
  0xff   : > { %v404_v46 = vsel %vm403_vm2, %v402_v40, %v397_v42  ;;  %v427_v48 = vrot.slane %v378_v45, %v396_v33  ;;  %v3359_v33 = vsub.s32 0, %v2645_v28 }
 0x100   : > { %v411_v55 = vsel %vm410_vm3, %v409_v49, %v404_v46 }
 0x101   : > { %v387_v50 = vpop.xlane.xlu1 %386  ;;  %v432_v56 = vsel %vm403_vm2, %v431_v47, %v427_v48  ;;  %v418_v58 = vsel %vm417_vm4, %v416_v51, %v411_v55  ;;  %vm1662_vm2 = vcmask 670720  }
 0x102   : > { %v384_v52 = vpop.xlane.xlu0 %383  ;;  %v441_v53 = vrot.slane %v387_v50, %v415_v43 }
 0x103   : > { %v436_v54 = vrot.slane %v384_v52, %v408_v38 }
 0x105   : > { %v437_v57 = vsel %vm410_vm3, %v436_v54, %v432_v56  ;;  %v2680_v36 = vpop.permute.xlu1 %1045  ;;  %vm1810_vm3 = vcmask 678912  }
 0x106   : > { %v442_v59 = vsel %vm417_vm4, %v441_v53, %v437_v57  ;;  %v2682_v37 = vpop.permute.xlu0 %1343  ;;  %vm900_vm4 = vcmask 629760  }
 0x107   : > { %v445_v60 = vsel %vm444_vm5, %v418_v58, %v442_v59  ;;  %vm1056_vm5 = vcmask 1039360  }
 0x108   : > { %2117 = vmatmul.mubr.msk.f32.vlgmr.msra.gmra.mrb[0].mxu0 %vm457_vm6, %v445_v60 }
 0x109   : > { %v2684_v38 = vpop.permute.xlu1 %1193 }
 0x1db   : > { %v527_v63 = vpop.f32.mrb[0].mxu0 }
 0x1dc   : > { %v528_v3 = vadd.f32 %v1990_v62, %v527_v63  ;;  %v2118_v7 = vpop.f32.mrb[1].mxu0 }
 0x1de   : > { %v531_v10 = vmax.f32 %v528_v3, 0.0 }
 0x1e0   : > { %2122 = vmatmul.mubr.msk.f32.vlgmr.msra.gmra.mrb[0].mxu1 %vm540_vm8, %v531_v10  ;;  %vm1353_vm8 = vcmask 1022976  }
 0x2b3   : > { %v614_v24 = vpop.f32.mrb[0].mxu1 }
 0x2b4   : > { %v615_v25 = vadd.f32 %v1992_v23, %v614_v24  ;;  %v2123_v26 = vpop.f32.mrb[1].mxu1 }
 0x2b6   : > { %v619_v27 = vrot.slane %v615_v25, 1 }
 0x2b8   : > { %v621_v29 = vadd.f32 %v619_v27, %v615_v25 }
 0x2ba   : > { %v1995_v30 = vmul.f32 -1.442695, %v621_v29 }
 0x2bc   : > { %2226 = vpow2.f32 %v1995_v30 }
 0x2c6   : > { %v2227_v31 = vpop.eup %2226 }
 0x2c7   : > { %v625_v32 = vadd.f32 1.0, %v2227_v31 }
 0x2c9   : > { %2228 = vrcp.f32 %v625_v32 }
 0x2d3   : > { %v2229_v34 = vpop.eup %2228 }
 0x2d4   : > { %v631_v35 = vrot.slane %v2229_v34, %v3359_v33 }
 0x2d6   : > { %637 = vbcast.lane.b32.xlu1 %v631_v35, 264  ;;  %633 = vbcast.lane.b32.xlu0 %v631_v35, 256 }
 0x2da   : > { %641 = vbcast.lane.b32.xlu1 %v631_v35, 272 }
 0x2de   : > { %645 = vbcast.lane.b32.xlu1 %v631_v35, 280 }
 0x348   : > { %v638_v39 = vpop.permute.xlu1 %637  ;;  %v634_v40 = vpop.permute.xlu0 %633 }
 0x349   : > { %v2687_v41 = vmul.f32 %v638_v39, %v2614_v8  ;;  %v2690_v42 = vmul.f32 %v638_v39, %v2616_v9  ;;  %v2693_v43 = vmul.f32 %v634_v40, %v2602_v2  ;;  %v2696_v44 = vmul.f32 %v634_v40, %v2606_v4 }
 0x34a   : > { %v987_v39 = vstv %s2018_s22  ;;  %v977_v40 = vstv %s2017_s20  ;;  %s2060_s22 = sld [smem:[#allocation7 + $0x43]]  ;;  %s2059_s20 = sld [smem:[#allocation7 + $0x3c]] }
 0x34b   : > { %3404 = vst [vmem:[#allocation16_spill] sm:$0xff] %v2687_v41  ;;  %3405 = vst [vmem:[#allocation17_spill] sm:$0xff] %v2690_v42  ;;  %v655_v8 = vadd.f32 %v2687_v41, %v2693_v43  ;;  %v664_v9 = vadd.f32 %v2690_v42, %v2696_v44 }
 0x34c   : > { %3406 = vst [vmem:[#allocation18_spill] sm:$0xff] %v2693_v43  ;;  %3407 = vst [vmem:[#allocation19_spill] sm:$0xff] %v2696_v44  ;;  %v642_v45 = vpop.permute.xlu1 %641 }
 0x34d   : > { %v2699_v46 = vmul.f32 %v642_v45, %v2598_v0  ;;  %v2702_v47 = vmul.f32 %v642_v45, %v2600_v1 }
 0x34f   : > { %3408 = vst [vmem:[#allocation20_spill] sm:$0xff] %v2699_v46  ;;  %3409 = vst [vmem:[#allocation21_spill] sm:$0xff] %v2702_v47  ;;  %v656_v2 = vadd.f32 %v655_v8, %v2699_v46  ;;  %v665_v49 = vadd.f32 %v664_v9, %v2702_v47  ;;  %v676_v1 = vmax.f32 %v2693_v43, %v2699_v46 }
 0x350   : > { %v646_v48 = vpop.permute.xlu1 %645  ;;  %v685_v50 = vmax.f32 %v2696_v44, %v2702_v47 }
 0x351   : > { %v2711_v4 = vmul.f32 %v646_v48, %v2608_v5  ;;  %v2714_v0 = vmul.f32 %v646_v48, %v2610_v6  ;;  %v1142_v48 = vstv %s2032_s26  ;;  %s2380_s26 = smov 64  }
 0x353   : > { %3410 = vst [vmem:[#allocation22_spill] sm:$0xff] %v2711_v4  ;;  %3411 = vst [vmem:[#allocation23_spill] sm:$0xff] %v2714_v0  ;;  %v657_v51 = vadd.f32 %v656_v2, %v2711_v4  ;;  %v666_v52 = vadd.f32 %v665_v49, %v2714_v0  ;;  %v677_v53 = vmax.f32 %v2687_v41, %v2711_v4  ;;  %v1132_v2 = vstv %s2031_s6  ;;  %s2022_s6 = sld [smem:[#allocation7 + $0x5c]] }
 0x354   : > { %v686_v5 = vmax.f32 %v2690_v42, %v2714_v0 }
 0x355   : > { %v658_v54 = vrot.slane %v657_v51, 4  ;;  %v667_v55 = vrot.slane %v666_v52, 4  ;;  %v678_v6 = vmax.f32 %v676_v1, %v677_v53 }
 0x356   : > { %v687_v56 = vmax.f32 %v685_v50, %v686_v5 }
 0x357   : > { %v659_v57 = vadd.f32 %v658_v54, %v657_v51  ;;  %v668_v58 = vadd.f32 %v667_v55, %v666_v52  ;;  %v679_v59 = vrot.slane %v678_v6, 4  ;;  %v1008_v51 = vstv %s2020_s21  ;;  %s2021_s21 = sld [smem:[#allocation7 + $0x55]] }
 0x358   : > { %v688_v60 = vrot.slane %v687_v56, 4  ;;  %v997_v52 = vstv %s2019_s12  ;;  %v1291_v55 = vstv %s2046_s15  ;;  %s2048_s12 = sld [smem:[#allocation7 + $0x50]]  ;;  %s2047_s15 = sld [smem:[#allocation7 + $0x49]] }
 0x359   : > { %v660_v61 = vrot.slane %v659_v57, 2  ;;  %v669_v62 = vrot.slane %v668_v58, 2  ;;  %v680_v63 = vmax.f32 %v678_v6, %v679_v59  ;;  %v1281_v6 = vstv %s2045_s5  ;;  %s2074_s5 = sld [smem:[#allocation7 + $0x44]] }
 0x35a   : > { %v689_v3 = vmax.f32 %v687_v56, %v688_v60  ;;  %v1163_v59 = vstv %s2034_s13  ;;  %v1152_v60 = vstv %s2033_s23  ;;  %s2073_s13 = sld [smem:[#allocation7 + $0x3d]]  ;;  %s2049_s23 = sld [smem:[#allocation7 + $0x57]] }
 0x35b   : > { %v661_v7 = vadd.f32 %v660_v61, %v659_v57  ;;  %v670_v10 = vadd.f32 %v669_v62, %v668_v58  ;;  %v681_v11 = vrot.slane %v680_v63, 2 }
 0x35c   : > { %v690_v12 = vrot.slane %v689_v3, 2 }
 0x35d   : > { %v662_v13 = vrot.slane %v661_v7, 1  ;;  %v671_v15 = vrot.slane %v670_v10, 1  ;;  %v682_v16 = vmax.f32 %v680_v63, %v681_v11 }
 0x35e   : > { %v691_v17 = vmax.f32 %v689_v3, %v690_v12  ;;  %v1439_v3 = vstv %s2060_s22  ;;  %v1028_v12 = vstv %s2022_s6  ;;  %s2035_s22 = sld [smem:[#allocation7 + $0x56]]  ;;  %s2382_s6 = smov 48  }
 0x35f   : > { %v663_v19 = vadd.f32 %v662_v13, %v661_v7  ;;  %v672_v20 = vadd.f32 %v671_v15, %v670_v10  ;;  %v683_v21 = vrot.slane %v682_v16, 1  ;;  %v1429_v7 = vstv %s2059_s20  ;;  %s2381_s20 = smov 32  }
 0x360   : > { %v692_v23 = vrot.slane %v691_v17, 1  ;;  %v1018_v13 = vstv %s2021_s21  ;;  %s2075_s21 = sld [smem:[#allocation7 + $0x4b]] }
 0x361   : > { %v674_v24 = vmul.f32 0.03125, %v663_v19  ;;  %v675_v25 = vmul.f32 0.03125, %v672_v20  ;;  %v684_v26 = vmax.f32 %v682_v16, %v683_v21  ;;  %v1313_v19 = vstv %s2048_s12  ;;  %s2063_s12 = sld [smem:[#allocation7 + $0x58]] }
 0x362   : > { %v693_v27 = vmax.f32 %v691_v17, %v692_v23  ;;  %v1302_v21 = vstv %s2047_s15  ;;  %s2087_s15 = sld [smem:[#allocation7 + $0x3e]] }
 0x363   : > { %v702_v29 = vcombine.low %v674_v24, %v675_v25 }
 0x364   : > { %v723_v30 = vcombine.low %v684_v26, %v693_v27  ;;  %v1601_v26 = vstv %s2074_s5  ;;  %v1591_v27 = vstv %s2073_s13  ;;  %s2089_s5 = sld [smem:[#allocation7 + $0x4c]]  ;;  %s2036_s13 = sld [smem:[#allocation7 + $0x5d]] }
 0x365   : > { %v709_v31 = vrot.slane %v702_v29, %v2661_v14 }
 0x366   : > { %v730_v32 = vrot.slane %v723_v30, %v2661_v14 }
 0x367   : > { %v716_v34 = vrot.slane %v709_v31, %v2661_v14  ;;  %v1323_v31 = vstv %s2049_s23  ;;  %s2064_s23 = sld [smem:[#allocation7 + $0x5f]] }
 0x368   : > { %v737_v35 = vrot.slane %v730_v32, %v2661_v14  ;;  %v1173_v32 = vstv %s2035_s22  ;;  %s2062_s22 = sld [smem:[#allocation7 + $0x51]] }
 0x369   : > { %720 = vst.msk [vmem:[#allocation2 + $0x1] sm:$0x3] %vm718_vm9, %v716_v34 }
 0x36a   : > { %740 = vst.msk [vmem:[#allocation2 + $0x5] sm:$0x3] %vm718_vm9, %v737_v35  ;;  %vm1515_vm9 = vcmask 1014784  }
 0x371   : > { %v2731_v45 = vld [vmem:[#allocation2 + $0x4] sm:$0x7] }
 0x372   : > { %v988_v8 = vmul.f32 %v987_v39, %v2731_v45  ;;  %v978_v22 = vmul.f32 %v977_v40, %v2731_v45  ;;  %v2735_v9 = vld [vmem:[#allocation2 + $0x4] sm:$0x7]  ;;  %v998_v5 = vmul.f32 %v997_v52, %v2731_v45  ;;  %v1612_v40 = vstv %s2075_s21  ;;  %s2011_s21 = sld [smem:[#allocation7 + $0xf]] }
 0x373   : > { %v1143_v49 = vmul.f32 %v1142_v48, %v2735_v9  ;;  %v1133_v1 = vmul.f32 %v1132_v2, %v2735_v9  ;;  %v1007_v50 = vld [vmem:[#allocation2 + $0x5] sm:$0x7]  ;;  %v1153_v62 = vmul.f32 %v1152_v60, %v2735_v9 }
 0x374   : > { %990 = vrot.lane.b32.xlu1 %v988_v8, %s3357_s16  ;;  %980 = vrot.lane.b32.xlu0 %v978_v22, %s3355_s10  ;;  %v1009_v53 = vmul.f32 %v1008_v51, %v1007_v50  ;;  %v2744_v54 = vld [vmem:[#allocation2 + $0x4] sm:$0x7]  ;;  %v1029_v15 = vmul.f32 %v1028_v12, %v1007_v50  ;;  %v1019_v16 = vmul.f32 %v1018_v13, %v1007_v50  ;;  %v1450_v22 = vstv %s2061_s25  ;;  %s2088_s25 = sld [smem:[#allocation7 + $0x45]] }
 0x375   : > { %v1292_v56 = vmul.f32 %v1291_v55, %v2744_v54  ;;  %v1282_v57 = vmul.f32 %v1281_v6, %v2744_v54  ;;  %v2750_v58 = vld [vmem:[#allocation2 + $0x5] sm:$0x7]  ;;  %v1746_v50 = vstv %s2087_s15  ;;  %v1183_v55 = vstv %s2036_s13  ;;  %s2012_s15 = sld [smem:[#allocation7 + $0x16]]  ;;  %s2038_s13 = sld [smem:[#allocation7 + $0xa]] }
 0x376   : > { %v1164_v61 = vmul.f32 %v1163_v59, %v2750_v58  ;;  %v2756_v63 = vld [vmem:[#allocation2 + $0x4] sm:$0x7]  ;;  %v1174_v35 = vmul.f32 %v1173_v32, %v2750_v58  ;;  %v1460_v59 = vstv %s2062_s22  ;;  %s2010_s22 = sld [smem:[#allocation7 + $0x8]] }
 0x377   : > { %v1440_v10 = vmul.f32 %v1439_v3, %v2756_v63  ;;  %v1430_v11 = vmul.f32 %v1429_v7, %v2756_v63  ;;  %v2764_v17 = vld [vmem:[#allocation2 + $0x5] sm:$0x7]  ;;  %v2797_v3 = vld [vmem:[#allocation2] sm:$0x7] }
 0x378   : > { %1145 = vrot.lane.b32.xlu1 %v1143_v49, %s3357_s16  ;;  %1135 = vrot.lane.b32.xlu0 %v1133_v1, %s3355_s10  ;;  %v1301_v20 = vld [vmem:[#allocation2 + $0x5] sm:$0x3]  ;;  %v1314_v23 = vmul.f32 %v1313_v19, %v2764_v17  ;;  %v1324_v34 = vmul.f32 %v1323_v31, %v2764_v17  ;;  %v1470_v49 = vstv %s2063_s12  ;;  %s2050_s12 = sld [smem:[#allocation7 + $0x5e]]  ;;  %v921_v7 = vstv %s2011_s21  ;;  %v2807_v19 = vld [vmem:[#allocation2] sm:$0x7]  ;;  %s2024_s21 = sld [smem:[#allocation7 + $0x9]] }
 0x379   : > { %v1303_v24 = vmul.f32 %v1302_v21, %v1301_v20  ;;  %v2769_v25 = vld [vmem:[#allocation2 + $0x4] sm:$0x7] }
 0x37a   : > { %v1602_v29 = vmul.f32 %v1601_v26, %v2769_v25  ;;  %v1592_v30 = vmul.f32 %v1591_v27, %v2769_v25  ;;  %v2779_v39 = vld [vmem:[#allocation2 + $0x5] sm:$0x7] }
 0x37b   : > { %v1449_v8 = vld [vmem:[#allocation2 + $0x5] sm:$0x7]  ;;  %v1613_v48 = vmul.f32 %v1612_v40, %v2779_v39  ;;  %v931_v12 = vstv %s2012_s15  ;;  %v1214_v20 = vstv %s2038_s13  ;;  %s2025_s15 = sld [smem:[#allocation7 + $0x10]]  ;;  %s2013_s13 = sld [smem:[#allocation7 + $0x1d]]  ;;  %v1096_v40 = vld [vmem:[#allocation2 + $0x1] sm:$0x7] }
 0x37c   : > { %1011 = vrot.lane.b32.xlu1 %v1009_v53, %s2380_s26  ;;  %1000 = vrot.lane.b32.xlu0 %v998_v5, %s2376_s19  ;;  %v1451_v2 = vmul.f32 %v1450_v22, %v1449_v8  ;;  %v2784_v1 = vld [vmem:[#allocation2 + $0x4] sm:$0x7]  ;;  %v1471_v51 = vmul.f32 %v1470_v49, %v1449_v8  ;;  %v1767_v5 = vstv %s2089_s5  ;;  %s2076_s5 = sld [smem:[#allocation7 + $0x52]] }
 0x37d   : > { %v1747_v52 = vmul.f32 %v1746_v50, %v2784_v1  ;;  %v2789_v53 = vld [vmem:[#allocation2 + $0x5] sm:$0x7]  ;;  %v941_v50 = vld [vmem:[#allocation2 + $0x1] sm:$0x7] }
 0x37e   : > { %v1768_v6 = vmul.f32 %v1767_v5, %v2789_v53  ;;  %v1066_v32 = vstv %s2024_s21  ;;  %s2014_s21 = sld [smem:[#allocation7 + $0x24]] }
 0x380   : > { %1294 = vrot.lane.b32.xlu1 %v1292_v56, %s3357_s16  ;;  %1284 = vrot.lane.b32.xlu0 %v1282_v57, %s3355_s10  ;;  %v1184_v56 = vmul.f32 %v1183_v55, %v2750_v58  ;;  %v1480_v57 = vstv %s2064_s23  ;;  %s2026_s23 = sld [smem:[#allocation7 + $0x17]] }
 0x381   : > { %v1481_v60 = vmul.f32 %v1480_v57, %v1449_v8  ;;  %v1076_v22 = vstv %s2025_s15  ;;  %s2040_s15 = sld [smem:[#allocation7 + $0x18]] }
 0x384   : > { %1166 = vrot.lane.b32.xlu1 %v1164_v61, %s2380_s26  ;;  %1155 = vrot.lane.b32.xlu0 %v1153_v62, %s2376_s19  ;;  %v1461_v61 = vmul.f32 %v1460_v59, %v1449_v8  ;;  %v1756_v62 = vstv %s2088_s25  ;;  %s2052_s25 = sld [smem:[#allocation7 + $0xb]]  ;;  %v1245_v59 = vld [vmem:[#allocation2 + $0x1] sm:$0x7] }
 0x385   : > { %v1757_v58 = vmul.f32 %v1756_v62, %v2784_v1 }
 0x386   : > { %v1086_v26 = vstv %s2026_s23  ;;  %s2015_s23 = sld [smem:[#allocation7 + $0x2b]] }
 0x388   : > { %1442 = vrot.lane.b32.xlu1 %v1440_v10, %s3357_s16  ;;  %1432 = vrot.lane.b32.xlu0 %v1430_v11, %s3355_s10  ;;  %v922_v10 = vmul.f32 %v921_v7, %v2797_v3  ;;  %v1333_v11 = vstv %s2050_s12  ;;  %s2027_s12 = sld [smem:[#allocation7 + $0x1e]] }
 0x389   : > { %v1334_v13 = vmul.f32 %v1333_v11, %v2764_v17  ;;  %v911_v17 = vstv %s2010_s22  ;;  %s2039_s22 = sld [smem:[#allocation7 + $0x11]]  ;;  %v1234_v11 = vld [vmem:[#allocation2 + $0x1] sm:$0x3] }
 0x38a   : > { %v1363_v31 = vstv %s2052_s25  ;;  %s2041_s25 = sld [smem:[#allocation7 + $0x1f]] }
 0x38c   : > { %1031 = vrot.lane.b32.xlu1 %v1029_v15, %s2381_s20  ;;  %1021 = vrot.lane.b32.xlu0 %v1019_v16, %s2382_s6  ;;  %v932_v15 = vmul.f32 %v931_v12, %v2797_v3  ;;  %v1622_v16 = vstv %s2076_s5  ;;  %s2053_s5 = sld [smem:[#allocation7 + $0x12]]  ;;  %v962_v55 = vstv %s2015_s23  ;;  %s2055_s23 = sld [smem:[#allocation7 + $0x20]] }
 0x38d   : > { %v1623_v21 = vmul.f32 %v1622_v16, %v2779_v39  ;;  %v1235_v12 = vstv %s2040_s15  ;;  %s2080_s15 = sld [smem:[#allocation7 + $0xd]] }
 0x38e   : > { %v1097_v8 = vstv %s2027_s12  ;;  %s2067_s12 = sld [smem:[#allocation7 + $0x13]] }
 0x390   : > { %1316 = vrot.lane.b32.xlu1 %v1314_v23, %s2380_s26  ;;  %1305 = vrot.lane.b32.xlu0 %v1303_v24, %s2376_s19  ;;  %v1215_v23 = vmul.f32 %v1214_v20, %v2807_v19  ;;  %v2813_v24 = vld [vmem:[#allocation2] sm:$0x7] }
 0x391   : > { %v1087_v27 = vmul.f32 %v1086_v26, %v2813_v24  ;;  %v1383_v26 = vld [vmem:[#allocation2 + $0x1] sm:$0x7] }
 0x392   : > { %v1373_v49 = vstv %s2053_s5  ;;  %s2029_s5 = sld [smem:[#allocation7 + $0x2c]] }
 0x394   : > { %1604 = vrot.lane.b32.xlu1 %v1602_v29, %s3357_s16  ;;  %1594 = vrot.lane.b32.xlu0 %v1592_v30, %s3355_s10  ;;  %v912_v29 = vmul.f32 %v911_v17, %v2797_v3  ;;  %v2819_v30 = vld [vmem:[#allocation2] sm:$0x7]  ;;  %v1394_v17 = vstv %s2055_s23  ;;  %s2057_s23 = sld [smem:[#allocation7 + $0x2e]] }
 0x398   : > { %1326 = vrot.lane.b32.xlu1 %v1324_v34, %s2382_s6  ;;  %1176 = vrot.lane.b32.xlu0 %v1174_v35, %s2382_s6  ;;  %v1364_v34 = vmul.f32 %v1363_v31, %v2819_v30  ;;  %v1067_v35 = vmul.f32 %v1066_v32, %v2813_v24  ;;  %v1117_v16 = vstv %s2029_s5  ;;  %v2846_v32 = vld [vmem:[#allocation2] sm:$0x7]  ;;  %s2069_s5 = sld [smem:[#allocation7 + $0x21]] }
 0x39c   : > { %1615 = vrot.lane.b32.xlu1 %v1613_v48, %s2376_s19  ;;  %1453 = vrot.lane.b32.xlu0 %v1451_v2, %s2376_s19  ;;  %v1098_v48 = vmul.f32 %v1097_v8, %v1096_v40  ;;  %v1077_v2 = vmul.f32 %v1076_v22, %v2813_v24 }
 0x3a0   : > { %1473 = vrot.lane.b32.xlu1 %v1471_v51, %s2382_s6  ;;  %1749 = vrot.lane.b32.xlu0 %v1747_v52, %s3355_s10  ;;  %v942_v51 = vstv %s2013_s13  ;;  %v1374_v52 = vmul.f32 %v1373_v49, %v2819_v30  ;;  %s2066_s13 = sld [smem:[#allocation7 + $0xc]] }
 0x3a1   : > { %v943_v5 = vmul.f32 %v942_v51, %v941_v50  ;;  %v1556_v51 = vstv %s2069_s5  ;;  %s2085_s5 = sld [smem:[#allocation7 + $0x30]] }
 0x3a4   : > { %1770 = vrot.lane.b32.xlu1 %v1768_v6, %s2376_s19  ;;  %1186 = vrot.lane.b32.xlu0 %v1184_v56, %s2381_s20  ;;  %v1224_v6 = vstv %s2039_s22  ;;  %v963_v56 = vmul.f32 %v962_v55, %v941_v50  ;;  %s2028_s22 = sld [smem:[#allocation7 + $0x25]] }
 0x3a5   : > { %v1225_v57 = vmul.f32 %v1224_v6, %v2807_v19  ;;  %v1414_v6 = vstv %s2057_s23  ;;  %s2090_s23 = sld [smem:[#allocation7 + $0x53]] }
 0x3a6   : > { %v1525_v20 = vstv %s2066_s13  ;;  %s2042_s13 = sld [smem:[#allocation7 + $0x26]] }
 0x3a8   : > { %1483 = vrot.lane.b32.xlu1 %v1481_v60, %s2381_s20  ;;  %1463 = vrot.lane.b32.xlu0 %v1461_v61, %s2380_s26  ;;  %v1246_v60 = vstv %s2041_s25  ;;  %v952_v61 = vstv %s2014_s21  ;;  %s2081_s25 = sld [smem:[#allocation7 + $0x14]]  ;;  %s2054_s21 = sld [smem:[#allocation7 + $0x19]] }
 0x3a9   : > { %v1247_v62 = vmul.f32 %v1246_v60, %v1245_v59  ;;  %v953_v7 = vmul.f32 %v952_v61, %v941_v50  ;;  %v1545_v50 = vld [vmem:[#allocation2 + $0x1] sm:$0x7]  ;;  %v1415_v61 = vmul.f32 %v1414_v6, %v1383_v26 }
 0x3ac   : > { %1759 = vrot.lane.b32.xlu0 %v1757_v58, %s3357_s16  ;;  %924 = vrot.lane.b32.xlu1 %v922_v10, %s3357_s16  ;;  %v2836_v58 = vld [vmem:[#allocation2] sm:$0x7]  ;;  %v1535_v10 = vstv %s2067_s12  ;;  %s2043_s12 = sld [smem:[#allocation7 + $0x2d]] }
 0x3b0   : > { %1336 = vrot.lane.b32.xlu0 %v1334_v13, %s2381_s20  ;;  %934 = vrot.lane.b32.xlu1 %v932_v15, %s2376_s19  ;;  %v1536_v13 = vmul.f32 %v1535_v10, %v2836_v58  ;;  %v1236_v15 = vmul.f32 %v1235_v12, %v1234_v11 }
 0x3b4   : > { %1625 = vrot.lane.b32.xlu0 %v1623_v21, %s2380_s26  ;;  %1217 = vrot.lane.b32.xlu1 %v1215_v23, %s3355_s10  ;;  %v1118_v21 = vmul.f32 %v1117_v16, %v1096_v40  ;;  %v1526_v23 = vmul.f32 %v1525_v20, %v2836_v58 }
 0x3b8   : > { %1089 = vrot.lane.b32.xlu1 %v1087_v27, %s2376_s19  ;;  %914 = vrot.lane.b32.xlu0 %v912_v29, %s3355_s10  ;;  %v1107_v27 = vstv %s2028_s22  ;;  %v1395_v29 = vmul.f32 %v1394_v17, %v1383_v26  ;;  %s2068_s22 = sld [smem:[#allocation7 + $0x1a]] }
 0x3b9   : > { %v1108_v31 = vmul.f32 %v1107_v27, %v1096_v40 }
 0x3bc   : > { %1366 = vrot.lane.b32.xlu1 %v1364_v34, %s3355_s10  ;;  %1069 = vrot.lane.b32.xlu0 %v1067_v35, %s3355_s10  ;;  %v1690_v34 = vstv %s2081_s25  ;;  %v1384_v35 = vstv %s2054_s21  ;;  %s2083_s25 = sld [smem:[#allocation7 + $0x22]]  ;;  %s2056_s21 = sld [smem:[#allocation7 + $0x27]] }
 0x3bd   : > { %v1691_v8 = vmul.f32 %v1690_v34, %v2846_v32  ;;  %v1385_v22 = vmul.f32 %v1384_v35, %v1383_v26 }
 0x3c0   : > { %1100 = vrot.lane.b32.xlu1 %v1098_v48, %s2380_s26  ;;  %1079 = vrot.lane.b32.xlu0 %v1077_v2, %s3357_s16  ;;  %v1266_v48 = vstv %s2043_s12  ;;  %v1680_v2 = vstv %s2080_s15  ;;  %s2071_s12 = sld [smem:[#allocation7 + $0x2f]]  ;;  %s2082_s15 = sld [smem:[#allocation7 + $0x1b]] }
 0x3c1   : > { %v1267_v40 = vmul.f32 %v1266_v48, %v1245_v59  ;;  %v1681_v49 = vmul.f32 %v1680_v2, %v2846_v32 }
 0x3c2   : > { %v1711_v10 = vstv %s2083_s25  ;;  %v1404_v11 = vstv %s2056_s21  ;;  %s2384_s25 = smov 81   ;;  %s2001_s21 = sld [smem:[#allocation7 + $0x2a]] }
 0x3c4   : > { %1376 = vrot.lane.b32.xlu1 %v1374_v52, %s3357_s16  ;;  %945 = vrot.lane.b32.xlu0 %v943_v5, %s2380_s26  ;;  %v1256_v52 = vstv %s2042_s13  ;;  %v1557_v5 = vmul.f32 %v1556_v51, %v1545_v50  ;;  %s2070_s13 = sld [smem:[#allocation7 + $0x28]] }
 0x3c5   : > { %v1257_v55 = vmul.f32 %v1256_v52, %v1245_v59 }
 0x3c6   : > { %v1576_v16 = vstv %s2071_s12  ;;  %v1701_v20 = vstv %s2082_s15  ;;  %s2078_s12 = sld [smem:[#allocation7 + $0x60]]  ;;  %s2077_s15 = sld [smem:[#allocation7 + $0x59]] }
 0x3c8   : > { %965 = vrot.lane.b32.xlu1 %v963_v56, %s2381_s20  ;;  %1227 = vrot.lane.b32.xlu0 %v1225_v57, %s3357_s16  ;;  %v1546_v56 = vstv %s2068_s22  ;;  %s2084_s22 = sld [smem:[#allocation7 + $0x29]] }
 0x3ca   : > { %v1566_v34 = vstv %s2070_s13  ;;  %s2910_s13 = sld [smem:[#allocation7 + $0x1c]] }
 0x3cb   : > { %v1567_v2 = vmul.f32 %v1566_v34, %v1545_v50 }
 0x3cc   : > { %1249 = vrot.lane.b32.xlu1 %v1247_v62, %s2380_s26  ;;  %955 = vrot.lane.b32.xlu0 %v953_v7, %s2382_s6  ;;  %v1547_v62 = vmul.f32 %v1546_v56, %v1545_v50  ;;  %v1700_v7 = vld [vmem:[#allocation2 + $0x1] sm:$0x7]  ;;  %v1642_v56 = vstv %s2078_s12  ;;  %s1998_s12 = sld [smem:[#allocation7 + $0x15]] }
 0x3d0   : > { %1538 = vrot.lane.b32.xlu1 %v1536_v13, %s3357_s16  ;;  %1238 = vrot.lane.b32.xlu0 %v1236_v15, %s2376_s19  ;;  %v1712_v13 = vmul.f32 %v1711_v10, %v1700_v7  ;;  %v1405_v15 = vmul.f32 %v1404_v11, %v1383_v26  ;;  %v1577_v26 = vmul.f32 %v1576_v16, %v1545_v50 }
 0x3d1   : > { %v1643_v11 = vmul.f32 %v1642_v56, %v2779_v39 }
 0x3d4   : > { %1120 = vrot.lane.b32.xlu1 %v1118_v21, %s2381_s20  ;;  %1528 = vrot.lane.b32.xlu0 %v1526_v23, %s3355_s10  ;;  %v741_v21 = vld [vmem:[%s3347_s7] sm:$0x7f]  ;;  %v742_v23 = vld [vmem:[%s3347_s7 + $0x8] sm:$0x7f] }
 0x3d5   : > { %v1489_v35 = vcombine.high %v741_v21, %v742_v23 }
 0x3d7   : > { %v1496_v51 = vrot.slane %v1489_v35, %v2661_v14 }
 0x3d8   : > { %1397 = vrot.lane.b32.xlu1 %v1395_v29, %s2380_s26  ;;  %1110 = vrot.lane.b32.xlu0 %v1108_v31, %s2382_s6  ;;  %v1702_v29 = vmul.f32 %v1701_v20, %v1700_v7  ;;  %v1731_v31 = vstv %s2085_s5  ;;  %s1997_s5 = sld [smem:[#allocation7 + $0xe]] }
 0x3d9   : > { %v1732_v48 = vmul.f32 %v1731_v31, %v1700_v7  ;;  %v1651_v50 = vcombine.high %v1496_v51, %v1496_v51  ;;  %v2919_v31 = vld [vmem:[#allocation2] sm:$0x7] }
 0x3da   : > { %3412 = vst [vmem:[#allocation24_spill] sm:$0xff] %v2919_v31 }
 0x3dc   : > { %1693 = vrot.lane.b32.xlu1 %v1691_v8, %s3357_s16  ;;  %1387 = vrot.lane.b32.xlu0 %v1385_v22, %s2376_s19  ;;  %s2091_s16 = sld [smem:[#allocation7 + $0x5a]] }
 0x3de   : > { %v760_v34 = vstv %s1997_s5  ;;  %s3415_s5 = smov 96  }
 0x3e0   : > { %1269 = vrot.lane.b32.xlu1 %v1267_v40, %s2381_s20  ;;  %1683 = vrot.lane.b32.xlu0 %v1681_v49, %s3355_s10  ;;  %v1777_v40 = vstv %s2090_s23  ;;  %v1721_v49 = vstv %s2084_s22  ;;  %s2092_s10 = sld [smem:[#allocation7 + $0x61]]  ;;  %s2912_s23 = sld [smem:[#allocation7 + $0x7]] }
 0x3e1   : > { %v1722_v6 = vmul.f32 %v1721_v49, %v1700_v7  ;;  %v1658_v7 = vrot.slane %v1651_v50, %v2661_v14  ;;  %s2383_s22 = smov 82   ;;  %v782_v49 = vld [vmem:[#allocation2 + $0x1] sm:$0x7] }
 0x3e2   : > { %v1787_v21 = vstv %s2091_s16  ;;  %s2004_s16 = sld [smem:[#allocation7 + $0x3f]] }
 0x3e4   : > { %1559 = vrot.lane.b32.xlu1 %v1557_v5, %s2380_s26  ;;  %1259 = vrot.lane.b32.xlu0 %v1257_v55, %s2382_s6  ;;  %v1778_v55 = vmul.f32 %v1777_v40, %v2789_v53  ;;  %v761_v40 = vmul.f32 %v760_v34, %v2919_v31 }
 0x3e6   : > { %v2858_v57 = vpop.permute.xlu1 %990  ;;  %v2860_v60 = vpop.permute.xlu0 %980 }
 0x3e8   : > { %1417 = vrot.lane.b32.xlu1 %v1415_v61, %s2381_s20  ;;  %1549 = vrot.lane.b32.xlu0 %v1547_v62, %s2376_s19  ;;  %v1632_v61 = vstv %s2077_s15  ;;  %s2385_s15 = smov 83  }
 0x3ea   : > { %v2864_v59 = vpop.permute.xlu1 %1145  ;;  %v2866_v12 = vpop.permute.xlu0 %1135 }
 0x3ec   : > { %1714 = vrot.lane.b32.xlu1 %v1712_v13, %s2380_s26  ;;  %1407 = vrot.lane.b32.xlu0 %v1405_v15, %s2382_s6  ;;  %v1633_v13 = vmul.f32 %v1632_v61, %v2779_v39  ;;  %v1503_v15 = vrot.slane %v1496_v51, %v2661_v14  ;;  %v1788_v14 = vmul.f32 %v1787_v21, %v2789_v53  ;;  %v783_v51 = vstv %s2910_s13  ;;  %s3417_s13 = smov 112  }
 0x3ed   : > { %v784_v61 = vmul.f32 %v783_v51, %v782_v49 }
 0x3ee   : > { %v2876_v17 = vpop.permute.xlu1 %1011  ;;  %v2878_v27 = vpop.permute.xlu0 %1000  ;;  %v1806_v39 = vcombine.high %v1503_v15, %v1503_v15 }
 0x3f0   : > { %1579 = vrot.lane.b32.xlu1 %v1577_v26, %s2381_s20  ;;  %1704 = vrot.lane.b32.xlu0 %v1702_v29, %s2376_s19  ;;  %v1797_v29 = vstv %s2092_s10  ;;  %s2000_s10 = sld [smem:[#allocation7 + $0x23]] }
 0x3f2   : > { %v2882_v8 = vpop.permute.xlu1 %1294  ;;  %v2884_v22 = vpop.permute.xlu0 %1284 }
 0x3f4   : > { %1734 = vrot.lane.b32.xlu1 %v1732_v48, %s2381_s20  ;;  %1569 = vrot.lane.b32.xlu0 %v1567_v2, %s2382_s6  ;;  %v1798_v2 = vmul.f32 %v1797_v29, %v2789_v53  ;;  %v771_v53 = vstv %s1998_s12  ;;  %s2007_s12 = sld [smem:[#allocation7 + $0x54]] }
 0x3f5   : > { %v772_v21 = vmul.f32 %v771_v53, %v2919_v31 }
 0x3f6   : > { %v2889_v52 = vpop.permute.xlu1 %1166  ;;  %v2891_v5 = vpop.permute.xlu0 %1155  ;;  %v794_v29 = vstv %s2000_s10  ;;  %s2999_s10 = sld [smem:[#allocation7 + $0x37]] }
 0x3f7   : > { %v795_v51 = vmul.f32 %v794_v29, %v782_v49 }
 0x3f8   : > { %1780 = vrot.lane.b32.xlu1 %v1778_v55, %s2380_s26  ;;  %1724 = vrot.lane.b32.xlu0 %v1722_v6, %s2382_s6  ;;  %v749_v55 = vstv %s2912_s23  ;;  %s2008_s23 = sld [smem:[#allocation7 + $0x5b]] }
 0x3f9   : > { %v750_v50 = vmul.f32 %v749_v55, %v2919_v31  ;;  %v850_v55 = vld [vmem:[#allocation2 + $0x5] sm:$0x7]  ;;  %v1047_v31 = vrot.slane %v2680_v36, 7 }
 0x3fa   : > { %v2896_v62 = vpop.permute.xlu1 %1442  ;;  %v2898_v10 = vpop.permute.xlu0 %1432 }
 0x3fc   : > { %1645 = vrot.lane.b32.xlu1 %v1643_v11, %s2381_s20  ;;  %1635 = vrot.lane.b32.xlu0 %v1633_v13, %s2382_s6  ;;  %v805_v11 = vstv %s2001_s21  ;;  %s2005_s21 = sld [smem:[#allocation7 + $0x46]] }
 0x3fe   : > { %v2906_v16 = vpop.permute.xlu1 %1031  ;;  %v2908_v20 = vpop.permute.xlu0 %1021  ;;  %v871_v33 = vstv %s2008_s23  ;;  %s3013_s23 = sld [smem:[#allocation7 + $0x33]] }
 0x3ff   : > { %v872_v29 = vmul.f32 %v871_v33, %v850_v55 }
 0x400   : > { %1659 = vrot.lane.b32.xlu1 %v1658_v7, %s2383_s22  ;;  %1504 = vrot.lane.b32.xlu0 %v1503_v15, %s2384_s25  ;;  %s2006_s22 = sld [smem:[#allocation7 + $0x4d]]  ;;  %s2003_s25 = sld [smem:[#allocation7 + $0x38]]  ;;  %v806_v15 = vmul.f32 %v805_v11, %v782_v49 }
 0x402   : > { %v2914_v23 = vpop.permute.xlu1 %1316  ;;  %v2916_v26 = vpop.permute.xlu0 %1305  ;;  %v840_v0 = vstv %s2005_s21  ;;  %s3023_s21 = sld [smem:[#allocation7 + $0x6]] }
 0x404   : > { %1807 = vrot.lane.b32.xlu1 %v1806_v39, %s2385_s15  ;;  %1790 = vrot.lane.b32.xlu0 %v1788_v14, %s2382_s6  ;;  %v2944_v39 = vld [vmem:[#allocation2 + $0x4] sm:$0x7]  ;;  %v830_v14 = vstv %s2004_s16  ;;  %s2009_s15 = sld [smem:[#allocation7 + $0x1]]  ;;  %s2995_s16 = sld [smem:[#allocation7 + $0x36]] }
 0x405   : > { %3420 = vst [vmem:[#allocation30_spill] sm:$0xff] %v2944_v39 }
 0x406   : > { %v2922_v35 = vpop.permute.xlu1 %1604  ;;  %v2924_v48 = vpop.permute.xlu0 %1594 }
 0x407   : > { %3413 = vst [vmem:[#allocation25_spill] sm:$0xff] %v2922_v35  ;;  %3414 = vst [vmem:[#allocation26_spill] sm:$0xff] %v2924_v48 }
 0x408   : > { %1800 = vrot.lane.b32.xlu0 %v1798_v2, %s2381_s20  ;;  %763 = vrot.lane.b32.xlu1 %v761_v40, %s3415_s5  ;;  %v831_v40 = vmul.f32 %v830_v14, %v2944_v39 }
 0x40a   : > { %v2932_v6 = vpop.permute.xlu1 %1326  ;;  %v2934_v56 = vpop.permute.xlu0 %1176 }
 0x40b   : > { %3416 = vst [vmem:[#allocation27_spill] sm:$0xff] %v2932_v6  ;;  %v982_v6 = vrot.slane %v2860_v60, 1 }
 0x40c   : > { %786 = vrot.lane.b32.xlu1 %v784_v61, %s2380_s26  ;;  %752 = vrot.lane.b32.xlu0 %v750_v50, %s3417_s13  ;;  %v851_v61 = vstv %s2006_s22  ;;  %v820_v50 = vstv %s2003_s25  ;;  %s3004_s22 = sld [smem:[#allocation7 + $0x32]]  ;;  %s3007_s25 = sld [smem:[#allocation7 + $0x4]] }
 0x40e   : > { %v2939_v13 = vpop.permute.xlu1 %1615  ;;  %v2941_v7 = vpop.permute.xlu0 %1453 }
 0x40f   : > { %3418 = vst [vmem:[#allocation28_spill] sm:$0xff] %v2939_v13  ;;  %3419 = vst [vmem:[#allocation29_spill] sm:$0xff] %v2941_v7 }
 0x410   : > { %808 = vrot.lane.b32.xlu1 %v806_v15, %s2381_s20  ;;  %774 = vrot.lane.b32.xlu0 %v772_v21, %s2376_s19  ;;  %v852_v15 = vmul.f32 %v851_v61, %v850_v55  ;;  %v821_v21 = vmul.f32 %v820_v50, %v2944_v39 }
 0x412   : > { %v2948_v34 = vpop.permute.xlu1 %1473  ;;  %v2950_v2 = vpop.permute.xlu0 %1749 }
 0x413   : > { %3421 = vst [vmem:[#allocation31_spill] sm:$0xff] %v2948_v34  ;;  %3422 = vst [vmem:[#allocation32_spill] sm:$0xff] %v2950_v2 }
 0x414   : > { %833 = vrot.lane.b32.xlu1 %v831_v40, %s3415_s5  ;;  %797 = vrot.lane.b32.xlu0 %v795_v51, %s2382_s6  ;;  %v841_v40 = vmul.f32 %v840_v0, %v2944_v39  ;;  %v861_v51 = vstv %s2007_s12  ;;  %s3002_s5 = sld [smem:[#allocation7 + $0x3]]  ;;  %s2387_s12 = smov 127  }
 0x415   : > { %v862_v47 = vmul.f32 %v861_v51, %v850_v55  ;;  %v907_v51 = vstv %s2009_s15  ;;  %s2389_s15 = smov 125  }
 0x416   : > { %v2955_v11 = vpop.permute.xlu1 %1770  ;;  %v2957_v53 = vpop.permute.xlu0 %1186 }
 0x417   : > { %3423 = vst [vmem:[#allocation33_spill] sm:$0xff] %v2955_v11 }
 0x418   : > { %854 = vrot.lane.b32.xlu1 %v852_v15, %s2380_s26  ;;  %823 = vrot.lane.b32.xlu0 %v821_v21, %s3417_s13  ;;  %s2386_s26 = smov 77   ;;  %s3011_s13 = sld [smem:[#allocation7 + $0x5]] }
 0x41a   : > { %v2962_v49 = vpop.permute.xlu1 %1483  ;;  %v2964_v14 = vpop.permute.xlu0 %1463 }
 0x41b   : > { %3424 = vst [vmem:[#allocation34_spill] sm:$0xff] %v2962_v49  ;;  %3425 = vst [vmem:[#allocation35_spill] sm:$0xff] %v2964_v14  ;;  %v1742_v14 = vstv %s2999_s10  ;;  %s2392_s10 = smov 122  }
 0x41c   : > { %874 = vrot.lane.b32.xlu1 %v872_v29, %s2381_s20  ;;  %843 = vrot.lane.b32.xlu0 %v841_v40, %s2376_s19  ;;  %s2987_s19 = sld [smem:[#allocation7 + $0x2]]  ;;  %s2989_s20 = sld [smem:[#allocation7 + $0x34]] }
 0x41e   : > { %v2969_v61 = vpop.permute.xlu0 %1759  ;;  %v925_v50 = vpop.permute.xlu1 %924 }
 0x41f   : > { %3426 = vst [vmem:[#allocation36_spill] sm:$0xff] %v2969_v61  ;;  %v926_v41 = vrot.slane %v925_v50, 1 }
 0x420   : > { %864 = vrot.lane.b32.xlu0 %v862_v47, %s2382_s6  ;;  %s2991_s6 = sld [smem:[#allocation7 + $0x35]] }
 0x422   : > { %v2972_v15 = vpop.permute.xlu0 %1336  ;;  %v935_v21 = vpop.permute.xlu1 %934  ;;  %v1062_v61 = vstv %s2987_s19  ;;  %s3249_s19 = sld [smem:[#allocation7]] }
 0x423   : > { %3427 = vst [vmem:[#allocation37_spill] sm:$0xff] %v2972_v15  ;;  %v1359_v15 = vstv %s3007_s25  ;;  %s2393_s25 = smov 51  }
 0x424   : > { %897 = vrot.lane.b32.xlu0 %v2668_v18, %s2386_s26  ;;  %v908_v18 = vmul.f32 %v907_v51, %v2797_v3  ;;  %v927_v3 = vsel %vm766_vm13, %v925_v50, %v926_v41  ;;  %v1195_v51 = vrot.slane %v2684_v38, 7  ;;  %v3017_v50 = vsel %vm1048_vm11, %v1047_v31, %v2680_v36  ;;  %s2388_s26 = smov 126  }
 0x425   : > { %v1277_v36 = vstv %s2989_s20  ;;  %s2390_s20 = smov 124   ;;  %vm1847_vm11 = vcmask 416768  }
 0x426   : > { %v2975_v33 = vpop.permute.xlu0 %1625  ;;  %v2977_v0 = vpop.permute.xlu1 %1217  ;;  %v3029_v49 = vsel %vm1196_vm14, %v1195_v51, %v2684_v38  ;;  %v1425_v31 = vstv %s2991_s6  ;;  %v1063_v38 = vmul.f32 %v1062_v61, %v2813_v24  ;;  %v1128_v61 = vstv %s3013_s23  ;;  %s2391_s6 = smov 123   ;;  %s3454_s23 = sshll.u32 %s2580_s24, 6 }
 0x427   : > { %3428 = vst [vmem:[#allocation38_spill] sm:$0xff] %v2975_v33  ;;  %3430 = vst [vmem:[#allocation40_spill] sm:$0xff] %v3029_v49  ;;  %v1521_v49 = vstv %s3011_s13  ;;  %s2100_s13 = sshll.u32 %s2463_s9, 10  ;;  %s1869_s9 = scalar_lea.sflag [#allocation5], %s2580_s24 }
 0x42a   : > { %v2979_v29 = vpop.permute.xlu1 %1089  ;;  %v915_v40 = vpop.permute.xlu0 %914 }
 0x42b   : > { %v916_v55 = vrot.slane %v915_v40, 1  ;;  %v1091_v24 = vrot.slane %v2979_v29, 1 }
 0x42d   : > { %v917_v46 = vsel %vm755_vm10, %v915_v40, %v916_v55  ;;  %v1345_v40 = vrot.slane %v2682_v37, 7  ;;  %v936_v55 = vrot.slane %v935_v21, 1 }
 0x42e   : > { %v2981_v42 = vpop.permute.xlu1 %1366  ;;  %v1070_v44 = vpop.permute.xlu0 %1069  ;;  %v919_v43 = vadd.f32 %v917_v46, %v908_v18 }
 0x42f   : > { %v1071_v41 = vrot.slane %v1070_v44, 1 }
 0x430   : > { %v929_v18 = vadd.f32 %v927_v3, %v919_v43  ;;  %v3021_v43 = vsel %vm777_vm12, %v1345_v40, %v2682_v37  ;;  %v937_v3 = vsel %vm777_vm12, %v935_v21, %v936_v55 }
 0x431   : > { %3429 = vst [vmem:[#allocation39_spill] sm:$0xff] %v3021_v43  ;;  %v1587_v43 = vstv %s2995_s16  ;;  %v1072_v34 = vsel %vm755_vm10, %v1070_v44, %v1071_v41  ;;  %s2002_s16 = sld [smem:[#allocation7 + $0x31]] }
 0x432   : > { %v2983_v47 = vpop.permute.xlu1 %1100  ;;  %v1080_v4 = vpop.permute.xlu0 %1079  ;;  %v939_v37 = vadd.f32 %v937_v3, %v929_v18  ;;  %v973_v18 = vstv %s3004_s22  ;;  %v1074_v7 = vadd.f32 %v1072_v34, %v1063_v38  ;;  %v3056_v34 = vmul.f32 %v1277_v36, %v2744_v54  ;;  %s2093_s22 = sld [smem:[#allocation8 + $0x1]] }
 0x433   : > { %v1081_v2 = vrot.slane %v1080_v4, 1  ;;  %v3062_v38 = vmul.f32 %v1587_v43, %v2769_v25  ;;  %v983_v54 = vsel %vm755_vm10, %v2860_v60, %v982_v6  ;;  %v3077_v25 = vmul.f32 %v1359_v15, %v2819_v30 }
 0x434   : > { %v1219_v60 = vrot.slane %v2977_v0, 1  ;;  %v1129_v6 = vmul.f32 %v1128_v61, %v2735_v9  ;;  %v1147_v30 = vrot.slane %v2864_v59, 1 }
 0x435   : > { %v1082_v51 = vsel %vm766_vm13, %v1080_v4, %v1081_v2  ;;  %v974_v2 = vmul.f32 %v973_v18, %v2731_v45 }
 0x436   : > { %v2993_v28 = vpop.permute.xlu1 %1376  ;;  %v946_v39 = vpop.permute.xlu0 %945  ;;  %v1084_v4 = vadd.f32 %v1082_v51, %v1074_v7  ;;  %v1002_v7 = vrot.slane %v2878_v27, 1 }
 0x437   : > { %v947_v46 = vrot.slane %v946_v39, 7 }
 0x438   : > { %v1003_v15 = vsel %vm777_vm12, %v2878_v27, %v1002_v7 }
 0x439   : > { %v948_v13 = vsel %vm789_vm15, %v947_v46, %v946_v39  ;;  %v1210_v46 = vstv %s3002_s5  ;;  %s1822_s5 = sld [smem:[#allocation8]] }
 0x43a   : > { %v966_v11 = vpop.permute.xlu1 %965  ;;  %v3009_v33 = vpop.permute.xlu0 %1227  ;;  %v950_v39 = vadd.f32 %v948_v13, %v939_v37  ;;  %v1211_v45 = vmul.f32 %v1210_v46, %v2807_v19  ;;  %v3082_v19 = vmul.f32 %v1521_v49, %v2836_v58  ;;  %v1023_v46 = vrot.slane %v2908_v20, 7 }
 0x43b   : > { %v967_v21 = vrot.slane %v966_v11, 7  ;;  %v1229_v18 = vrot.slane %v3009_v33, 1 }
 0x43d   : > { %v968_v13 = vsel %vm457_vm6, %v967_v21, %v966_v11 }
 0x43e   : > { %v3033_v40 = vpop.permute.xlu1 %1249  ;;  %v956_v35 = vpop.permute.xlu0 %955 }
 0x43f   : > { %v957_v55 = vrot.slane %v956_v35, 7 }
 0x441   : > { %v958_v3 = vsel %vm800_vm0, %v957_v55, %v956_v35  ;;  %v1676_v35 = vstv %s3023_s21  ;;  %v3059_v55 = vmul.f32 %v1425_v31, %v2756_v63  ;;  %v1092_v63 = vsel %vm777_vm12, %v2979_v29, %v1091_v24  ;;  %s350_s21 = scalar_lea.vmem [#allocation10], %s3454_s23 }
 0x442   : > { %v960_v48 = vadd.f32 %v958_v3, %v950_v39  ;;  %v3044_v44 = vpop.permute.xlu1 %1538  ;;  %v3046_v41 = vpop.permute.xlu0 %1238  ;;  %v992_v39 = vrot.slane %v2858_v57, 1  ;;  %v3066_v3 = vmul.f32 %v1742_v14, %v2784_v1  ;;  %v1102_v1 = vrot.slane %v2983_v47, 7 }
 0x443   : > { %v1013_v14 = vrot.slane %v2876_v17, 7  ;;  %v1094_v43 = vadd.f32 %v1092_v63, %v1084_v4  ;;  %v3089_v29 = vmul.f32 %v1676_v35, %v2846_v32  ;;  %v1137_v32 = vrot.slane %v2866_v12, 1 }
 0x444   : > { %v970_v37 = vadd.f32 %v968_v13, %v960_v48  ;;  %v993_v31 = vsel %vm766_vm13, %v2858_v57, %v992_v39  ;;  %v1103_v57 = vsel %vm789_vm15, %v1102_v1, %v2983_v47  ;;  %v1033_v4 = vrot.slane %v2906_v16, 7 }
 0x445   : > { %v1014_v13 = vsel %vm789_vm15, %v1013_v14, %v2876_v17  ;;  %v1105_v27 = vadd.f32 %v1103_v57, %v1094_v43  ;;  %v1148_v35 = vsel %vm766_vm13, %v2864_v59, %v1147_v30  ;;  %v1296_v39 = vrot.slane %v2882_v8, 1 }
 0x446   : > { %v975_v48 = vadd.f32 %v974_v2, %v970_v37  ;;  %v1121_v11 = vpop.permute.xlu1 %1120  ;;  %v3070_v21 = vpop.permute.xlu0 %1528  ;;  %v1220_v2 = vsel %vm755_vm10, %v2977_v0, %v1219_v60  ;;  %v1240_v37 = vrot.slane %v3046_v41, 7  ;;  %v1286_v63 = vrot.slane %v2884_v22, 1 }
 0x447   : > { %v1122_v9 = vrot.slane %v1121_v11, 7  ;;  %v1024_v1 = vsel %vm800_vm0, %v1023_v46, %v2908_v20  ;;  %v1230_v0 = vsel %vm766_vm13, %v3009_v33, %v1229_v18  ;;  %v1168_v43 = vrot.slane %v2889_v52, 7 }
 0x448   : > { %v985_v36 = vadd.f32 %v983_v54, %v975_v48  ;;  %v1222_v59 = vadd.f32 %v1220_v2, %v1211_v45  ;;  %v1157_v60 = vrot.slane %v2891_v5, 1  ;;  %v1034_v30 = vsel %vm457_vm6, %v1033_v4, %v2906_v16 }
 0x449   : > { %v1123_v14 = vsel %vm457_vm6, %v1122_v9, %v1121_v11  ;;  %v1241_v20 = vsel %vm777_vm12, %v1240_v37, %v3046_v41  ;;  %v1378_v46 = vrot.slane %v2993_v28, 1  ;;  %v1138_v45 = vsel %vm755_vm10, %v2866_v12, %v1137_v32 }
 0x44a   : > { %v995_v51 = vadd.f32 %v993_v31, %v985_v36  ;;  %v3095_v58 = vpop.permute.xlu1 %1397  ;;  %v1111_v49 = vpop.permute.xlu0 %1110  ;;  %v1232_v33 = vadd.f32 %v1230_v0, %v1222_v59  ;;  %v3131_v18 = vsel %vm766_vm13, %v2882_v8, %v1296_v39  ;;  %v1287_v16 = vsel %vm755_vm10, %v2884_v22, %v1286_v63 }
 0x44b   : > { %v1112_v24 = vrot.slane %v1111_v49, 7  ;;  %v1251_v9 = vrot.slane %v3033_v40, 7  ;;  %v1444_v41 = vrot.slane %v2896_v62, 1  ;;  %v1158_v12 = vsel %vm777_vm12, %v2891_v5, %v1157_v60 }
 0x44c   : > { %v1005_v61 = vadd.f32 %v1003_v15, %v995_v51  ;;  %v1368_v15 = vrot.slane %v2981_v42, 1  ;;  %v1434_v22 = vrot.slane %v2898_v10, 1  ;;  %v1379_v4 = vsel %vm766_vm13, %v2993_v28, %v1378_v46 }
 0x44d   : > { %v1113_v47 = vsel %vm800_vm0, %v1112_v24, %v1111_v49  ;;  %v1243_v24 = vadd.f32 %v1241_v20, %v1232_v33  ;;  %v1530_v5 = vrot.slane %v3070_v21, 1  ;;  %v3155_v39 = vsel %vm766_vm13, %v2896_v62, %v1444_v41 }
 0x44e   : > { %v1115_v7 = vadd.f32 %v1113_v47, %v1105_v27  ;;  %v3111_v48 = vpop.permute.xlu1 %1693  ;;  %v1388_v17 = vpop.permute.xlu0 %1387  ;;  %v1016_v54 = vadd.f32 %v1014_v13, %v1005_v61  ;;  %v1169_v61 = vsel %vm789_vm15, %v1168_v43, %v2889_v52  ;;  %v1369_v8 = vsel %vm755_vm10, %v2981_v42, %v1368_v15 }
 0x44f   : > { %v1389_v32 = vrot.slane %v1388_v17, 7  ;;  %v1178_v27 = vrot.slane %v2934_v56, 7  ;;  %v1252_v52 = vsel %vm789_vm15, %v1251_v9, %v3033_v40  ;;  %v1188_v63 = vrot.slane %v2957_v53, 7 }
 0x450   : > { %v1125_v36 = vadd.f32 %v1123_v14, %v1115_v7  ;;  %v1026_v31 = vadd.f32 %v1024_v1, %v1016_v54  ;;  %v1371_v7 = vadd.f32 %v1369_v8, %v3077_v25  ;;  %v1318_v54 = vrot.slane %v2914_v23, 7 }
 0x451   : > { %v1390_v1 = vsel %vm777_vm12, %v1389_v32, %v1388_v17  ;;  %v1179_v0 = vsel %vm800_vm0, %v1178_v27, %v2934_v56  ;;  %v1531_v25 = vsel %vm755_vm10, %v3070_v21, %v1530_v5  ;;  %v1435_v17 = vsel %vm755_vm10, %v2898_v10, %v1434_v22  ;;  %v3432_v22 = vld [vmem:[#allocation40_spill] sm:$0xff] }
 0x452   : > { %v1130_v51 = vadd.f32 %v1129_v6, %v1125_v36  ;;  %v1270_v11 = vpop.permute.xlu1 %1269  ;;  %v1684_v49 = vpop.permute.xlu0 %1683  ;;  %v1036_v57 = vadd.f32 %v1034_v30, %v1026_v31  ;;  %v1381_v14 = vadd.f32 %v1379_v4, %v1371_v7  ;;  %v1399_v31 = vrot.slane %v3095_v58, 7  ;;  %v3433_v7 = vld [vmem:[#allocation26_spill] sm:$0xff] }
 0x453   : > { %v1271_v42 = vrot.slane %v1270_v11, 7  ;;  %v1685_v30 = vrot.slane %v1684_v49, 1  ;;  %v1307_v56 = vrot.slane %v2916_v26, 7  ;;  %v1189_v33 = vsel %vm457_vm6, %v1188_v63, %v2957_v53 }
 0x454   : > { %v1140_v13 = vadd.f32 %v1138_v45, %v1130_v51  ;;  %v1051_v6 = vmul.f32 %v3017_v50, %v1036_v57  ;;  %v1392_v15 = vadd.f32 %v1390_v1, %v1381_v14  ;;  %v1540_v51 = vrot.slane %v3044_v44, 1  ;;  %v3435_v1 = vld [vmem:[#allocation37_spill] sm:$0xff] }
 0x455   : > { %v1272_v60 = vsel %vm457_vm6, %v1271_v42, %v1270_v11  ;;  %v1319_v21 = vsel %vm789_vm15, %v1318_v54, %v2914_v23  ;;  %v1533_v11 = vadd.f32 %v1531_v25, %v3082_v19  ;;  %v1308_v5 = vsel %vm777_vm12, %v1307_v56, %v2916_v26 }
 0x456   : > { %v1150_v2 = vadd.f32 %v1148_v35, %v1140_v13  ;;  %v3148_v37 = vpop.permute.xlu1 %1559  ;;  %v1260_v50 = vpop.permute.xlu0 %1259  ;;  %1053 = vrot.lane.b32.xlu1 %v1051_v6, %s2387_s12  ;;  %v1254_v35 = vadd.f32 %v1252_v52, %v1243_v24  ;;  %v1400_v24 = vsel %vm789_vm15, %v1399_v31, %v3095_v58  ;;  %v1686_v13 = vsel %vm755_vm10, %v1684_v49, %v1685_v30  ;;  %s1882_s12 = sshll.u32 %s350_s21, 4  ;;  %s3292_s12 = int_to_ptr.vmem [resolvable:$true] %s1882_s12 }
 0x457   : > { %v1261_v47 = vrot.slane %v1260_v50, 7  ;;  %v1402_v32 = vadd.f32 %v1400_v24, %v1392_v15  ;;  %v1541_v19 = vsel %vm766_vm13, %v3044_v44, %v1540_v51  ;;  %v1688_v58 = vadd.f32 %v1686_v13, %v3089_v29  ;;  %v3436_v51 = vld [vmem:[#allocation35_spill] sm:$0xff] }
 0x458   : > { %v1160_v28 = vadd.f32 %v1158_v12, %v1150_v2  ;;  %v1543_v2 = vadd.f32 %v1541_v19, %v1533_v11  ;;  %v1561_v44 = vrot.slane %v3148_v37, 7  ;;  %v3437_v11 = vld [vmem:[#allocation31_spill] sm:$0xff]  ;;  %v3439_v19 = vld [vmem:[#allocation25_spill] sm:$0xff] }
 0x459   : > { %v1262_v40 = vsel %vm800_vm0, %v1261_v47, %v1260_v50 }
 0x45a   : > { %v1264_v43 = vadd.f32 %v1262_v40, %v1254_v35  ;;  %v1418_v59 = vpop.permute.xlu1 %1417  ;;  %v1550_v62 = vpop.permute.xlu0 %1549  ;;  %v1171_v36 = vadd.f32 %v1169_v61, %v1160_v28  ;;  %v3431_v61 = vld [vmem:[#allocation27_spill] sm:$0xff]  ;;  %v1596_v28 = vrot.slane %v3433_v7, 1  ;;  %v1338_v40 = vrot.slane %v3435_v1, 7 }
 0x45b   : > { %v1551_v57 = vrot.slane %v1550_v62, 7  ;;  %v1419_v6 = vrot.slane %v1418_v59, 7  ;;  %v1328_v12 = vrot.slane %v3431_v61, 7  ;;  %v1562_v31 = vsel %vm789_vm15, %v1561_v44, %v3148_v37 }
 0x45c   : > { %v1274_v20 = vadd.f32 %v1272_v60, %v1264_v43  ;;  %v1181_v46 = vadd.f32 %v1179_v0, %v1171_v36  ;;  %v1597_v44 = vsel %vm755_vm10, %v3433_v7, %v1596_v28 }
 0x45d   : > { %v1552_v27 = vsel %vm777_vm12, %v1551_v57, %v1550_v62  ;;  %v1420_v42 = vsel %vm457_vm6, %v1419_v6, %v1418_v59  ;;  %v1329_v26 = vsel %vm800_vm0, %v1328_v12, %v3431_v61  ;;  %v1465_v57 = vrot.slane %v3436_v51, 7 }
 0x45e   : > { %v1279_v45 = vadd.f32 %v3056_v34, %v1274_v20  ;;  %v1715_v9 = vpop.permute.xlu1 %1714  ;;  %v1408_v10 = vpop.permute.xlu0 %1407  ;;  %v1191_v41 = vadd.f32 %v1189_v33, %v1181_v46  ;;  %v1695_v34 = vrot.slane %v3111_v48, 1  ;;  %v1554_v29 = vadd.f32 %v1552_v27, %v1543_v2  ;;  %v3440_v27 = vld [vmem:[#allocation34_spill] sm:$0xff] }
 0x45f   : > { %v1409_v53 = vrot.slane %v1408_v10, 7  ;;  %v1716_v60 = vrot.slane %v1715_v9, 7 }
 0x460   : > { %v1289_v8 = vadd.f32 %v1287_v16, %v1279_v45  ;;  %v1199_v23 = vmul.f32 %v3432_v22, %v1191_v41  ;;  %v1696_v0 = vsel %vm766_vm13, %v3111_v48, %v1695_v34  ;;  %v1564_v48 = vadd.f32 %v1562_v31, %v1554_v29  ;;  %v3445_v31 = vld [vmem:[#allocation33_spill] sm:$0xff] }
 0x461   : > { %v1410_v4 = vsel %vm800_vm0, %v1409_v53, %v1408_v10  ;;  %v1698_v59 = vadd.f32 %v1696_v0, %v1688_v58  ;;  %v1475_v45 = vrot.slane %v3437_v11, 7  ;;  %v1717_v13 = vsel %vm789_vm15, %v1716_v60, %v1715_v9 }
 0x462   : > { %v1299_v49 = vadd.f32 %v3131_v18, %v1289_v8  ;;  %v1412_v50 = vadd.f32 %v1410_v4, %v1402_v32  ;;  %v1580_v52 = vpop.permute.xlu1 %1579  ;;  %v1705_v16 = vpop.permute.xlu0 %1704  ;;  %1201 = vrot.lane.b32.xlu0 %v1199_v23, %s2388_s26  ;;  %v3434_v18 = vld [vmem:[#allocation29_spill] sm:$0xff]  ;;  %v3438_v32 = vld [vmem:[#allocation39_spill] sm:$0xff]  ;;  %v1606_v34 = vrot.slane %v3439_v19, 1  ;;  %v1466_v4 = vsel %vm789_vm15, %v1465_v57, %v3436_v51 }
 0x463   : > { %v1706_v47 = vrot.slane %v1705_v16, 7  ;;  %v1455_v63 = vrot.slane %v3434_v18, 7  ;;  %v1581_v30 = vrot.slane %v1580_v52, 7  ;;  %v1772_v60 = vrot.slane %v3445_v31, 7 }
 0x464   : > { %v1310_v35 = vadd.f32 %v1308_v5, %v1299_v49  ;;  %v1422_v54 = vadd.f32 %v1420_v42, %v1412_v50  ;;  %v3441_v49 = vld [vmem:[#allocation28_spill] sm:$0xff]  ;;  %v1476_v42 = vsel %vm800_vm0, %v1475_v45, %v3437_v11 }
 0x465   : > { %v1707_v14 = vsel %vm777_vm12, %v1706_v47, %v1705_v16  ;;  %v1456_v33 = vsel %vm777_vm12, %v1455_v63, %v3434_v18  ;;  %v1582_v6 = vsel %vm457_vm6, %v1581_v30, %v1580_v52  ;;  %v1617_v9 = vrot.slane %v3441_v49, 7  ;;  %v3442_v47 = vld [vmem:[#allocation32_spill] sm:$0xff] }
 0x466   : > { %v1427_v43 = vadd.f32 %v3059_v55, %v1422_v54  ;;  %v1735_v62 = vpop.permute.xlu1 %1734  ;;  %v1570_v36 = vpop.permute.xlu0 %1569  ;;  %v1321_v25 = vadd.f32 %v1319_v21, %v1310_v35  ;;  %v1709_v46 = vadd.f32 %v1707_v14, %v1698_v59  ;;  %v1339_v55 = vsel %vm457_vm6, %v1338_v40, %v3435_v1  ;;  %v3443_v54 = vld [vmem:[#allocation36_spill] sm:$0xff]  ;;  %v3444_v14 = vld [vmem:[#allocation38_spill] sm:$0xff] }
 0x467   : > { %v1571_v15 = vrot.slane %v1570_v36, 7  ;;  %v1736_v53 = vrot.slane %v1735_v62, 7  ;;  %v1751_v35 = vrot.slane %v3442_v47, 1  ;;  %v1761_v18 = vrot.slane %v3443_v54, 1 }
 0x468   : > { %v1437_v20 = vadd.f32 %v1435_v17, %v1427_v43  ;;  %v1331_v56 = vadd.f32 %v1329_v26, %v1321_v25  ;;  %v1719_v8 = vadd.f32 %v1717_v13, %v1709_v46  ;;  %v1607_v40 = vsel %vm766_vm13, %v3439_v19, %v1606_v34 }
 0x469   : > { %v1572_v21 = vsel %vm800_vm0, %v1571_v15, %v1570_v36  ;;  %v1737_v29 = vsel %vm457_vm6, %v1736_v53, %v1735_v62  ;;  %v1627_v7 = vrot.slane %v3444_v14, 7  ;;  %v1618_v28 = vsel %vm777_vm12, %v1617_v9, %v3441_v49 }
 0x46a   : > { %v1447_v37 = vadd.f32 %v3155_v39, %v1437_v20  ;;  %v1574_v10 = vadd.f32 %v1572_v21, %v1564_v48  ;;  %v3213_v41 = vpop.permute.xlu1 %1780  ;;  %v1725_v17 = vpop.permute.xlu0 %1724  ;;  %v1341_v24 = vadd.f32 %v1339_v55, %v1331_v56  ;;  %v1485_v39 = vrot.slane %v3440_v27, 7 }
 0x46b   : > { %v1726_v61 = vrot.slane %v1725_v17, 7  ;;  %v1752_v25 = vsel %vm755_vm10, %v3442_v47, %v1751_v35  ;;  %v1762_v20 = vsel %vm766_vm13, %v3443_v54, %v1761_v18  ;;  %v1628_v56 = vsel %vm789_vm15, %v1627_v7, %v3444_v14 }
 0x46c   : > { %v1584_v12 = vadd.f32 %v1582_v6, %v1574_v10  ;;  %v1348_v22 = vmul.f32 %v3438_v32, %v1341_v24  ;;  %v1458_v23 = vadd.f32 %v1456_v33, %v1447_v37  ;;  %v1486_v0 = vsel %vm457_vm6, %v1485_v39, %v3440_v27 }
 0x46d   : > { %v1727_v58 = vsel %vm800_vm0, %v1726_v61, %v1725_v17  ;;  %v1773_v37 = vsel %vm777_vm12, %v1772_v60, %v3445_v31  ;;  %v745_v49 = vstv %s3249_s19  ;;  %v3447_v60 = vld [vmem:[#allocation30_spill] sm:$0xff]  ;;  %s3290_s19 = scalar_lea.hbm %s3348_s8, %s2100_s13 }
 0x46e   : > { %v1589_v2 = vadd.f32 %v3062_v38, %v1584_v12  ;;  %v1729_v50 = vadd.f32 %v1727_v58, %v1719_v8  ;;  %v1646_v52 = vpop.permute.xlu1 %1645  ;;  %v1636_v16 = vpop.permute.xlu0 %1635  ;;  %1350 = vrot.lane.b32.xlu1 %v1348_v22, %s2389_s15  ;;  %v1468_v5 = vadd.f32 %v1466_v4, %v1458_v23 }
 0x46f   : > { %v1637_v30 = vrot.slane %v1636_v16, 7  ;;  %v1647_v33 = vrot.slane %v1646_v52, 7 }
 0x470   : > { %v1599_v63 = vadd.f32 %v1597_v44, %v1589_v2  ;;  %v1739_v38 = vadd.f32 %v1737_v29, %v1729_v50  ;;  %v1478_v1 = vadd.f32 %v1476_v42, %v1468_v5  ;;  %v3446_v44 = vld [vmem:[#allocation24_spill] sm:$0xff] }
 0x471   : > { %v1638_v10 = vsel %vm800_vm0, %v1637_v30, %v1636_v16  ;;  %v1648_v61 = vsel %vm457_vm6, %v1647_v33, %v1646_v52  ;;  %v746_v42 = vmul.f32 %v745_v49, %v3446_v44 }
 0x472   : > { %v1744_v26 = vadd.f32 %v3066_v3, %v1739_v38  ;;  %v1609_v43 = vadd.f32 %v1607_v40, %v1599_v63  ;;  %v1660_v59 = vpop.permute.xlu1 %1659  ;;  %v1488_v62 = vadd.f32 %v1486_v0, %v1478_v1  ;;  %v1505_v36 = vpop.permute.xlu0 %1504  ;;  %v1782_v3 = vrot.slane %v3213_v41, 7 }
 0x473   : > { %v1506_v15 = vrot.slane %v1505_v36, 7  ;;  %v1661_v17 = vrot.slane %v1660_v59, 7 }
 0x474   : > { %v1754_v46 = vadd.f32 %v1752_v25, %v1744_v26  ;;  %v1620_v48 = vadd.f32 %v1618_v28, %v1609_v43  ;;  %v1783_v53 = vsel %vm789_vm15, %v1782_v3, %v3213_v41 }
 0x475   : > { %v1508_v51 = vsel %vm1507_vm1, %v1506_v15, %v1505_v36  ;;  %v1663_v23 = vsel %vm1662_vm2, %v1661_v17, %v1660_v59 }
 0x476   : > { %v1630_v57 = vadd.f32 %v1628_v56, %v1620_v48  ;;  %v1510_v55 = vmul.f32 %v1508_v51, %v1488_v62  ;;  %v1808_v21 = vpop.permute.xlu1 %1807  ;;  %v1764_v11 = vadd.f32 %v1762_v20, %v1754_v46  ;;  %v1791_v45 = vpop.permute.xlu0 %1790  ;;  %v816_v62 = vstv %s2002_s16 }
 0x477   : > { %v1792_v24 = vrot.slane %v1791_v45, 7  ;;  %v1809_v19 = vrot.slane %v1808_v21, 7  ;;  %v817_v30 = vmul.f32 %v816_v62, %v3447_v60 }
 0x478   : > { %v1640_v13 = vadd.f32 %v1638_v10, %v1630_v57  ;;  %v1775_v6 = vadd.f32 %v1773_v37, %v1764_v11  ;;  %1512 = vrot.lane.b32.xlu0 %v1510_v55, %s2390_s20  ;;  %s2290_s20 = scalar_lea.vmem %s3292_s12, 1024 }
 0x479   : > { %v1793_v34 = vsel %vm800_vm0, %v1792_v24, %v1791_v45  ;;  %v1811_v50 = vsel %vm1810_vm3, %v1809_v19, %v1808_v21  ;;  %p2291_p5 = scmp.ne.s32.totalorder %s3292_s12, %s2290_s20 }
 0x47a   : > { %v1650_v12 = vadd.f32 %v1648_v61, %v1640_v13  ;;  %v1785_v8 = vadd.f32 %v1783_v53, %v1775_v6  ;;  %v1801_v32 = vpop.permute.xlu0 %1800  ;;  %v764_v22 = vpop.permute.xlu1 %763 }
 0x47b   : > { %v1802_v27 = vrot.slane %v1801_v32, 7  ;;  %v765_v52 = vrot.slane %v764_v22, 1  ;;  %p2292_p8 = pnand %p2291_p5, %p3459_p2 }
 0x47c   : > { %v1665_v39 = vmul.f32 %v1663_v23, %v1650_v12  ;;  %v1795_v4 = vadd.f32 %v1793_v34, %v1785_v8 }
 0x47d   : > { %v1803_v58 = vsel %vm457_vm6, %v1802_v27, %v1801_v32  ;;  %v767_v54 = vsel %vm766_vm13, %v764_v22, %v765_v52  ;;  %p2293_p10 = pneg %p2292_p8 }
 0x47e   : > { %v1805_v9 = vadd.f32 %v1803_v58, %v1795_v4  ;;  %1667 = vrot.lane.b32.xlu1 %v1665_v39, %s2391_s6  ;;  %v787_v41 = vpop.permute.xlu1 %786  ;;  %v753_v2 = vpop.permute.xlu0 %752  ;;  %s2394_s6 = smov [#allocation10]  }
 0x47f   : > { %v754_v16 = vrot.slane %v753_v2, 1  ;;  %v788_v18 = vrot.slane %v787_v41, 7  ;;  %s2294_s16 = sshll.u32 %s2394_s6, 4  ;;  %s2295_s16 = int_to_ptr.vmem [resolvable:$false] %s2294_s16 }
 0x480   : > { %v1813_v5 = vmul.f32 %v1811_v50, %v1805_v9  ;;  %p2297_p4 = scmp.lt.s32.totalorder %s3292_s12, %s2295_s16 }
 0x481   : > { %v756_v47 = vsel %vm755_vm10, %v753_v2, %v754_v16  ;;  %v790_v7 = vsel %vm789_vm15, %v788_v18, %v787_v41 }
 0x482   : > { %v758_v35 = vadd.f32 %v756_v47, %v746_v42  ;;  %1815 = vrot.lane.b32.xlu0 %v1813_v5, %s2392_s10  ;;  %v775_v29 = vpop.permute.xlu0 %774  ;;  %v809_v38 = vpop.permute.xlu1 %808  ;;  %s2296_s10 = scalar_lea.vmem %s2295_s16, 2048 }
 0x483   : > { %v776_v63 = vrot.slane %v775_v29, 1  ;;  %v810_v28 = vrot.slane %v809_v38, 7  ;;  %p2298_p12 = scmp.lt.s32.totalorder %s2296_s10, %s2290_s20 }
 0x484   : > { %v769_v1 = vadd.f32 %v767_v54, %v758_v35 }
 0x485   : > { %v778_v40 = vsel %vm777_vm12, %v775_v29, %v776_v63  ;;  %v811_v25 = vsel %vm457_vm6, %v810_v28, %v809_v38  ;;  %v1826_v28 = vstv %s2093_s22  ;;  %p2299_p0 = por %p2298_p12, %p2297_p4 }
 0x486   : > { %v780_v0 = vadd.f32 %v778_v40, %v769_v1  ;;  %v798_v14 = vpop.permute.xlu0 %797  ;;  %v834_v48 = vpop.permute.xlu1 %833 }
 0x487   : > { %v799_v26 = vrot.slane %v798_v14, 7  ;;  %v835_v56 = vrot.slane %v834_v48, 1  ;;  %p2300_p7 = pnand %p2299_p0, %p2293_p10 }
 0x488   : > { %v792_v43 = vadd.f32 %v790_v7, %v780_v0  ;;  %v1823_v0 = vstv %s1822_s5 }
 0x489   : > { %v801_v59 = vsel %vm800_vm0, %v799_v26, %v798_v14  ;;  %v836_v57 = vsel %vm766_vm13, %v834_v48, %v835_v56  ;;  %v3450_v48 = vld [vmem:[#allocation18_spill] sm:$0xff] }
 0x48a   : > { %v803_v36 = vadd.f32 %v801_v59, %v792_v43  ;;  %v824_v20 = vpop.permute.xlu0 %823  ;;  %v855_v21 = vpop.permute.xlu1 %854  ;;  %v3448_v43 = vld [vmem:[#allocation15_spill] sm:$0xff] }
 0x48b   : > { %v825_v46 = vrot.slane %v824_v20, 1  ;;  %v856_v45 = vrot.slane %v855_v21, 7  ;;  %v1835_v59 = vsub.s32 1, %v3448_v43  ;;  %v1839_v60 = vsub.s32 2, %v3448_v43 }
 0x48c   : > { %v813_v31 = vadd.f32 %v811_v25, %v803_v36  ;;  %v3449_v25 = vsub.s32 0, %v3448_v43 }
 0x48d   : > { %v826_v3 = vsel %vm755_vm10, %v824_v20, %v825_v46  ;;  %v857_v24 = vsel %vm789_vm15, %v856_v45, %v855_v21  ;;  %vm1818_vm10 = vcmask 998400  }
 0x48e   : > { %v818_v15 = vadd.f32 %v817_v30, %v813_v31  ;;  %v844_v51 = vpop.permute.xlu0 %843  ;;  %v875_v6 = vpop.permute.xlu1 %874 }
 0x48f   : > { %v845_v55 = vrot.slane %v844_v51, 1  ;;  %v876_v12 = vrot.slane %v875_v6, 7 }
 0x490   : > { %v828_v33 = vadd.f32 %v826_v3, %v818_v15  ;;  %v3451_v3 = vld [vmem:[#allocation16_spill] sm:$0xff] }
 0x491   : > { %v846_v37 = vsel %vm777_vm12, %v844_v51, %v845_v55  ;;  %v877_v34 = vsel %vm457_vm6, %v876_v12, %v875_v6  ;;  %vm1670_vm6 = vcmask 1006592   ;;  %v3452_v51 = vld [vmem:[#allocation20_spill] sm:$0xff]  ;;  %v3453_v55 = vld [vmem:[#allocation22_spill] sm:$0xff] }
 0x492   : > { %v838_v11 = vadd.f32 %v836_v57, %v828_v33  ;;  %v865_v17 = vpop.permute.xlu0 %864 }
 0x493   : > { %v866_v13 = vrot.slane %v865_v17, 7 }
 0x494   : > { %v848_v10 = vadd.f32 %v846_v37, %v838_v11  ;;  %v3455_v37 = vld [vmem:[#allocation19_spill] sm:$0xff] }
 0x495   : > { %v867_v8 = vsel %vm800_vm0, %v866_v13, %v865_v17  ;;  %v3456_v17 = vld [vmem:[#allocation17_spill] sm:$0xff] }
 0x496   : > { %v859_v53 = vadd.f32 %v857_v24, %v848_v10  ;;  %v898_v61 = vpop.permute.xlu0 %897  ;;  %v3457_v13 = vld [vmem:[#allocation21_spill] sm:$0xff] }
 0x497   : > { %v899_v23 = vrot.slane %v898_v61, 7 }
 0x498   : > { %v869_v32 = vadd.f32 %v867_v8, %v859_v53  ;;  %v3458_v53 = vld [vmem:[#allocation23_spill] sm:$0xff] }
 0x499   : > { %v901_v58 = vsel %vm900_vm4, %v899_v23, %v898_v61 }
 0x49a   : > { %v879_v39 = vadd.f32 %v877_v34, %v869_v32 }
 0x49c   : > { %v903_v50 = vmul.f32 %v901_v58, %v879_v39 }
 0x4c8   : > { %v1054_v22 = vpop.permute.xlu1 %1053 }
 0x4c9   : > { %v1055_v27 = vrot.slane %v1054_v22, 1 }
 0x4cb   : > { %v1057_v41 = vsel %vm1056_vm5, %v1054_v22, %v1055_v27 }
 0x4cc   : > { %v1059_v5 = vadd.f32 %v1057_v41, %v903_v50 }
 0x4d4   : > { %v1202_v19 = vpop.permute.xlu0 %1201 }
 0x4d5   : > { %v1203_v49 = vrot.slane %v1202_v19, 1 }
 0x4d7   : > { %v1205_v52 = vsel %vm1204_vm7, %v1202_v19, %v1203_v49 }
 0x4d8   : > { %v1207_v42 = vadd.f32 %v1205_v52, %v1059_v5 }
 0x4e0   : > { %v1351_v4 = vpop.permute.xlu1 %1350 }
 0x4e1   : > { %v1352_v2 = vrot.slane %v1351_v4, 1 }
 0x4e3   : > { %v1354_v44 = vsel %vm1353_vm8, %v1351_v4, %v1352_v2 }
 0x4e4   : > { %v1356_v54 = vadd.f32 %v1354_v44, %v1207_v42 }
 0x4ea   : > { %v1513_v9 = vpop.permute.xlu0 %1512 }
 0x4eb   : > { %v1514_v16 = vrot.slane %v1513_v9, 1 }
 0x4ed   : > { %v1516_v35 = vsel %vm1515_vm9, %v1513_v9, %v1514_v16 }
 0x4ee   : > { %v1518_v63 = vadd.f32 %v1516_v35, %v1356_v54 }
 0x4f0   : > { %v1668_v47 = vpop.permute.xlu1 %1667 }
 0x4f1   : > { %v1669_v29 = vrot.slane %v1668_v47, 1 }
 0x4f3   : > { %v1671_v18 = vsel %vm1670_vm6, %v1668_v47, %v1669_v29 }
 0x4f4   : > { %v1816_v38 = vpop.permute.xlu0 %1815  ;;  %v1673_v40 = vadd.f32 %v1671_v18, %v1518_v63 }
 0x4f5   : > { %v1817_v1 = vrot.slane %v1816_v38, 1 }
 0x4f7   : > { %v1819_v14 = vsel %vm1818_vm10, %v1816_v38, %v1817_v1 }
 0x4f8   : > { %v1821_v7 = vadd.f32 %v1819_v14, %v1673_v40 }
 0x4fa   : > { %v1824_v26 = vmul.f32 %v1823_v0, %v1821_v7 }
 0x4fc   : > { %v1827_v62 = vadd.f32 %v1826_v28, %v1824_v26 }
 0x4fe   : > { %v1836_v36 = vrot.slane %v1827_v62, %v1835_v59  ;;  %v1832_v31 = vrot.slane %v1827_v62, %v3449_v25  ;;  %v1840_v30 = vrot.slane %v1827_v62, %v1839_v60 }
 0x500   : > { %1843 = vrot.lane.b32.xlu0 %v1836_v36, %s2393_s25  ;;  %1841 = vrot.lane.b32.xlu1 %v1832_v31, %s2393_s25 }
 0x504   : > { %1845 = vrot.lane.b32.xlu1 %v1840_v30, %s2393_s25 }
 0x572   : > { %v1844_v15 = vpop.permute.xlu0 %1843  ;;  %v1842_v20 = vpop.permute.xlu1 %1841 }
 0x573   : > { %v1848_v46 = vsel %vm1847_vm11, %v1842_v20, %v1844_v15 }
 0x574   : > { %v1852_v56 = vmul.f32 %v1848_v46, %v3450_v48  ;;  %v1854_v33 = vmul.f32 %v1848_v46, %v3451_v3  ;;  %v1856_v57 = vmul.f32 %v1848_v46, %v3452_v51  ;;  %v1858_v21 = vmul.f32 %v1848_v46, %v3453_v55 }
 0x576   : > { %1860 = vst [vmem:[%s350_s21] sm:$0xff] %v1852_v56  ;;  %1862 = vst [vmem:[%s350_s21 + $0x10] sm:$0xff] %v1854_v33  ;;  %v1846_v11 = vpop.permute.xlu1 %1845 }
 0x577   : > { %1864 = vst [vmem:[%s350_s21 + $0x20] sm:$0xff] %v1856_v57  ;;  %1866 = vst [vmem:[%s350_s21 + $0x30] sm:$0xff] %v1858_v21  ;;  %v1849_v45 = vsel %vm1847_vm11, %v1844_v15, %v1846_v11 }
 0x578   : > { %v1853_v10 = vmul.f32 %v1849_v45, %v3455_v37  ;;  %v1855_v24 = vmul.f32 %v1849_v45, %v3456_v17  ;;  %v1857_v6 = vmul.f32 %v1849_v45, %v3457_v13  ;;  %v1859_v61 = vmul.f32 %v1849_v45, %v3458_v53 }
 0x57a   : > { %1861 = vst [vmem:[%s350_s21 + $0x8] sm:$0xff] %v1853_v10  ;;  %1863 = vst [vmem:[%s350_s21 + $0x18] sm:$0xff] %v1855_v24 }
 0x57b   : > { %1865 = vst [vmem:[%s350_s21 + $0x28] sm:$0xff] %v1857_v6  ;;  %1867 = vst [vmem:[%s350_s21 + $0x38] sm:$0xff] %v1859_v61 }
 0x57c   : > { %2303 = shalt.err (!%p2300_p7)
}
 0x57d   : > { %s2304_s5 = scalar_lea.hbm %s3290_s19, 1024  ;;  %s2308_s13 = scalar_lea.hbm %s3348_s8, 2048 }
 0x57e   : > { %p2305_p11 = scmp.ne.s32.totalorder %s3290_s19, %s2304_s5  ;;  %p2309_p3 = scmp.lt.u32.totalorder %s3290_s19, %s3348_s8 }
 0x57f   : > { %p2310_p9 = scmp.lt.u32.totalorder %s2308_s13, %s2304_s5  ;;  %p2312_p5 = scmp.lt.u32.totalorder %s2304_s5, %s3290_s19 }
 0x580   : > { %p2306_p13 = pnand %p2305_p11, %p3459_p2 }
 0x581   : > { %p2311_p1 = por %p2310_p9, %p2309_p3 }
 0x582   : > { %p2307_p6 = pneg %p2306_p13 }
 0x583   : > { %p2313_p8 = por %p2312_p5, %p2311_p1 }
 0x585   : > { %p2314_p10 = pnand %p2313_p8, %p2307_p6 }
 0x587   : > { %2317 = shalt.err (!%p2314_p10)
}
 0x588   : > { %s2395_s26 = smov 256   ;;  %s2396_s15 = smov 16  }
 0x589   : > { %2140 = dma.vmem_to_hbm [thread:$0]  (%p3459_p2), %s3292_s12, 1024, %s3290_s19, %s1869_s9, %s2395_s26, %s2395_s26, %s2396_s15  }
 0x58a PF: > { %s1897_s20 = sand.u32 1, %s2352_s27   ;;  %p3460_p4 = scmp.ne.s32.totalorder %s3390_s18, 0 }
 0x58b   : > { %p3461_p12 = scmp.ge.s32.totalorder %s2364_s30, 2  ;;  %s1898_s6 = scalar_lea.sflag [#allocation5], %s1897_s20 }
 0x58d   : > { %p2154_p0 = pnand %p3461_p12, %p3460_p4 }
 0x58f   : > { %2347 = dma.done.wait (!%p2154_p0), %s1898_s6, 1024  }
 0x590   : > { %2349 = vsyncadd (!%p2154_p0), %s1898_s6, 4294966272  ;;  %p23_p7 = scmp.ge.s32.totalorder %s2467_s11, 4   ;;  %s3462_s27 = smov %s2356_s28 }
 0x591   : > { %s3463_s28 = smov %s2360_s29  ;;  %s3464_s29 = smov %s2479_s14 }
 0x592   : > { %s3465_s30 = smov %s2467_s11  ;;  %25 = sbr.rel (!%p23_p7) target bundleno = 10 (0xa), region = 107 }
 0x599   :  { %1903 = vsyncpa [#allocation4], 1 }
 0x59a   :  { %1905 = vsyncpa [#allocation4 + $0x1], 1 }
 0x59b   :  { %1906 = vsyncpa [#allocation5], 1 }
 0x59c   :  { %1908 = vsyncpa [#allocation5 + $0x1], 1 }
 0x59d   :  { %1909 = vsyncpa [#allocation6], 1 }
 0x59e   :  { %1911 = vsyncpa [#allocation6 + $0x1], 1 }
 0x59f   :  { %1912 = vsyncpa [#allocation9], 1 }

</bundles_post_ra>
